<compile_context>
chip_gen: v7x
topology: tpu7x:2x2x1
jax: 0.10.0
libtpu: 0.0.40
codegen_flags: <defaults>
</compile_context>

<pallas_src>
import functools

import numpy as np

import jax
import jax.numpy as jnp
from jax import lax
from jax.experimental import pallas as pl
from jax.experimental.pallas import tpu as pltpu


# ---------------------------------------------------------------------------
# Fused BasicBlock kernel: one batch image per grid step, everything on-chip.
# ---------------------------------------------------------------------------
def _basic_block_kernel(x_ref, w_ref, ss_ref, m_ref, o_ref, *, shifts, num_res_block):
    _, CH, HWp = x_ref.shape

    # Probe pltpu.roll's rotation convention once (uniform vreg of bools); the per-tap
    # select below then always yields  tap[:, p] == a[:, (p + s) mod HWp]  regardless
    # of the convention.  Cost: one roll + one compare for the whole kernel.
    lane = lax.broadcasted_iota(jnp.int32, (CH, HWp), 1)
    probe = pltpu.roll(lane, shift=1, axis=1)
    roll_fwd = probe == jnp.where(lane == 0, HWp - 1, lane - 1)   # == jnp.roll(lane, 1)

    def conv(a, layer, relu, residual=None):
        # a: (CH, HWp) activation.  One Conv2d(K, stride 1, pad K//2) with bias / folded
        # BN, optional residual add and optional ReLU, fully fused.
        rolled = {0: a}
        for s in shifts:                                   # 8 lane-rolls per conv (XLU)
            for k in {(-s) % HWp, s % HWp}:
                if k not in rolled:
                    rolled[k] = pltpu.roll(a, shift=k, axis=1)

        acc = None
        for t, s in enumerate(shifts):
            if s % HWp == 0:
                tap = a * m_ref[t]                         # centre tap: no shift needed
            else:
                tap = jnp.where(roll_fwd, rolled[(-s) % HWp], rolled[s % HWp]) * m_ref[t]
            contrib = jnp.dot(w_ref[layer, t], tap,        # (CH,CH) @ (CH,HWp) on MXU
                              preferred_element_type=jnp.float32)
            acc = contrib if acc is None else acc + contrib

        acc = acc * ss_ref[layer, 0] + ss_ref[layer, 1]    # bias / inference-BN fold
        if residual is not None:
            acc = acc + residual
        if relu:
            acc = jnp.maximum(acc, 0.0)
        return acc

    x = x_ref[0]                                           # (CH, HWp), lane-dense
    res = conv(x, 0, relu=True)                            # head conv + ReLU
    out = res
    layer = 1
    for _ in range(num_res_block):
        inner = conv(out, layer, relu=True)                # ResBlock conv1 (+BN, ReLU)
        layer += 1
        out = conv(inner, layer, relu=False, residual=out) # ResBlock conv2 (+BN) += in
        layer += 1
    out = conv(out, layer, relu=False, residual=res)       # tail conv (+BN) += head out

    o_ref[0] = out.astype(o_ref.dtype)                     # unmasked lane-dense store


# ---------------------------------------------------------------------------
# Wrapper glue
# ---------------------------------------------------------------------------
def _round_up(x, m):
    return (x + m - 1) // m * m


def _tap_masks_and_shifts(H, W, K, HW_pad):
    """Per-tap flat lane shift (dh*W + dw) and 0/1 validity mask over output pixels."""
    pad = K // 2
    HW = H * W
    p = np.arange(HW_pad)
    h, w = p // W, p % W
    valid_p = p < HW
    masks, shifts = [], []
    for kh in range(K):
        for kw in range(K):
            dh, dw = kh - pad, kw - pad
            ok = valid_p & (h + dh >= 0) & (h + dh < H) & (w + dw >= 0) & (w + dw < W)
            masks.append(ok.astype(np.float32))
            shifts.append(dh * W + dw)
    masks = np.stack(masks)[:, None, :]                    # (K*K, 1, HW_pad)
    return jnp.asarray(masks), tuple(shifts)


def basic_block_forward(x, params):
    """BasicBlock forward: conv+ReLU -> [ResBlock]*n -> conv+BN, with residual adds."""
    N, C, H, W = x.shape
    head = params["head"]
    O, _, K, _ = head["w"].shape
    KK = K * K
    HW = H * W
    HW_pad = _round_up(HW, 128)                            # lane-dense spatial axis
    CH = max(_round_up(C, 8), _round_up(O, 8))             # uniform padded channel count
    num_res_block = len(params["res_blocks"])

    layers = [head] + \
             [c for blk in params["res_blocks"] for c in (blk["c1"], blk["c2"])] + \
             [params["tail"]]
    L = len(layers)

    # ---- input: NCHW -> zero-padded lane-dense (N, CH, HW_pad) ----
    x_p = jnp.pad(x.reshape(N, C, HW).astype(jnp.float32),
                  ((0, 0), (0, CH - C), (0, HW_pad - HW)))

    # ---- per-layer, per-tap (CH_out, CH_in) weight slabs ----
    def layer_taps(w):
        O_, Cin = w.shape[0], w.shape[1]
        t = jnp.transpose(w, (2, 3, 0, 1)).reshape(KK, O_, Cin)   # tap index = kh*K + kw
        return jnp.pad(t, ((0, 0), (0, CH - O_), (0, CH - Cin)))
    w_all = jnp.stack([layer_taps(l["w"].astype(jnp.float32)) for l in layers])

    # ---- bias (+ folded inference-mode BatchNorm) -> per-channel scale / shift ----
    def fold(l):
        b = l["b"].astype(jnp.float32)
        bn = l.get("bn")
        if bn is None:
            return jnp.ones_like(b), b
        gamma, beta, mean, var, eps = bn
        scale = gamma / jnp.sqrt(var + eps)
        return scale, beta + (b - mean) * scale
    ss = jnp.stack([jnp.stack(fold(l)) for l in layers])          # (L, 2, O)
    ss = jnp.pad(ss, ((0, 0), (0, 0), (0, CH - O)))[..., None]    # (L, 2, CH, 1)

    masks, shifts = _tap_masks_and_shifts(H, W, K, HW_pad)        # (KK, 1, HWp), tuple

    kernel = functools.partial(_basic_block_kernel, shifts=shifts,
                               num_res_block=num_res_block)

    out = pl.pallas_call(
        kernel,
        out_shape=jax.ShapeDtypeStruct((N, CH, HW_pad), jnp.float32),
        grid=(N,),
        in_specs=[
            pl.BlockSpec((1, CH, HW_pad), lambda n: (n, 0, 0)),       # activation image
            pl.BlockSpec((L, KK, CH, CH), lambda n: (0, 0, 0, 0)),    # all conv weights
            pl.BlockSpec((L, 2, CH, 1), lambda n: (0, 0, 0, 0)),      # scale / shift
            pl.BlockSpec((KK, 1, HW_pad), lambda n: (0, 0, 0)),       # tap validity masks
        ],
        out_specs=pl.BlockSpec((1, CH, HW_pad), lambda n: (n, 0, 0)),
        compiler_params=pltpu.CompilerParams(
            dimension_semantics=("parallel",)),                       # batch across TCs
    )(x_p, w_all, ss, masks)

    return out[:, :O, :HW].reshape(N, O, H, W)            # drop pads: free XLA metadata


# ---------------------------------------------------------------------------
# Pure-JAX reference (for the in-script sanity check only)
# ---------------------------------------------------------------------------
def _ref_conv(x, w, b, bn, relu, residual):
    K = w.shape[-1]
    pad = K // 2
    y = lax.conv_general_dilated(
        x, w, window_strides=(1, 1), padding=[(pad, pad), (pad, pad)],
        dimension_numbers=("NCHW", "OIHW", "NCHW"))
    y = y + b.reshape(1, -1, 1, 1)
    if bn is not None:
        gamma, beta, mean, var, eps = bn
        scale = gamma / jnp.sqrt(var + eps)
        y = (y - mean.reshape(1, -1, 1, 1)) * scale.reshape(1, -1, 1, 1) \
            + beta.reshape(1, -1, 1, 1)
    if residual is not None:
        y = y + residual
    if relu:
        y = jnp.maximum(y, 0.0)
    return y


def basic_block_ref(x, params):
    head = params["head"]
    res = _ref_conv(x, head["w"], head["b"], None, True, None)
    out = res
    for blk in params["res_blocks"]:
        inner = _ref_conv(out, blk["c1"]["w"], blk["c1"]["b"], blk["c1"]["bn"], True, None)
        out = _ref_conv(inner, blk["c2"]["w"], blk["c2"]["b"], blk["c2"]["bn"], False, out)
    tail = params["tail"]
    out = _ref_conv(out, tail["w"], tail["b"], tail["bn"], False, res)
    return out


# ---------------------------------------------------------------------------
if __name__ == "__main__":
    batch, in_channels, out_channels = 2, 4, 8
    H = W = 16
    kernel_size = 3
    num_res_block = 2

    keys = jax.random.split(jax.random.PRNGKey(0), 3 + 2 * num_res_block)
    x = jax.random.normal(keys[0], (batch, in_channels, H, W), dtype=jnp.float32)

    def conv_params(k, cin, cout):
        # _conv init: weight ~ N(0, 0.02), bias = 0
        w = 0.02 * jax.random.normal(k, (cout, cin, kernel_size, kernel_size), jnp.float32)
        return {"w": w, "b": jnp.zeros((cout,), jnp.float32)}

    def bn_params(c):
        # PyTorch BatchNorm2d defaults: weight=1, bias=0, running_mean=0, running_var=1
        return (jnp.ones((c,), jnp.float32), jnp.zeros((c,), jnp.float32),
                jnp.zeros((c,), jnp.float32), jnp.ones((c,), jnp.float32), 1e-5)

    params = {"head": conv_params(keys[1], in_channels, out_channels),
              "res_blocks": [], "tail": None}
    ki = 2
    for _ in range(num_res_block):
        c1 = conv_params(keys[ki], out_channels, out_channels); ki += 1
        c1["bn"] = bn_params(out_channels)
        c2 = conv_params(keys[ki], out_channels, out_channels); ki += 1
        c2["bn"] = bn_params(out_channels)
        params["res_blocks"].append({"c1": c1, "c2": c2})
    tail = conv_params(keys[ki], out_channels, out_channels)
    tail["bn"] = bn_params(out_channels)
    params["tail"] = tail

    fwd = jax.jit(basic_block_forward)
    out = jax.block_until_ready(fwd(x, params))

    ref = basic_block_ref(x, params)
    assert out.shape == (batch, out_channels, H, W)
    assert jnp.allclose(out, ref, atol=1e-4, rtol=1e-4), \
        float(jnp.max(jnp.abs(out - ref)))

    print("KERNEL_OK")
</pallas_src>

<mosaic_0001>
module attributes {stable_mosaic.version = 11 : i64} {
  func.func @_basic_block_kernel(%arg0: i32, %arg1: memref<1x8x256xf32, #tpu.memory_space<vmem>>, %arg2: memref<6x9x8x8xf32, #tpu.memory_space<vmem>>, %arg3: memref<6x2x8x1xf32, #tpu.memory_space<vmem>>, %arg4: memref<9x1x256xf32, #tpu.memory_space<vmem>>, %arg5: memref<1x8x256xf32, #tpu.memory_space<vmem>>) attributes {dimension_semantics = [#tpu.dimension_semantics<parallel>], iteration_bounds = array<i64: 2>, scalar_prefetch = 0 : i64, scratch_operands = 0 : i64, tpu.core_type = #tpu.core_type<tc>, window_params = [{transform_indices = @transform_0, window_bounds = array<i64: 1, 8, 256>}, {pipeline_mode = #tpu.pipeline_mode<synchronous>, transform_indices = @transform_1, window_bounds = array<i64: 6, 9, 8, 8>}, {pipeline_mode = #tpu.pipeline_mode<synchronous>, transform_indices = @transform_2, window_bounds = array<i64: 6, 2, 8, 1>}, {pipeline_mode = #tpu.pipeline_mode<synchronous>, transform_indices = @transform_3, window_bounds = array<i64: 9, 1, 256>}, {transform_indices = @transform_4, window_bounds = array<i64: 1, 8, 256>}]} {
    %0 = tpu.iota {dimensions = array<i32: 1>} : vector<8x256xi32>
    %c1_i32 = arith.constant 1 : i32
    %1 = tpu.dynamic_rotate %0 by %c1_i32 dim 1 : vector<8x256xi32>, i32 -> vector<8x256xi32>
    %c0_i32 = arith.constant 0 : i32
    %2 = vector.broadcast %c0_i32 : i32 to vector<8x256xi32>
    %3 = arith.cmpi eq, %0, %2 : vector<8x256xi32>
    %c1_i32_0 = arith.constant 1 : i32
    %4 = vector.broadcast %c1_i32_0 : i32 to vector<8x256xi32>
    %5 = arith.subi %0, %4 : vector<8x256xi32>
    %c255_i32 = arith.constant 255 : i32
    %6 = vector.broadcast %c255_i32 : i32 to vector<8x256xi32>
    %7 = arith.select %3, %6, %5 : vector<8x256xi1>, vector<8x256xi32>
    %8 = arith.cmpi eq, %1, %7 : vector<8x256xi32>
    %c0 = arith.constant 0 : index
    %c0_1 = arith.constant 0 : index
    %c0_2 = arith.constant 0 : index
    %9 = vector.load %arg1[%c0, %c0_1, %c0_2] : memref<1x8x256xf32, #tpu.memory_space<vmem>>, vector<1x8x256xf32>
    %10 = vector.shape_cast %9 : vector<1x8x256xf32> to vector<8x256xf32>
    %c17_i32 = arith.constant 17 : i32
    %11 = tpu.dynamic_rotate %10 by %c17_i32 dim 1 : vector<8x256xf32>, i32 -> vector<8x256xf32>
    %c239_i32 = arith.constant 239 : i32
    %12 = tpu.dynamic_rotate %10 by %c239_i32 dim 1 : vector<8x256xf32>, i32 -> vector<8x256xf32>
    %c16_i32 = arith.constant 16 : i32
    %13 = tpu.dynamic_rotate %10 by %c16_i32 dim 1 : vector<8x256xf32>, i32 -> vector<8x256xf32>
    %c240_i32 = arith.constant 240 : i32
    %14 = tpu.dynamic_rotate %10 by %c240_i32 dim 1 : vector<8x256xf32>, i32 -> vector<8x256xf32>
    %c241_i32 = arith.constant 241 : i32
    %15 = tpu.dynamic_rotate %10 by %c241_i32 dim 1 : vector<8x256xf32>, i32 -> vector<8x256xf32>
    %c15_i32 = arith.constant 15 : i32
    %16 = tpu.dynamic_rotate %10 by %c15_i32 dim 1 : vector<8x256xf32>, i32 -> vector<8x256xf32>
    %c1_i32_3 = arith.constant 1 : i32
    %17 = tpu.dynamic_rotate %10 by %c1_i32_3 dim 1 : vector<8x256xf32>, i32 -> vector<8x256xf32>
    %c255_i32_4 = arith.constant 255 : i32
    %18 = tpu.dynamic_rotate %10 by %c255_i32_4 dim 1 : vector<8x256xf32>, i32 -> vector<8x256xf32>
    %19 = arith.select %8, %11, %12 : vector<8x256xi1>, vector<8x256xf32>
    %c0_5 = arith.constant 0 : index
    %c0_6 = arith.constant 0 : index
    %c0_7 = arith.constant 0 : index
    %20 = vector.load %arg4[%c0_5, %c0_6, %c0_7] : memref<9x1x256xf32, #tpu.memory_space<vmem>>, vector<1x1x256xf32>
    %21 = vector.shape_cast %20 : vector<1x1x256xf32> to vector<1x256xf32>
    %22 = vector.broadcast %21 : vector<1x256xf32> to vector<8x256xf32>
    %23 = arith.mulf %19, %22 : vector<8x256xf32>
    %c0_8 = arith.constant 0 : index
    %c0_9 = arith.constant 0 : index
    %c0_10 = arith.constant 0 : index
    %c0_11 = arith.constant 0 : index
    %24 = vector.load %arg2[%c0_8, %c0_9, %c0_10, %c0_11] : memref<6x9x8x8xf32, #tpu.memory_space<vmem>>, vector<1x1x8x8xf32>
    %25 = vector.shape_cast %24 : vector<1x1x8x8xf32> to vector<8x8xf32>
    %cst = arith.constant dense<0.000000e+00> : vector<8x256xf32>
    %26 = tpu.matmul %25, %23, %cst {dimension_numbers = #tpu.dot_dimension_numbers<[1], [0], [0], [1], [0, 0, 1, 1], [], []>} : vector<8x8xf32>, vector<8x256xf32>, vector<8x256xf32> -> vector<8x256xf32>
    %27 = arith.select %8, %13, %14 : vector<8x256xi1>, vector<8x256xf32>
    %c1 = arith.constant 1 : index
    %c0_12 = arith.constant 0 : index
    %c0_13 = arith.constant 0 : index
    %28 = vector.load %arg4[%c1, %c0_12, %c0_13] : memref<9x1x256xf32, #tpu.memory_space<vmem>>, vector<1x1x256xf32>
    %29 = vector.shape_cast %28 : vector<1x1x256xf32> to vector<1x256xf32>
    %30 = vector.broadcast %29 : vector<1x256xf32> to vector<8x256xf32>
    %31 = arith.mulf %27, %30 : vector<8x256xf32>
    %c0_14 = arith.constant 0 : index
    %c1_15 = arith.constant 1 : index
    %c0_16 = arith.constant 0 : index
    %c0_17 = arith.constant 0 : index
    %32 = vector.load %arg2[%c0_14, %c1_15, %c0_16, %c0_17] : memref<6x9x8x8xf32, #tpu.memory_space<vmem>>, vector<1x1x8x8xf32>
    %33 = vector.shape_cast %32 : vector<1x1x8x8xf32> to vector<8x8xf32>
    %cst_18 = arith.constant dense<0.000000e+00> : vector<8x256xf32>
    %34 = tpu.matmul %33, %31, %cst_18 {dimension_numbers = #tpu.dot_dimension_numbers<[1], [0], [0], [1], [0, 0, 1, 1], [], []>} : vector<8x8xf32>, vector<8x256xf32>, vector<8x256xf32> -> vector<8x256xf32>
    %35 = arith.addf %26, %34 : vector<8x256xf32>
    %36 = arith.select %8, %16, %15 : vector<8x256xi1>, vector<8x256xf32>
    %c2 = arith.constant 2 : index
    %c0_19 = arith.constant 0 : index
    %c0_20 = arith.constant 0 : index
    %37 = vector.load %arg4[%c2, %c0_19, %c0_20] : memref<9x1x256xf32, #tpu.memory_space<vmem>>, vector<1x1x256xf32>
    %38 = vector.shape_cast %37 : vector<1x1x256xf32> to vector<1x256xf32>
    %39 = vector.broadcast %38 : vector<1x256xf32> to vector<8x256xf32>
    %40 = arith.mulf %36, %39 : vector<8x256xf32>
    %c0_21 = arith.constant 0 : index
    %c2_22 = arith.constant 2 : index
    %c0_23 = arith.constant 0 : index
    %c0_24 = arith.constant 0 : index
    %41 = vector.load %arg2[%c0_21, %c2_22, %c0_23, %c0_24] : memref<6x9x8x8xf32, #tpu.memory_space<vmem>>, vector<1x1x8x8xf32>
    %42 = vector.shape_cast %41 : vector<1x1x8x8xf32> to vector<8x8xf32>
    %cst_25 = arith.constant dense<0.000000e+00> : vector<8x256xf32>
    %43 = tpu.matmul %42, %40, %cst_25 {dimension_numbers = #tpu.dot_dimension_numbers<[1], [0], [0], [1], [0, 0, 1, 1], [], []>} : vector<8x8xf32>, vector<8x256xf32>, vector<8x256xf32> -> vector<8x256xf32>
    %44 = arith.addf %35, %43 : vector<8x256xf32>
    %45 = arith.select %8, %17, %18 : vector<8x256xi1>, vector<8x256xf32>
    %c3 = arith.constant 3 : index
    %c0_26 = arith.constant 0 : index
    %c0_27 = arith.constant 0 : index
    %46 = vector.load %arg4[%c3, %c0_26, %c0_27] : memref<9x1x256xf32, #tpu.memory_space<vmem>>, vector<1x1x256xf32>
    %47 = vector.shape_cast %46 : vector<1x1x256xf32> to vector<1x256xf32>
    %48 = vector.broadcast %47 : vector<1x256xf32> to vector<8x256xf32>
    %49 = arith.mulf %45, %48 : vector<8x256xf32>
    %c0_28 = arith.constant 0 : index
    %c3_29 = arith.constant 3 : index
    %c0_30 = arith.constant 0 : index
    %c0_31 = arith.constant 0 : index
    %50 = vector.load %arg2[%c0_28, %c3_29, %c0_30, %c0_31] : memref<6x9x8x8xf32, #tpu.memory_space<vmem>>, vector<1x1x8x8xf32>
    %51 = vector.shape_cast %50 : vector<1x1x8x8xf32> to vector<8x8xf32>
    %cst_32 = arith.constant dense<0.000000e+00> : vector<8x256xf32>
    %52 = tpu.matmul %51, %49, %cst_32 {dimension_numbers = #tpu.dot_dimension_numbers<[1], [0], [0], [1], [0, 0, 1, 1], [], []>} : vector<8x8xf32>, vector<8x256xf32>, vector<8x256xf32> -> vector<8x256xf32>
    %53 = arith.addf %44, %52 : vector<8x256xf32>
    %c4 = arith.constant 4 : index
    %c0_33 = arith.constant 0 : index
    %c0_34 = arith.constant 0 : index
    %54 = vector.load %arg4[%c4, %c0_33, %c0_34] : memref<9x1x256xf32, #tpu.memory_space<vmem>>, vector<1x1x256xf32>
    %55 = vector.shape_cast %54 : vector<1x1x256xf32> to vector<1x256xf32>
    %56 = vector.broadcast %55 : vector<1x256xf32> to vector<8x256xf32>
    %57 = arith.mulf %10, %56 : vector<8x256xf32>
    %c0_35 = arith.constant 0 : index
    %c4_36 = arith.constant 4 : index
    %c0_37 = arith.constant 0 : index
    %c0_38 = arith.constant 0 : index
    %58 = vector.load %arg2[%c0_35, %c4_36, %c0_37, %c0_38] : memref<6x9x8x8xf32, #tpu.memory_space<vmem>>, vector<1x1x8x8xf32>
    %59 = vector.shape_cast %58 : vector<1x1x8x8xf32> to vector<8x8xf32>
    %cst_39 = arith.constant dense<0.000000e+00> : vector<8x256xf32>
    %60 = tpu.matmul %59, %57, %cst_39 {dimension_numbers = #tpu.dot_dimension_numbers<[1], [0], [0], [1], [0, 0, 1, 1], [], []>} : vector<8x8xf32>, vector<8x256xf32>, vector<8x256xf32> -> vector<8x256xf32>
    %61 = arith.addf %53, %60 : vector<8x256xf32>
    %62 = arith.select %8, %18, %17 : vector<8x256xi1>, vector<8x256xf32>
    %c5 = arith.constant 5 : index
    %c0_40 = arith.constant 0 : index
    %c0_41 = arith.constant 0 : index
    %63 = vector.load %arg4[%c5, %c0_40, %c0_41] : memref<9x1x256xf32, #tpu.memory_space<vmem>>, vector<1x1x256xf32>
    %64 = vector.shape_cast %63 : vector<1x1x256xf32> to vector<1x256xf32>
    %65 = vector.broadcast %64 : vector<1x256xf32> to vector<8x256xf32>
    %66 = arith.mulf %62, %65 : vector<8x256xf32>
    %c0_42 = arith.constant 0 : index
    %c5_43 = arith.constant 5 : index
    %c0_44 = arith.constant 0 : index
    %c0_45 = arith.constant 0 : index
    %67 = vector.load %arg2[%c0_42, %c5_43, %c0_44, %c0_45] : memref<6x9x8x8xf32, #tpu.memory_space<vmem>>, vector<1x1x8x8xf32>
    %68 = vector.shape_cast %67 : vector<1x1x8x8xf32> to vector<8x8xf32>
    %cst_46 = arith.constant dense<0.000000e+00> : vector<8x256xf32>
    %69 = tpu.matmul %68, %66, %cst_46 {dimension_numbers = #tpu.dot_dimension_numbers<[1], [0], [0], [1], [0, 0, 1, 1], [], []>} : vector<8x8xf32>, vector<8x256xf32>, vector<8x256xf32> -> vector<8x256xf32>
    %70 = arith.addf %61, %69 : vector<8x256xf32>
    %71 = arith.select %8, %15, %16 : vector<8x256xi1>, vector<8x256xf32>
    %c6 = arith.constant 6 : index
    %c0_47 = arith.constant 0 : index
    %c0_48 = arith.constant 0 : index
    %72 = vector.load %arg4[%c6, %c0_47, %c0_48] : memref<9x1x256xf32, #tpu.memory_space<vmem>>, vector<1x1x256xf32>
    %73 = vector.shape_cast %72 : vector<1x1x256xf32> to vector<1x256xf32>
    %74 = vector.broadcast %73 : vector<1x256xf32> to vector<8x256xf32>
    %75 = arith.mulf %71, %74 : vector<8x256xf32>
    %c0_49 = arith.constant 0 : index
    %c6_50 = arith.constant 6 : index
    %c0_51 = arith.constant 0 : index
    %c0_52 = arith.constant 0 : index
    %76 = vector.load %arg2[%c0_49, %c6_50, %c0_51, %c0_52] : memref<6x9x8x8xf32, #tpu.memory_space<vmem>>, vector<1x1x8x8xf32>
    %77 = vector.shape_cast %76 : vector<1x1x8x8xf32> to vector<8x8xf32>
    %cst_53 = arith.constant dense<0.000000e+00> : vector<8x256xf32>
    %78 = tpu.matmul %77, %75, %cst_53 {dimension_numbers = #tpu.dot_dimension_numbers<[1], [0], [0], [1], [0, 0, 1, 1], [], []>} : vector<8x8xf32>, vector<8x256xf32>, vector<8x256xf32> -> vector<8x256xf32>
    %79 = arith.addf %70, %78 : vector<8x256xf32>
    %80 = arith.select %8, %14, %13 : vector<8x256xi1>, vector<8x256xf32>
    %c7 = arith.constant 7 : index
    %c0_54 = arith.constant 0 : index
    %c0_55 = arith.constant 0 : index
    %81 = vector.load %arg4[%c7, %c0_54, %c0_55] : memref<9x1x256xf32, #tpu.memory_space<vmem>>, vector<1x1x256xf32>
    %82 = vector.shape_cast %81 : vector<1x1x256xf32> to vector<1x256xf32>
    %83 = vector.broadcast %82 : vector<1x256xf32> to vector<8x256xf32>
    %84 = arith.mulf %80, %83 : vector<8x256xf32>
    %c0_56 = arith.constant 0 : index
    %c7_57 = arith.constant 7 : index
    %c0_58 = arith.constant 0 : index
    %c0_59 = arith.constant 0 : index
    %85 = vector.load %arg2[%c0_56, %c7_57, %c0_58, %c0_59] : memref<6x9x8x8xf32, #tpu.memory_space<vmem>>, vector<1x1x8x8xf32>
    %86 = vector.shape_cast %85 : vector<1x1x8x8xf32> to vector<8x8xf32>
    %cst_60 = arith.constant dense<0.000000e+00> : vector<8x256xf32>
    %87 = tpu.matmul %86, %84, %cst_60 {dimension_numbers = #tpu.dot_dimension_numbers<[1], [0], [0], [1], [0, 0, 1, 1], [], []>} : vector<8x8xf32>, vector<8x256xf32>, vector<8x256xf32> -> vector<8x256xf32>
    %88 = arith.addf %79, %87 : vector<8x256xf32>
    %89 = arith.select %8, %12, %11 : vector<8x256xi1>, vector<8x256xf32>
    %c8 = arith.constant 8 : index
    %c0_61 = arith.constant 0 : index
    %c0_62 = arith.constant 0 : index
    %90 = vector.load %arg4[%c8, %c0_61, %c0_62] : memref<9x1x256xf32, #tpu.memory_space<vmem>>, vector<1x1x256xf32>
    %91 = vector.shape_cast %90 : vector<1x1x256xf32> to vector<1x256xf32>
    %92 = vector.broadcast %91 : vector<1x256xf32> to vector<8x256xf32>
    %93 = arith.mulf %89, %92 : vector<8x256xf32>
    %c0_63 = arith.constant 0 : index
    %c8_64 = arith.constant 8 : index
    %c0_65 = arith.constant 0 : index
    %c0_66 = arith.constant 0 : index
    %94 = vector.load %arg2[%c0_63, %c8_64, %c0_65, %c0_66] : memref<6x9x8x8xf32, #tpu.memory_space<vmem>>, vector<1x1x8x8xf32>
    %95 = vector.shape_cast %94 : vector<1x1x8x8xf32> to vector<8x8xf32>
    %cst_67 = arith.constant dense<0.000000e+00> : vector<8x256xf32>
    %96 = tpu.matmul %95, %93, %cst_67 {dimension_numbers = #tpu.dot_dimension_numbers<[1], [0], [0], [1], [0, 0, 1, 1], [], []>} : vector<8x8xf32>, vector<8x256xf32>, vector<8x256xf32> -> vector<8x256xf32>
    %97 = arith.addf %88, %96 : vector<8x256xf32>
    %c0_68 = arith.constant 0 : index
    %c0_69 = arith.constant 0 : index
    %c0_70 = arith.constant 0 : index
    %c0_71 = arith.constant 0 : index
    %98 = vector.load %arg3[%c0_68, %c0_69, %c0_70, %c0_71] : memref<6x2x8x1xf32, #tpu.memory_space<vmem>>, vector<1x1x8x1xf32>
    %99 = vector.shape_cast %98 : vector<1x1x8x1xf32> to vector<8x1xf32>
    %100 = vector.broadcast %99 : vector<8x1xf32> to vector<8x256xf32>
    %101 = arith.mulf %97, %100 : vector<8x256xf32>
    %c0_72 = arith.constant 0 : index
    %c1_73 = arith.constant 1 : index
    %c0_74 = arith.constant 0 : index
    %c0_75 = arith.constant 0 : index
    %102 = vector.load %arg3[%c0_72, %c1_73, %c0_74, %c0_75] : memref<6x2x8x1xf32, #tpu.memory_space<vmem>>, vector<1x1x8x1xf32>
    %103 = vector.shape_cast %102 : vector<1x1x8x1xf32> to vector<8x1xf32>
    %104 = vector.broadcast %103 : vector<8x1xf32> to vector<8x256xf32>
    %105 = arith.addf %101, %104 : vector<8x256xf32>
    %cst_76 = arith.constant 0.000000e+00 : f32
    %106 = vector.broadcast %cst_76 : f32 to vector<8x256xf32>
    %107 = arith.maximumf %105, %106 : vector<8x256xf32>
    %c17_i32_77 = arith.constant 17 : i32
    %108 = tpu.dynamic_rotate %107 by %c17_i32_77 dim 1 : vector<8x256xf32>, i32 -> vector<8x256xf32>
    %c239_i32_78 = arith.constant 239 : i32
    %109 = tpu.dynamic_rotate %107 by %c239_i32_78 dim 1 : vector<8x256xf32>, i32 -> vector<8x256xf32>
    %c16_i32_79 = arith.constant 16 : i32
    %110 = tpu.dynamic_rotate %107 by %c16_i32_79 dim 1 : vector<8x256xf32>, i32 -> vector<8x256xf32>
    %c240_i32_80 = arith.constant 240 : i32
    %111 = tpu.dynamic_rotate %107 by %c240_i32_80 dim 1 : vector<8x256xf32>, i32 -> vector<8x256xf32>
    %c241_i32_81 = arith.constant 241 : i32
    %112 = tpu.dynamic_rotate %107 by %c241_i32_81 dim 1 : vector<8x256xf32>, i32 -> vector<8x256xf32>
    %c15_i32_82 = arith.constant 15 : i32
    %113 = tpu.dynamic_rotate %107 by %c15_i32_82 dim 1 : vector<8x256xf32>, i32 -> vector<8x256xf32>
    %c1_i32_83 = arith.constant 1 : i32
    %114 = tpu.dynamic_rotate %107 by %c1_i32_83 dim 1 : vector<8x256xf32>, i32 -> vector<8x256xf32>
    %c255_i32_84 = arith.constant 255 : i32
    %115 = tpu.dynamic_rotate %107 by %c255_i32_84 dim 1 : vector<8x256xf32>, i32 -> vector<8x256xf32>
    %116 = arith.select %8, %108, %109 : vector<8x256xi1>, vector<8x256xf32>
    %c0_85 = arith.constant 0 : index
    %c0_86 = arith.constant 0 : index
    %c0_87 = arith.constant 0 : index
    %117 = vector.load %arg4[%c0_85, %c0_86, %c0_87] : memref<9x1x256xf32, #tpu.memory_space<vmem>>, vector<1x1x256xf32>
    %118 = vector.shape_cast %117 : vector<1x1x256xf32> to vector<1x256xf32>
    %119 = vector.broadcast %118 : vector<1x256xf32> to vector<8x256xf32>
    %120 = arith.mulf %116, %119 : vector<8x256xf32>
    %c1_88 = arith.constant 1 : index
    %c0_89 = arith.constant 0 : index
    %c0_90 = arith.constant 0 : index
    %c0_91 = arith.constant 0 : index
    %121 = vector.load %arg2[%c1_88, %c0_89, %c0_90, %c0_91] : memref<6x9x8x8xf32, #tpu.memory_space<vmem>>, vector<1x1x8x8xf32>
    %122 = vector.shape_cast %121 : vector<1x1x8x8xf32> to vector<8x8xf32>
    %cst_92 = arith.constant dense<0.000000e+00> : vector<8x256xf32>
    %123 = tpu.matmul %122, %120, %cst_92 {dimension_numbers = #tpu.dot_dimension_numbers<[1], [0], [0], [1], [0, 0, 1, 1], [], []>} : vector<8x8xf32>, vector<8x256xf32>, vector<8x256xf32> -> vector<8x256xf32>
    %124 = arith.select %8, %110, %111 : vector<8x256xi1>, vector<8x256xf32>
    %c1_93 = arith.constant 1 : index
    %c0_94 = arith.constant 0 : index
    %c0_95 = arith.constant 0 : index
    %125 = vector.load %arg4[%c1_93, %c0_94, %c0_95] : memref<9x1x256xf32, #tpu.memory_space<vmem>>, vector<1x1x256xf32>
    %126 = vector.shape_cast %125 : vector<1x1x256xf32> to vector<1x256xf32>
    %127 = vector.broadcast %126 : vector<1x256xf32> to vector<8x256xf32>
    %128 = arith.mulf %124, %127 : vector<8x256xf32>
    %c1_96 = arith.constant 1 : index
    %c1_97 = arith.constant 1 : index
    %c0_98 = arith.constant 0 : index
    %c0_99 = arith.constant 0 : index
    %129 = vector.load %arg2[%c1_96, %c1_97, %c0_98, %c0_99] : memref<6x9x8x8xf32, #tpu.memory_space<vmem>>, vector<1x1x8x8xf32>
    %130 = vector.shape_cast %129 : vector<1x1x8x8xf32> to vector<8x8xf32>
    %cst_100 = arith.constant dense<0.000000e+00> : vector<8x256xf32>
    %131 = tpu.matmul %130, %128, %cst_100 {dimension_numbers = #tpu.dot_dimension_numbers<[1], [0], [0], [1], [0, 0, 1, 1], [], []>} : vector<8x8xf32>, vector<8x256xf32>, vector<8x256xf32> -> vector<8x256xf32>
    %132 = arith.addf %123, %131 : vector<8x256xf32>
    %133 = arith.select %8, %113, %112 : vector<8x256xi1>, vector<8x256xf32>
    %c2_101 = arith.constant 2 : index
    %c0_102 = arith.constant 0 : index
    %c0_103 = arith.constant 0 : index
    %134 = vector.load %arg4[%c2_101, %c0_102, %c0_103] : memref<9x1x256xf32, #tpu.memory_space<vmem>>, vector<1x1x256xf32>
    %135 = vector.shape_cast %134 : vector<1x1x256xf32> to vector<1x256xf32>
    %136 = vector.broadcast %135 : vector<1x256xf32> to vector<8x256xf32>
    %137 = arith.mulf %133, %136 : vector<8x256xf32>
    %c1_104 = arith.constant 1 : index
    %c2_105 = arith.constant 2 : index
    %c0_106 = arith.constant 0 : index
    %c0_107 = arith.constant 0 : index
    %138 = vector.load %arg2[%c1_104, %c2_105, %c0_106, %c0_107] : memref<6x9x8x8xf32, #tpu.memory_space<vmem>>, vector<1x1x8x8xf32>
    %139 = vector.shape_cast %138 : vector<1x1x8x8xf32> to vector<8x8xf32>
    %cst_108 = arith.constant dense<0.000000e+00> : vector<8x256xf32>
    %140 = tpu.matmul %139, %137, %cst_108 {dimension_numbers = #tpu.dot_dimension_numbers<[1], [0], [0], [1], [0, 0, 1, 1], [], []>} : vector<8x8xf32>, vector<8x256xf32>, vector<8x256xf32> -> vector<8x256xf32>
    %141 = arith.addf %132, %140 : vector<8x256xf32>
    %142 = arith.select %8, %114, %115 : vector<8x256xi1>, vector<8x256xf32>
    %c3_109 = arith.constant 3 : index
    %c0_110 = arith.constant 0 : index
    %c0_111 = arith.constant 0 : index
    %143 = vector.load %arg4[%c3_109, %c0_110, %c0_111] : memref<9x1x256xf32, #tpu.memory_space<vmem>>, vector<1x1x256xf32>
    %144 = vector.shape_cast %143 : vector<1x1x256xf32> to vector<1x256xf32>
    %145 = vector.broadcast %144 : vector<1x256xf32> to vector<8x256xf32>
    %146 = arith.mulf %142, %145 : vector<8x256xf32>
    %c1_112 = arith.constant 1 : index
    %c3_113 = arith.constant 3 : index
    %c0_114 = arith.constant 0 : index
    %c0_115 = arith.constant 0 : index
    %147 = vector.load %arg2[%c1_112, %c3_113, %c0_114, %c0_115] : memref<6x9x8x8xf32, #tpu.memory_space<vmem>>, vector<1x1x8x8xf32>
    %148 = vector.shape_cast %147 : vector<1x1x8x8xf32> to vector<8x8xf32>
    %cst_116 = arith.constant dense<0.000000e+00> : vector<8x256xf32>
    %149 = tpu.matmul %148, %146, %cst_116 {dimension_numbers = #tpu.dot_dimension_numbers<[1], [0], [0], [1], [0, 0, 1, 1], [], []>} : vector<8x8xf32>, vector<8x256xf32>, vector<8x256xf32> -> vector<8x256xf32>
    %150 = arith.addf %141, %149 : vector<8x256xf32>
    %c4_117 = arith.constant 4 : index
    %c0_118 = arith.constant 0 : index
    %c0_119 = arith.constant 0 : index
    %151 = vector.load %arg4[%c4_117, %c0_118, %c0_119] : memref<9x1x256xf32, #tpu.memory_space<vmem>>, vector<1x1x256xf32>
    %152 = vector.shape_cast %151 : vector<1x1x256xf32> to vector<1x256xf32>
    %153 = vector.broadcast %152 : vector<1x256xf32> to vector<8x256xf32>
    %154 = arith.mulf %107, %153 : vector<8x256xf32>
    %c1_120 = arith.constant 1 : index
    %c4_121 = arith.constant 4 : index
    %c0_122 = arith.constant 0 : index
    %c0_123 = arith.constant 0 : index
    %155 = vector.load %arg2[%c1_120, %c4_121, %c0_122, %c0_123] : memref<6x9x8x8xf32, #tpu.memory_space<vmem>>, vector<1x1x8x8xf32>
    %156 = vector.shape_cast %155 : vector<1x1x8x8xf32> to vector<8x8xf32>
    %cst_124 = arith.constant dense<0.000000e+00> : vector<8x256xf32>
    %157 = tpu.matmul %156, %154, %cst_124 {dimension_numbers = #tpu.dot_dimension_numbers<[1], [0], [0], [1], [0, 0, 1, 1], [], []>} : vector<8x8xf32>, vector<8x256xf32>, vector<8x256xf32> -> vector<8x256xf32>
    %158 = arith.addf %150, %157 : vector<8x256xf32>
    %159 = arith.select %8, %115, %114 : vector<8x256xi1>, vector<8x256xf32>
    %c5_125 = arith.constant 5 : index
    %c0_126 = arith.constant 0 : index
    %c0_127 = arith.constant 0 : index
    %160 = vector.load %arg4[%c5_125, %c0_126, %c0_127] : memref<9x1x256xf32, #tpu.memory_space<vmem>>, vector<1x1x256xf32>
    %161 = vector.shape_cast %160 : vector<1x1x256xf32> to vector<1x256xf32>
    %162 = vector.broadcast %161 : vector<1x256xf32> to vector<8x256xf32>
    %163 = arith.mulf %159, %162 : vector<8x256xf32>
    %c1_128 = arith.constant 1 : index
    %c5_129 = arith.constant 5 : index
    %c0_130 = arith.constant 0 : index
    %c0_131 = arith.constant 0 : index
    %164 = vector.load %arg2[%c1_128, %c5_129, %c0_130, %c0_131] : memref<6x9x8x8xf32, #tpu.memory_space<vmem>>, vector<1x1x8x8xf32>
    %165 = vector.shape_cast %164 : vector<1x1x8x8xf32> to vector<8x8xf32>
    %cst_132 = arith.constant dense<0.000000e+00> : vector<8x256xf32>
    %166 = tpu.matmul %165, %163, %cst_132 {dimension_numbers = #tpu.dot_dimension_numbers<[1], [0], [0], [1], [0, 0, 1, 1], [], []>} : vector<8x8xf32>, vector<8x256xf32>, vector<8x256xf32> -> vector<8x256xf32>
    %167 = arith.addf %158, %166 : vector<8x256xf32>
    %168 = arith.select %8, %112, %113 : vector<8x256xi1>, vector<8x256xf32>
    %c6_133 = arith.constant 6 : index
    %c0_134 = arith.constant 0 : index
    %c0_135 = arith.constant 0 : index
    %169 = vector.load %arg4[%c6_133, %c0_134, %c0_135] : memref<9x1x256xf32, #tpu.memory_space<vmem>>, vector<1x1x256xf32>
    %170 = vector.shape_cast %169 : vector<1x1x256xf32> to vector<1x256xf32>
    %171 = vector.broadcast %170 : vector<1x256xf32> to vector<8x256xf32>
    %172 = arith.mulf %168, %171 : vector<8x256xf32>
    %c1_136 = arith.constant 1 : index
    %c6_137 = arith.constant 6 : index
    %c0_138 = arith.constant 0 : index
    %c0_139 = arith.constant 0 : index
    %173 = vector.load %arg2[%c1_136, %c6_137, %c0_138, %c0_139] : memref<6x9x8x8xf32, #tpu.memory_space<vmem>>, vector<1x1x8x8xf32>
    %174 = vector.shape_cast %173 : vector<1x1x8x8xf32> to vector<8x8xf32>
    %cst_140 = arith.constant dense<0.000000e+00> : vector<8x256xf32>
    %175 = tpu.matmul %174, %172, %cst_140 {dimension_numbers = #tpu.dot_dimension_numbers<[1], [0], [0], [1], [0, 0, 1, 1], [], []>} : vector<8x8xf32>, vector<8x256xf32>, vector<8x256xf32> -> vector<8x256xf32>
    %176 = arith.addf %167, %175 : vector<8x256xf32>
    %177 = arith.select %8, %111, %110 : vector<8x256xi1>, vector<8x256xf32>
    %c7_141 = arith.constant 7 : index
    %c0_142 = arith.constant 0 : index
    %c0_143 = arith.constant 0 : index
    %178 = vector.load %arg4[%c7_141, %c0_142, %c0_143] : memref<9x1x256xf32, #tpu.memory_space<vmem>>, vector<1x1x256xf32>
    %179 = vector.shape_cast %178 : vector<1x1x256xf32> to vector<1x256xf32>
    %180 = vector.broadcast %179 : vector<1x256xf32> to vector<8x256xf32>
    %181 = arith.mulf %177, %180 : vector<8x256xf32>
    %c1_144 = arith.constant 1 : index
    %c7_145 = arith.constant 7 : index
    %c0_146 = arith.constant 0 : index
    %c0_147 = arith.constant 0 : index
    %182 = vector.load %arg2[%c1_144, %c7_145, %c0_146, %c0_147] : memref<6x9x8x8xf32, #tpu.memory_space<vmem>>, vector<1x1x8x8xf32>
    %183 = vector.shape_cast %182 : vector<1x1x8x8xf32> to vector<8x8xf32>
    %cst_148 = arith.constant dense<0.000000e+00> : vector<8x256xf32>
    %184 = tpu.matmul %183, %181, %cst_148 {dimension_numbers = #tpu.dot_dimension_numbers<[1], [0], [0], [1], [0, 0, 1, 1], [], []>} : vector<8x8xf32>, vector<8x256xf32>, vector<8x256xf32> -> vector<8x256xf32>
    %185 = arith.addf %176, %184 : vector<8x256xf32>
    %186 = arith.select %8, %109, %108 : vector<8x256xi1>, vector<8x256xf32>
    %c8_149 = arith.constant 8 : index
    %c0_150 = arith.constant 0 : index
    %c0_151 = arith.constant 0 : index
    %187 = vector.load %arg4[%c8_149, %c0_150, %c0_151] : memref<9x1x256xf32, #tpu.memory_space<vmem>>, vector<1x1x256xf32>
    %188 = vector.shape_cast %187 : vector<1x1x256xf32> to vector<1x256xf32>
    %189 = vector.broadcast %188 : vector<1x256xf32> to vector<8x256xf32>
    %190 = arith.mulf %186, %189 : vector<8x256xf32>
    %c1_152 = arith.constant 1 : index
    %c8_153 = arith.constant 8 : index
    %c0_154 = arith.constant 0 : index
    %c0_155 = arith.constant 0 : index
    %191 = vector.load %arg2[%c1_152, %c8_153, %c0_154, %c0_155] : memref<6x9x8x8xf32, #tpu.memory_space<vmem>>, vector<1x1x8x8xf32>
    %192 = vector.shape_cast %191 : vector<1x1x8x8xf32> to vector<8x8xf32>
    %cst_156 = arith.constant dense<0.000000e+00> : vector<8x256xf32>
    %193 = tpu.matmul %192, %190, %cst_156 {dimension_numbers = #tpu.dot_dimension_numbers<[1], [0], [0], [1], [0, 0, 1, 1], [], []>} : vector<8x8xf32>, vector<8x256xf32>, vector<8x256xf32> -> vector<8x256xf32>
    %194 = arith.addf %185, %193 : vector<8x256xf32>
    %c1_157 = arith.constant 1 : index
    %c0_158 = arith.constant 0 : index
    %c0_159 = arith.constant 0 : index
    %c0_160 = arith.constant 0 : index
    %195 = vector.load %arg3[%c1_157, %c0_158, %c0_159, %c0_160] : memref<6x2x8x1xf32, #tpu.memory_space<vmem>>, vector<1x1x8x1xf32>
    %196 = vector.shape_cast %195 : vector<1x1x8x1xf32> to vector<8x1xf32>
    %197 = vector.broadcast %196 : vector<8x1xf32> to vector<8x256xf32>
    %198 = arith.mulf %194, %197 : vector<8x256xf32>
    %c1_161 = arith.constant 1 : index
    %c1_162 = arith.constant 1 : index
    %c0_163 = arith.constant 0 : index
    %c0_164 = arith.constant 0 : index
    %199 = vector.load %arg3[%c1_161, %c1_162, %c0_163, %c0_164] : memref<6x2x8x1xf32, #tpu.memory_space<vmem>>, vector<1x1x8x1xf32>
    %200 = vector.shape_cast %199 : vector<1x1x8x1xf32> to vector<8x1xf32>
    %201 = vector.broadcast %200 : vector<8x1xf32> to vector<8x256xf32>
    %202 = arith.addf %198, %201 : vector<8x256xf32>
    %cst_165 = arith.constant 0.000000e+00 : f32
    %203 = vector.broadcast %cst_165 : f32 to vector<8x256xf32>
    %204 = arith.maximumf %202, %203 : vector<8x256xf32>
    %c17_i32_166 = arith.constant 17 : i32
    %205 = tpu.dynamic_rotate %204 by %c17_i32_166 dim 1 : vector<8x256xf32>, i32 -> vector<8x256xf32>
    %c239_i32_167 = arith.constant 239 : i32
    %206 = tpu.dynamic_rotate %204 by %c239_i32_167 dim 1 : vector<8x256xf32>, i32 -> vector<8x256xf32>
    %c16_i32_168 = arith.constant 16 : i32
    %207 = tpu.dynamic_rotate %204 by %c16_i32_168 dim 1 : vector<8x256xf32>, i32 -> vector<8x256xf32>
    %c240_i32_169 = arith.constant 240 : i32
    %208 = tpu.dynamic_rotate %204 by %c240_i32_169 dim 1 : vector<8x256xf32>, i32 -> vector<8x256xf32>
    %c241_i32_170 = arith.constant 241 : i32
    %209 = tpu.dynamic_rotate %204 by %c241_i32_170 dim 1 : vector<8x256xf32>, i32 -> vector<8x256xf32>
    %c15_i32_171 = arith.constant 15 : i32
    %210 = tpu.dynamic_rotate %204 by %c15_i32_171 dim 1 : vector<8x256xf32>, i32 -> vector<8x256xf32>
    %c1_i32_172 = arith.constant 1 : i32
    %211 = tpu.dynamic_rotate %204 by %c1_i32_172 dim 1 : vector<8x256xf32>, i32 -> vector<8x256xf32>
    %c255_i32_173 = arith.constant 255 : i32
    %212 = tpu.dynamic_rotate %204 by %c255_i32_173 dim 1 : vector<8x256xf32>, i32 -> vector<8x256xf32>
    %213 = arith.select %8, %205, %206 : vector<8x256xi1>, vector<8x256xf32>
    %c0_174 = arith.constant 0 : index
    %c0_175 = arith.constant 0 : index
    %c0_176 = arith.constant 0 : index
    %214 = vector.load %arg4[%c0_174, %c0_175, %c0_176] : memref<9x1x256xf32, #tpu.memory_space<vmem>>, vector<1x1x256xf32>
    %215 = vector.shape_cast %214 : vector<1x1x256xf32> to vector<1x256xf32>
    %216 = vector.broadcast %215 : vector<1x256xf32> to vector<8x256xf32>
    %217 = arith.mulf %213, %216 : vector<8x256xf32>
    %c2_177 = arith.constant 2 : index
    %c0_178 = arith.constant 0 : index
    %c0_179 = arith.constant 0 : index
    %c0_180 = arith.constant 0 : index
    %218 = vector.load %arg2[%c2_177, %c0_178, %c0_179, %c0_180] : memref<6x9x8x8xf32, #tpu.memory_space<vmem>>, vector<1x1x8x8xf32>
    %219 = vector.shape_cast %218 : vector<1x1x8x8xf32> to vector<8x8xf32>
    %cst_181 = arith.constant dense<0.000000e+00> : vector<8x256xf32>
    %220 = tpu.matmul %219, %217, %cst_181 {dimension_numbers = #tpu.dot_dimension_numbers<[1], [0], [0], [1], [0, 0, 1, 1], [], []>} : vector<8x8xf32>, vector<8x256xf32>, vector<8x256xf32> -> vector<8x256xf32>
    %221 = arith.select %8, %207, %208 : vector<8x256xi1>, vector<8x256xf32>
    %c1_182 = arith.constant 1 : index
    %c0_183 = arith.constant 0 : index
    %c0_184 = arith.constant 0 : index
    %222 = vector.load %arg4[%c1_182, %c0_183, %c0_184] : memref<9x1x256xf32, #tpu.memory_space<vmem>>, vector<1x1x256xf32>
    %223 = vector.shape_cast %222 : vector<1x1x256xf32> to vector<1x256xf32>
    %224 = vector.broadcast %223 : vector<1x256xf32> to vector<8x256xf32>
    %225 = arith.mulf %221, %224 : vector<8x256xf32>
    %c2_185 = arith.constant 2 : index
    %c1_186 = arith.constant 1 : index
    %c0_187 = arith.constant 0 : index
    %c0_188 = arith.constant 0 : index
    %226 = vector.load %arg2[%c2_185, %c1_186, %c0_187, %c0_188] : memref<6x9x8x8xf32, #tpu.memory_space<vmem>>, vector<1x1x8x8xf32>
    %227 = vector.shape_cast %226 : vector<1x1x8x8xf32> to vector<8x8xf32>
    %cst_189 = arith.constant dense<0.000000e+00> : vector<8x256xf32>
    %228 = tpu.matmul %227, %225, %cst_189 {dimension_numbers = #tpu.dot_dimension_numbers<[1], [0], [0], [1], [0, 0, 1, 1], [], []>} : vector<8x8xf32>, vector<8x256xf32>, vector<8x256xf32> -> vector<8x256xf32>
    %229 = arith.addf %220, %228 : vector<8x256xf32>
    %230 = arith.select %8, %210, %209 : vector<8x256xi1>, vector<8x256xf32>
    %c2_190 = arith.constant 2 : index
    %c0_191 = arith.constant 0 : index
    %c0_192 = arith.constant 0 : index
    %231 = vector.load %arg4[%c2_190, %c0_191, %c0_192] : memref<9x1x256xf32, #tpu.memory_space<vmem>>, vector<1x1x256xf32>
    %232 = vector.shape_cast %231 : vector<1x1x256xf32> to vector<1x256xf32>
    %233 = vector.broadcast %232 : vector<1x256xf32> to vector<8x256xf32>
    %234 = arith.mulf %230, %233 : vector<8x256xf32>
    %c2_193 = arith.constant 2 : index
    %c2_194 = arith.constant 2 : index
    %c0_195 = arith.constant 0 : index
    %c0_196 = arith.constant 0 : index
    %235 = vector.load %arg2[%c2_193, %c2_194, %c0_195, %c0_196] : memref<6x9x8x8xf32, #tpu.memory_space<vmem>>, vector<1x1x8x8xf32>
    %236 = vector.shape_cast %235 : vector<1x1x8x8xf32> to vector<8x8xf32>
    %cst_197 = arith.constant dense<0.000000e+00> : vector<8x256xf32>
    %237 = tpu.matmul %236, %234, %cst_197 {dimension_numbers = #tpu.dot_dimension_numbers<[1], [0], [0], [1], [0, 0, 1, 1], [], []>} : vector<8x8xf32>, vector<8x256xf32>, vector<8x256xf32> -> vector<8x256xf32>
    %238 = arith.addf %229, %237 : vector<8x256xf32>
    %239 = arith.select %8, %211, %212 : vector<8x256xi1>, vector<8x256xf32>
    %c3_198 = arith.constant 3 : index
    %c0_199 = arith.constant 0 : index
    %c0_200 = arith.constant 0 : index
    %240 = vector.load %arg4[%c3_198, %c0_199, %c0_200] : memref<9x1x256xf32, #tpu.memory_space<vmem>>, vector<1x1x256xf32>
    %241 = vector.shape_cast %240 : vector<1x1x256xf32> to vector<1x256xf32>
    %242 = vector.broadcast %241 : vector<1x256xf32> to vector<8x256xf32>
    %243 = arith.mulf %239, %242 : vector<8x256xf32>
    %c2_201 = arith.constant 2 : index
    %c3_202 = arith.constant 3 : index
    %c0_203 = arith.constant 0 : index
    %c0_204 = arith.constant 0 : index
    %244 = vector.load %arg2[%c2_201, %c3_202, %c0_203, %c0_204] : memref<6x9x8x8xf32, #tpu.memory_space<vmem>>, vector<1x1x8x8xf32>
    %245 = vector.shape_cast %244 : vector<1x1x8x8xf32> to vector<8x8xf32>
    %cst_205 = arith.constant dense<0.000000e+00> : vector<8x256xf32>
    %246 = tpu.matmul %245, %243, %cst_205 {dimension_numbers = #tpu.dot_dimension_numbers<[1], [0], [0], [1], [0, 0, 1, 1], [], []>} : vector<8x8xf32>, vector<8x256xf32>, vector<8x256xf32> -> vector<8x256xf32>
    %247 = arith.addf %238, %246 : vector<8x256xf32>
    %c4_206 = arith.constant 4 : index
    %c0_207 = arith.constant 0 : index
    %c0_208 = arith.constant 0 : index
    %248 = vector.load %arg4[%c4_206, %c0_207, %c0_208] : memref<9x1x256xf32, #tpu.memory_space<vmem>>, vector<1x1x256xf32>
    %249 = vector.shape_cast %248 : vector<1x1x256xf32> to vector<1x256xf32>
    %250 = vector.broadcast %249 : vector<1x256xf32> to vector<8x256xf32>
    %251 = arith.mulf %204, %250 : vector<8x256xf32>
    %c2_209 = arith.constant 2 : index
    %c4_210 = arith.constant 4 : index
    %c0_211 = arith.constant 0 : index
    %c0_212 = arith.constant 0 : index
    %252 = vector.load %arg2[%c2_209, %c4_210, %c0_211, %c0_212] : memref<6x9x8x8xf32, #tpu.memory_space<vmem>>, vector<1x1x8x8xf32>
    %253 = vector.shape_cast %252 : vector<1x1x8x8xf32> to vector<8x8xf32>
    %cst_213 = arith.constant dense<0.000000e+00> : vector<8x256xf32>
    %254 = tpu.matmul %253, %251, %cst_213 {dimension_numbers = #tpu.dot_dimension_numbers<[1], [0], [0], [1], [0, 0, 1, 1], [], []>} : vector<8x8xf32>, vector<8x256xf32>, vector<8x256xf32> -> vector<8x256xf32>
    %255 = arith.addf %247, %254 : vector<8x256xf32>
    %256 = arith.select %8, %212, %211 : vector<8x256xi1>, vector<8x256xf32>
    %c5_214 = arith.constant 5 : index
    %c0_215 = arith.constant 0 : index
    %c0_216 = arith.constant 0 : index
    %257 = vector.load %arg4[%c5_214, %c0_215, %c0_216] : memref<9x1x256xf32, #tpu.memory_space<vmem>>, vector<1x1x256xf32>
    %258 = vector.shape_cast %257 : vector<1x1x256xf32> to vector<1x256xf32>
    %259 = vector.broadcast %258 : vector<1x256xf32> to vector<8x256xf32>
    %260 = arith.mulf %256, %259 : vector<8x256xf32>
    %c2_217 = arith.constant 2 : index
    %c5_218 = arith.constant 5 : index
    %c0_219 = arith.constant 0 : index
    %c0_220 = arith.constant 0 : index
    %261 = vector.load %arg2[%c2_217, %c5_218, %c0_219, %c0_220] : memref<6x9x8x8xf32, #tpu.memory_space<vmem>>, vector<1x1x8x8xf32>
    %262 = vector.shape_cast %261 : vector<1x1x8x8xf32> to vector<8x8xf32>
    %cst_221 = arith.constant dense<0.000000e+00> : vector<8x256xf32>
    %263 = tpu.matmul %262, %260, %cst_221 {dimension_numbers = #tpu.dot_dimension_numbers<[1], [0], [0], [1], [0, 0, 1, 1], [], []>} : vector<8x8xf32>, vector<8x256xf32>, vector<8x256xf32> -> vector<8x256xf32>
    %264 = arith.addf %255, %263 : vector<8x256xf32>
    %265 = arith.select %8, %209, %210 : vector<8x256xi1>, vector<8x256xf32>
    %c6_222 = arith.constant 6 : index
    %c0_223 = arith.constant 0 : index
    %c0_224 = arith.constant 0 : index
    %266 = vector.load %arg4[%c6_222, %c0_223, %c0_224] : memref<9x1x256xf32, #tpu.memory_space<vmem>>, vector<1x1x256xf32>
    %267 = vector.shape_cast %266 : vector<1x1x256xf32> to vector<1x256xf32>
    %268 = vector.broadcast %267 : vector<1x256xf32> to vector<8x256xf32>
    %269 = arith.mulf %265, %268 : vector<8x256xf32>
    %c2_225 = arith.constant 2 : index
    %c6_226 = arith.constant 6 : index
    %c0_227 = arith.constant 0 : index
    %c0_228 = arith.constant 0 : index
    %270 = vector.load %arg2[%c2_225, %c6_226, %c0_227, %c0_228] : memref<6x9x8x8xf32, #tpu.memory_space<vmem>>, vector<1x1x8x8xf32>
    %271 = vector.shape_cast %270 : vector<1x1x8x8xf32> to vector<8x8xf32>
    %cst_229 = arith.constant dense<0.000000e+00> : vector<8x256xf32>
    %272 = tpu.matmul %271, %269, %cst_229 {dimension_numbers = #tpu.dot_dimension_numbers<[1], [0], [0], [1], [0, 0, 1, 1], [], []>} : vector<8x8xf32>, vector<8x256xf32>, vector<8x256xf32> -> vector<8x256xf32>
    %273 = arith.addf %264, %272 : vector<8x256xf32>
    %274 = arith.select %8, %208, %207 : vector<8x256xi1>, vector<8x256xf32>
    %c7_230 = arith.constant 7 : index
    %c0_231 = arith.constant 0 : index
    %c0_232 = arith.constant 0 : index
    %275 = vector.load %arg4[%c7_230, %c0_231, %c0_232] : memref<9x1x256xf32, #tpu.memory_space<vmem>>, vector<1x1x256xf32>
    %276 = vector.shape_cast %275 : vector<1x1x256xf32> to vector<1x256xf32>
    %277 = vector.broadcast %276 : vector<1x256xf32> to vector<8x256xf32>
    %278 = arith.mulf %274, %277 : vector<8x256xf32>
    %c2_233 = arith.constant 2 : index
    %c7_234 = arith.constant 7 : index
    %c0_235 = arith.constant 0 : index
    %c0_236 = arith.constant 0 : index
    %279 = vector.load %arg2[%c2_233, %c7_234, %c0_235, %c0_236] : memref<6x9x8x8xf32, #tpu.memory_space<vmem>>, vector<1x1x8x8xf32>
    %280 = vector.shape_cast %279 : vector<1x1x8x8xf32> to vector<8x8xf32>
    %cst_237 = arith.constant dense<0.000000e+00> : vector<8x256xf32>
    %281 = tpu.matmul %280, %278, %cst_237 {dimension_numbers = #tpu.dot_dimension_numbers<[1], [0], [0], [1], [0, 0, 1, 1], [], []>} : vector<8x8xf32>, vector<8x256xf32>, vector<8x256xf32> -> vector<8x256xf32>
    %282 = arith.addf %273, %281 : vector<8x256xf32>
    %283 = arith.select %8, %206, %205 : vector<8x256xi1>, vector<8x256xf32>
    %c8_238 = arith.constant 8 : index
    %c0_239 = arith.constant 0 : index
    %c0_240 = arith.constant 0 : index
    %284 = vector.load %arg4[%c8_238, %c0_239, %c0_240] : memref<9x1x256xf32, #tpu.memory_space<vmem>>, vector<1x1x256xf32>
    %285 = vector.shape_cast %284 : vector<1x1x256xf32> to vector<1x256xf32>
    %286 = vector.broadcast %285 : vector<1x256xf32> to vector<8x256xf32>
    %287 = arith.mulf %283, %286 : vector<8x256xf32>
    %c2_241 = arith.constant 2 : index
    %c8_242 = arith.constant 8 : index
    %c0_243 = arith.constant 0 : index
    %c0_244 = arith.constant 0 : index
    %288 = vector.load %arg2[%c2_241, %c8_242, %c0_243, %c0_244] : memref<6x9x8x8xf32, #tpu.memory_space<vmem>>, vector<1x1x8x8xf32>
    %289 = vector.shape_cast %288 : vector<1x1x8x8xf32> to vector<8x8xf32>
    %cst_245 = arith.constant dense<0.000000e+00> : vector<8x256xf32>
    %290 = tpu.matmul %289, %287, %cst_245 {dimension_numbers = #tpu.dot_dimension_numbers<[1], [0], [0], [1], [0, 0, 1, 1], [], []>} : vector<8x8xf32>, vector<8x256xf32>, vector<8x256xf32> -> vector<8x256xf32>
    %291 = arith.addf %282, %290 : vector<8x256xf32>
    %c2_246 = arith.constant 2 : index
    %c0_247 = arith.constant 0 : index
    %c0_248 = arith.constant 0 : index
    %c0_249 = arith.constant 0 : index
    %292 = vector.load %arg3[%c2_246, %c0_247, %c0_248, %c0_249] : memref<6x2x8x1xf32, #tpu.memory_space<vmem>>, vector<1x1x8x1xf32>
    %293 = vector.shape_cast %292 : vector<1x1x8x1xf32> to vector<8x1xf32>
    %294 = vector.broadcast %293 : vector<8x1xf32> to vector<8x256xf32>
    %295 = arith.mulf %291, %294 : vector<8x256xf32>
    %c2_250 = arith.constant 2 : index
    %c1_251 = arith.constant 1 : index
    %c0_252 = arith.constant 0 : index
    %c0_253 = arith.constant 0 : index
    %296 = vector.load %arg3[%c2_250, %c1_251, %c0_252, %c0_253] : memref<6x2x8x1xf32, #tpu.memory_space<vmem>>, vector<1x1x8x1xf32>
    %297 = vector.shape_cast %296 : vector<1x1x8x1xf32> to vector<8x1xf32>
    %298 = vector.broadcast %297 : vector<8x1xf32> to vector<8x256xf32>
    %299 = arith.addf %295, %298 : vector<8x256xf32>
    %300 = arith.addf %299, %107 : vector<8x256xf32>
    %c17_i32_254 = arith.constant 17 : i32
    %301 = tpu.dynamic_rotate %300 by %c17_i32_254 dim 1 : vector<8x256xf32>, i32 -> vector<8x256xf32>
    %c239_i32_255 = arith.constant 239 : i32
    %302 = tpu.dynamic_rotate %300 by %c239_i32_255 dim 1 : vector<8x256xf32>, i32 -> vector<8x256xf32>
    %c16_i32_256 = arith.constant 16 : i32
    %303 = tpu.dynamic_rotate %300 by %c16_i32_256 dim 1 : vector<8x256xf32>, i32 -> vector<8x256xf32>
    %c240_i32_257 = arith.constant 240 : i32
    %304 = tpu.dynamic_rotate %300 by %c240_i32_257 dim 1 : vector<8x256xf32>, i32 -> vector<8x256xf32>
    %c241_i32_258 = arith.constant 241 : i32
    %305 = tpu.dynamic_rotate %300 by %c241_i32_258 dim 1 : vector<8x256xf32>, i32 -> vector<8x256xf32>
    %c15_i32_259 = arith.constant 15 : i32
    %306 = tpu.dynamic_rotate %300 by %c15_i32_259 dim 1 : vector<8x256xf32>, i32 -> vector<8x256xf32>
    %c1_i32_260 = arith.constant 1 : i32
    %307 = tpu.dynamic_rotate %300 by %c1_i32_260 dim 1 : vector<8x256xf32>, i32 -> vector<8x256xf32>
    %c255_i32_261 = arith.constant 255 : i32
    %308 = tpu.dynamic_rotate %300 by %c255_i32_261 dim 1 : vector<8x256xf32>, i32 -> vector<8x256xf32>
    %309 = arith.select %8, %301, %302 : vector<8x256xi1>, vector<8x256xf32>
    %c0_262 = arith.constant 0 : index
    %c0_263 = arith.constant 0 : index
    %c0_264 = arith.constant 0 : index
    %310 = vector.load %arg4[%c0_262, %c0_263, %c0_264] : memref<9x1x256xf32, #tpu.memory_space<vmem>>, vector<1x1x256xf32>
    %311 = vector.shape_cast %310 : vector<1x1x256xf32> to vector<1x256xf32>
    %312 = vector.broadcast %311 : vector<1x256xf32> to vector<8x256xf32>
    %313 = arith.mulf %309, %312 : vector<8x256xf32>
    %c3_265 = arith.constant 3 : index
    %c0_266 = arith.constant 0 : index
    %c0_267 = arith.constant 0 : index
    %c0_268 = arith.constant 0 : index
    %314 = vector.load %arg2[%c3_265, %c0_266, %c0_267, %c0_268] : memref<6x9x8x8xf32, #tpu.memory_space<vmem>>, vector<1x1x8x8xf32>
    %315 = vector.shape_cast %314 : vector<1x1x8x8xf32> to vector<8x8xf32>
    %cst_269 = arith.constant dense<0.000000e+00> : vector<8x256xf32>
    %316 = tpu.matmul %315, %313, %cst_269 {dimension_numbers = #tpu.dot_dimension_numbers<[1], [0], [0], [1], [0, 0, 1, 1], [], []>} : vector<8x8xf32>, vector<8x256xf32>, vector<8x256xf32> -> vector<8x256xf32>
    %317 = arith.select %8, %303, %304 : vector<8x256xi1>, vector<8x256xf32>
    %c1_270 = arith.constant 1 : index
    %c0_271 = arith.constant 0 : index
    %c0_272 = arith.constant 0 : index
    %318 = vector.load %arg4[%c1_270, %c0_271, %c0_272] : memref<9x1x256xf32, #tpu.memory_space<vmem>>, vector<1x1x256xf32>
    %319 = vector.shape_cast %318 : vector<1x1x256xf32> to vector<1x256xf32>
    %320 = vector.broadcast %319 : vector<1x256xf32> to vector<8x256xf32>
    %321 = arith.mulf %317, %320 : vector<8x256xf32>
    %c3_273 = arith.constant 3 : index
    %c1_274 = arith.constant 1 : index
    %c0_275 = arith.constant 0 : index
    %c0_276 = arith.constant 0 : index
    %322 = vector.load %arg2[%c3_273, %c1_274, %c0_275, %c0_276] : memref<6x9x8x8xf32, #tpu.memory_space<vmem>>, vector<1x1x8x8xf32>
    %323 = vector.shape_cast %322 : vector<1x1x8x8xf32> to vector<8x8xf32>
    %cst_277 = arith.constant dense<0.000000e+00> : vector<8x256xf32>
    %324 = tpu.matmul %323, %321, %cst_277 {dimension_numbers = #tpu.dot_dimension_numbers<[1], [0], [0], [1], [0, 0, 1, 1], [], []>} : vector<8x8xf32>, vector<8x256xf32>, vector<8x256xf32> -> vector<8x256xf32>
    %325 = arith.addf %316, %324 : vector<8x256xf32>
    %326 = arith.select %8, %306, %305 : vector<8x256xi1>, vector<8x256xf32>
    %c2_278 = arith.constant 2 : index
    %c0_279 = arith.constant 0 : index
    %c0_280 = arith.constant 0 : index
    %327 = vector.load %arg4[%c2_278, %c0_279, %c0_280] : memref<9x1x256xf32, #tpu.memory_space<vmem>>, vector<1x1x256xf32>
    %328 = vector.shape_cast %327 : vector<1x1x256xf32> to vector<1x256xf32>
    %329 = vector.broadcast %328 : vector<1x256xf32> to vector<8x256xf32>
    %330 = arith.mulf %326, %329 : vector<8x256xf32>
    %c3_281 = arith.constant 3 : index
    %c2_282 = arith.constant 2 : index
    %c0_283 = arith.constant 0 : index
    %c0_284 = arith.constant 0 : index
    %331 = vector.load %arg2[%c3_281, %c2_282, %c0_283, %c0_284] : memref<6x9x8x8xf32, #tpu.memory_space<vmem>>, vector<1x1x8x8xf32>
    %332 = vector.shape_cast %331 : vector<1x1x8x8xf32> to vector<8x8xf32>
    %cst_285 = arith.constant dense<0.000000e+00> : vector<8x256xf32>
    %333 = tpu.matmul %332, %330, %cst_285 {dimension_numbers = #tpu.dot_dimension_numbers<[1], [0], [0], [1], [0, 0, 1, 1], [], []>} : vector<8x8xf32>, vector<8x256xf32>, vector<8x256xf32> -> vector<8x256xf32>
    %334 = arith.addf %325, %333 : vector<8x256xf32>
    %335 = arith.select %8, %307, %308 : vector<8x256xi1>, vector<8x256xf32>
    %c3_286 = arith.constant 3 : index
    %c0_287 = arith.constant 0 : index
    %c0_288 = arith.constant 0 : index
    %336 = vector.load %arg4[%c3_286, %c0_287, %c0_288] : memref<9x1x256xf32, #tpu.memory_space<vmem>>, vector<1x1x256xf32>
    %337 = vector.shape_cast %336 : vector<1x1x256xf32> to vector<1x256xf32>
    %338 = vector.broadcast %337 : vector<1x256xf32> to vector<8x256xf32>
    %339 = arith.mulf %335, %338 : vector<8x256xf32>
    %c3_289 = arith.constant 3 : index
    %c3_290 = arith.constant 3 : index
    %c0_291 = arith.constant 0 : index
    %c0_292 = arith.constant 0 : index
    %340 = vector.load %arg2[%c3_289, %c3_290, %c0_291, %c0_292] : memref<6x9x8x8xf32, #tpu.memory_space<vmem>>, vector<1x1x8x8xf32>
    %341 = vector.shape_cast %340 : vector<1x1x8x8xf32> to vector<8x8xf32>
    %cst_293 = arith.constant dense<0.000000e+00> : vector<8x256xf32>
    %342 = tpu.matmul %341, %339, %cst_293 {dimension_numbers = #tpu.dot_dimension_numbers<[1], [0], [0], [1], [0, 0, 1, 1], [], []>} : vector<8x8xf32>, vector<8x256xf32>, vector<8x256xf32> -> vector<8x256xf32>
    %343 = arith.addf %334, %342 : vector<8x256xf32>
    %c4_294 = arith.constant 4 : index
    %c0_295 = arith.constant 0 : index
    %c0_296 = arith.constant 0 : index
    %344 = vector.load %arg4[%c4_294, %c0_295, %c0_296] : memref<9x1x256xf32, #tpu.memory_space<vmem>>, vector<1x1x256xf32>
    %345 = vector.shape_cast %344 : vector<1x1x256xf32> to vector<1x256xf32>
    %346 = vector.broadcast %345 : vector<1x256xf32> to vector<8x256xf32>
    %347 = arith.mulf %300, %346 : vector<8x256xf32>
    %c3_297 = arith.constant 3 : index
    %c4_298 = arith.constant 4 : index
    %c0_299 = arith.constant 0 : index
    %c0_300 = arith.constant 0 : index
    %348 = vector.load %arg2[%c3_297, %c4_298, %c0_299, %c0_300] : memref<6x9x8x8xf32, #tpu.memory_space<vmem>>, vector<1x1x8x8xf32>
    %349 = vector.shape_cast %348 : vector<1x1x8x8xf32> to vector<8x8xf32>
    %cst_301 = arith.constant dense<0.000000e+00> : vector<8x256xf32>
    %350 = tpu.matmul %349, %347, %cst_301 {dimension_numbers = #tpu.dot_dimension_numbers<[1], [0], [0], [1], [0, 0, 1, 1], [], []>} : vector<8x8xf32>, vector<8x256xf32>, vector<8x256xf32> -> vector<8x256xf32>
    %351 = arith.addf %343, %350 : vector<8x256xf32>
    %352 = arith.select %8, %308, %307 : vector<8x256xi1>, vector<8x256xf32>
    %c5_302 = arith.constant 5 : index
    %c0_303 = arith.constant 0 : index
    %c0_304 = arith.constant 0 : index
    %353 = vector.load %arg4[%c5_302, %c0_303, %c0_304] : memref<9x1x256xf32, #tpu.memory_space<vmem>>, vector<1x1x256xf32>
    %354 = vector.shape_cast %353 : vector<1x1x256xf32> to vector<1x256xf32>
    %355 = vector.broadcast %354 : vector<1x256xf32> to vector<8x256xf32>
    %356 = arith.mulf %352, %355 : vector<8x256xf32>
    %c3_305 = arith.constant 3 : index
    %c5_306 = arith.constant 5 : index
    %c0_307 = arith.constant 0 : index
    %c0_308 = arith.constant 0 : index
    %357 = vector.load %arg2[%c3_305, %c5_306, %c0_307, %c0_308] : memref<6x9x8x8xf32, #tpu.memory_space<vmem>>, vector<1x1x8x8xf32>
    %358 = vector.shape_cast %357 : vector<1x1x8x8xf32> to vector<8x8xf32>
    %cst_309 = arith.constant dense<0.000000e+00> : vector<8x256xf32>
    %359 = tpu.matmul %358, %356, %cst_309 {dimension_numbers = #tpu.dot_dimension_numbers<[1], [0], [0], [1], [0, 0, 1, 1], [], []>} : vector<8x8xf32>, vector<8x256xf32>, vector<8x256xf32> -> vector<8x256xf32>
    %360 = arith.addf %351, %359 : vector<8x256xf32>
    %361 = arith.select %8, %305, %306 : vector<8x256xi1>, vector<8x256xf32>
    %c6_310 = arith.constant 6 : index
    %c0_311 = arith.constant 0 : index
    %c0_312 = arith.constant 0 : index
    %362 = vector.load %arg4[%c6_310, %c0_311, %c0_312] : memref<9x1x256xf32, #tpu.memory_space<vmem>>, vector<1x1x256xf32>
    %363 = vector.shape_cast %362 : vector<1x1x256xf32> to vector<1x256xf32>
    %364 = vector.broadcast %363 : vector<1x256xf32> to vector<8x256xf32>
    %365 = arith.mulf %361, %364 : vector<8x256xf32>
    %c3_313 = arith.constant 3 : index
    %c6_314 = arith.constant 6 : index
    %c0_315 = arith.constant 0 : index
    %c0_316 = arith.constant 0 : index
    %366 = vector.load %arg2[%c3_313, %c6_314, %c0_315, %c0_316] : memref<6x9x8x8xf32, #tpu.memory_space<vmem>>, vector<1x1x8x8xf32>
    %367 = vector.shape_cast %366 : vector<1x1x8x8xf32> to vector<8x8xf32>
    %cst_317 = arith.constant dense<0.000000e+00> : vector<8x256xf32>
    %368 = tpu.matmul %367, %365, %cst_317 {dimension_numbers = #tpu.dot_dimension_numbers<[1], [0], [0], [1], [0, 0, 1, 1], [], []>} : vector<8x8xf32>, vector<8x256xf32>, vector<8x256xf32> -> vector<8x256xf32>
    %369 = arith.addf %360, %368 : vector<8x256xf32>
    %370 = arith.select %8, %304, %303 : vector<8x256xi1>, vector<8x256xf32>
    %c7_318 = arith.constant 7 : index
    %c0_319 = arith.constant 0 : index
    %c0_320 = arith.constant 0 : index
    %371 = vector.load %arg4[%c7_318, %c0_319, %c0_320] : memref<9x1x256xf32, #tpu.memory_space<vmem>>, vector<1x1x256xf32>
    %372 = vector.shape_cast %371 : vector<1x1x256xf32> to vector<1x256xf32>
    %373 = vector.broadcast %372 : vector<1x256xf32> to vector<8x256xf32>
    %374 = arith.mulf %370, %373 : vector<8x256xf32>
    %c3_321 = arith.constant 3 : index
    %c7_322 = arith.constant 7 : index
    %c0_323 = arith.constant 0 : index
    %c0_324 = arith.constant 0 : index
    %375 = vector.load %arg2[%c3_321, %c7_322, %c0_323, %c0_324] : memref<6x9x8x8xf32, #tpu.memory_space<vmem>>, vector<1x1x8x8xf32>
    %376 = vector.shape_cast %375 : vector<1x1x8x8xf32> to vector<8x8xf32>
    %cst_325 = arith.constant dense<0.000000e+00> : vector<8x256xf32>
    %377 = tpu.matmul %376, %374, %cst_325 {dimension_numbers = #tpu.dot_dimension_numbers<[1], [0], [0], [1], [0, 0, 1, 1], [], []>} : vector<8x8xf32>, vector<8x256xf32>, vector<8x256xf32> -> vector<8x256xf32>
    %378 = arith.addf %369, %377 : vector<8x256xf32>
    %379 = arith.select %8, %302, %301 : vector<8x256xi1>, vector<8x256xf32>
    %c8_326 = arith.constant 8 : index
    %c0_327 = arith.constant 0 : index
    %c0_328 = arith.constant 0 : index
    %380 = vector.load %arg4[%c8_326, %c0_327, %c0_328] : memref<9x1x256xf32, #tpu.memory_space<vmem>>, vector<1x1x256xf32>
    %381 = vector.shape_cast %380 : vector<1x1x256xf32> to vector<1x256xf32>
    %382 = vector.broadcast %381 : vector<1x256xf32> to vector<8x256xf32>
    %383 = arith.mulf %379, %382 : vector<8x256xf32>
    %c3_329 = arith.constant 3 : index
    %c8_330 = arith.constant 8 : index
    %c0_331 = arith.constant 0 : index
    %c0_332 = arith.constant 0 : index
    %384 = vector.load %arg2[%c3_329, %c8_330, %c0_331, %c0_332] : memref<6x9x8x8xf32, #tpu.memory_space<vmem>>, vector<1x1x8x8xf32>
    %385 = vector.shape_cast %384 : vector<1x1x8x8xf32> to vector<8x8xf32>
    %cst_333 = arith.constant dense<0.000000e+00> : vector<8x256xf32>
    %386 = tpu.matmul %385, %383, %cst_333 {dimension_numbers = #tpu.dot_dimension_numbers<[1], [0], [0], [1], [0, 0, 1, 1], [], []>} : vector<8x8xf32>, vector<8x256xf32>, vector<8x256xf32> -> vector<8x256xf32>
    %387 = arith.addf %378, %386 : vector<8x256xf32>
    %c3_334 = arith.constant 3 : index
    %c0_335 = arith.constant 0 : index
    %c0_336 = arith.constant 0 : index
    %c0_337 = arith.constant 0 : index
    %388 = vector.load %arg3[%c3_334, %c0_335, %c0_336, %c0_337] : memref<6x2x8x1xf32, #tpu.memory_space<vmem>>, vector<1x1x8x1xf32>
    %389 = vector.shape_cast %388 : vector<1x1x8x1xf32> to vector<8x1xf32>
    %390 = vector.broadcast %389 : vector<8x1xf32> to vector<8x256xf32>
    %391 = arith.mulf %387, %390 : vector<8x256xf32>
    %c3_338 = arith.constant 3 : index
    %c1_339 = arith.constant 1 : index
    %c0_340 = arith.constant 0 : index
    %c0_341 = arith.constant 0 : index
    %392 = vector.load %arg3[%c3_338, %c1_339, %c0_340, %c0_341] : memref<6x2x8x1xf32, #tpu.memory_space<vmem>>, vector<1x1x8x1xf32>
    %393 = vector.shape_cast %392 : vector<1x1x8x1xf32> to vector<8x1xf32>
    %394 = vector.broadcast %393 : vector<8x1xf32> to vector<8x256xf32>
    %395 = arith.addf %391, %394 : vector<8x256xf32>
    %cst_342 = arith.constant 0.000000e+00 : f32
    %396 = vector.broadcast %cst_342 : f32 to vector<8x256xf32>
    %397 = arith.maximumf %395, %396 : vector<8x256xf32>
    %c17_i32_343 = arith.constant 17 : i32
    %398 = tpu.dynamic_rotate %397 by %c17_i32_343 dim 1 : vector<8x256xf32>, i32 -> vector<8x256xf32>
    %c239_i32_344 = arith.constant 239 : i32
    %399 = tpu.dynamic_rotate %397 by %c239_i32_344 dim 1 : vector<8x256xf32>, i32 -> vector<8x256xf32>
    %c16_i32_345 = arith.constant 16 : i32
    %400 = tpu.dynamic_rotate %397 by %c16_i32_345 dim 1 : vector<8x256xf32>, i32 -> vector<8x256xf32>
    %c240_i32_346 = arith.constant 240 : i32
    %401 = tpu.dynamic_rotate %397 by %c240_i32_346 dim 1 : vector<8x256xf32>, i32 -> vector<8x256xf32>
    %c241_i32_347 = arith.constant 241 : i32
    %402 = tpu.dynamic_rotate %397 by %c241_i32_347 dim 1 : vector<8x256xf32>, i32 -> vector<8x256xf32>
    %c15_i32_348 = arith.constant 15 : i32
    %403 = tpu.dynamic_rotate %397 by %c15_i32_348 dim 1 : vector<8x256xf32>, i32 -> vector<8x256xf32>
    %c1_i32_349 = arith.constant 1 : i32
    %404 = tpu.dynamic_rotate %397 by %c1_i32_349 dim 1 : vector<8x256xf32>, i32 -> vector<8x256xf32>
    %c255_i32_350 = arith.constant 255 : i32
    %405 = tpu.dynamic_rotate %397 by %c255_i32_350 dim 1 : vector<8x256xf32>, i32 -> vector<8x256xf32>
    %406 = arith.select %8, %398, %399 : vector<8x256xi1>, vector<8x256xf32>
    %c0_351 = arith.constant 0 : index
    %c0_352 = arith.constant 0 : index
    %c0_353 = arith.constant 0 : index
    %407 = vector.load %arg4[%c0_351, %c0_352, %c0_353] : memref<9x1x256xf32, #tpu.memory_space<vmem>>, vector<1x1x256xf32>
    %408 = vector.shape_cast %407 : vector<1x1x256xf32> to vector<1x256xf32>
    %409 = vector.broadcast %408 : vector<1x256xf32> to vector<8x256xf32>
    %410 = arith.mulf %406, %409 : vector<8x256xf32>
    %c4_354 = arith.constant 4 : index
    %c0_355 = arith.constant 0 : index
    %c0_356 = arith.constant 0 : index
    %c0_357 = arith.constant 0 : index
    %411 = vector.load %arg2[%c4_354, %c0_355, %c0_356, %c0_357] : memref<6x9x8x8xf32, #tpu.memory_space<vmem>>, vector<1x1x8x8xf32>
    %412 = vector.shape_cast %411 : vector<1x1x8x8xf32> to vector<8x8xf32>
    %cst_358 = arith.constant dense<0.000000e+00> : vector<8x256xf32>
    %413 = tpu.matmul %412, %410, %cst_358 {dimension_numbers = #tpu.dot_dimension_numbers<[1], [0], [0], [1], [0, 0, 1, 1], [], []>} : vector<8x8xf32>, vector<8x256xf32>, vector<8x256xf32> -> vector<8x256xf32>
    %414 = arith.select %8, %400, %401 : vector<8x256xi1>, vector<8x256xf32>
    %c1_359 = arith.constant 1 : index
    %c0_360 = arith.constant 0 : index
    %c0_361 = arith.constant 0 : index
    %415 = vector.load %arg4[%c1_359, %c0_360, %c0_361] : memref<9x1x256xf32, #tpu.memory_space<vmem>>, vector<1x1x256xf32>
    %416 = vector.shape_cast %415 : vector<1x1x256xf32> to vector<1x256xf32>
    %417 = vector.broadcast %416 : vector<1x256xf32> to vector<8x256xf32>
    %418 = arith.mulf %414, %417 : vector<8x256xf32>
    %c4_362 = arith.constant 4 : index
    %c1_363 = arith.constant 1 : index
    %c0_364 = arith.constant 0 : index
    %c0_365 = arith.constant 0 : index
    %419 = vector.load %arg2[%c4_362, %c1_363, %c0_364, %c0_365] : memref<6x9x8x8xf32, #tpu.memory_space<vmem>>, vector<1x1x8x8xf32>
    %420 = vector.shape_cast %419 : vector<1x1x8x8xf32> to vector<8x8xf32>
    %cst_366 = arith.constant dense<0.000000e+00> : vector<8x256xf32>
    %421 = tpu.matmul %420, %418, %cst_366 {dimension_numbers = #tpu.dot_dimension_numbers<[1], [0], [0], [1], [0, 0, 1, 1], [], []>} : vector<8x8xf32>, vector<8x256xf32>, vector<8x256xf32> -> vector<8x256xf32>
    %422 = arith.addf %413, %421 : vector<8x256xf32>
    %423 = arith.select %8, %403, %402 : vector<8x256xi1>, vector<8x256xf32>
    %c2_367 = arith.constant 2 : index
    %c0_368 = arith.constant 0 : index
    %c0_369 = arith.constant 0 : index
    %424 = vector.load %arg4[%c2_367, %c0_368, %c0_369] : memref<9x1x256xf32, #tpu.memory_space<vmem>>, vector<1x1x256xf32>
    %425 = vector.shape_cast %424 : vector<1x1x256xf32> to vector<1x256xf32>
    %426 = vector.broadcast %425 : vector<1x256xf32> to vector<8x256xf32>
    %427 = arith.mulf %423, %426 : vector<8x256xf32>
    %c4_370 = arith.constant 4 : index
    %c2_371 = arith.constant 2 : index
    %c0_372 = arith.constant 0 : index
    %c0_373 = arith.constant 0 : index
    %428 = vector.load %arg2[%c4_370, %c2_371, %c0_372, %c0_373] : memref<6x9x8x8xf32, #tpu.memory_space<vmem>>, vector<1x1x8x8xf32>
    %429 = vector.shape_cast %428 : vector<1x1x8x8xf32> to vector<8x8xf32>
    %cst_374 = arith.constant dense<0.000000e+00> : vector<8x256xf32>
    %430 = tpu.matmul %429, %427, %cst_374 {dimension_numbers = #tpu.dot_dimension_numbers<[1], [0], [0], [1], [0, 0, 1, 1], [], []>} : vector<8x8xf32>, vector<8x256xf32>, vector<8x256xf32> -> vector<8x256xf32>
    %431 = arith.addf %422, %430 : vector<8x256xf32>
    %432 = arith.select %8, %404, %405 : vector<8x256xi1>, vector<8x256xf32>
    %c3_375 = arith.constant 3 : index
    %c0_376 = arith.constant 0 : index
    %c0_377 = arith.constant 0 : index
    %433 = vector.load %arg4[%c3_375, %c0_376, %c0_377] : memref<9x1x256xf32, #tpu.memory_space<vmem>>, vector<1x1x256xf32>
    %434 = vector.shape_cast %433 : vector<1x1x256xf32> to vector<1x256xf32>
    %435 = vector.broadcast %434 : vector<1x256xf32> to vector<8x256xf32>
    %436 = arith.mulf %432, %435 : vector<8x256xf32>
    %c4_378 = arith.constant 4 : index
    %c3_379 = arith.constant 3 : index
    %c0_380 = arith.constant 0 : index
    %c0_381 = arith.constant 0 : index
    %437 = vector.load %arg2[%c4_378, %c3_379, %c0_380, %c0_381] : memref<6x9x8x8xf32, #tpu.memory_space<vmem>>, vector<1x1x8x8xf32>
    %438 = vector.shape_cast %437 : vector<1x1x8x8xf32> to vector<8x8xf32>
    %cst_382 = arith.constant dense<0.000000e+00> : vector<8x256xf32>
    %439 = tpu.matmul %438, %436, %cst_382 {dimension_numbers = #tpu.dot_dimension_numbers<[1], [0], [0], [1], [0, 0, 1, 1], [], []>} : vector<8x8xf32>, vector<8x256xf32>, vector<8x256xf32> -> vector<8x256xf32>
    %440 = arith.addf %431, %439 : vector<8x256xf32>
    %c4_383 = arith.constant 4 : index
    %c0_384 = arith.constant 0 : index
    %c0_385 = arith.constant 0 : index
    %441 = vector.load %arg4[%c4_383, %c0_384, %c0_385] : memref<9x1x256xf32, #tpu.memory_space<vmem>>, vector<1x1x256xf32>
    %442 = vector.shape_cast %441 : vector<1x1x256xf32> to vector<1x256xf32>
    %443 = vector.broadcast %442 : vector<1x256xf32> to vector<8x256xf32>
    %444 = arith.mulf %397, %443 : vector<8x256xf32>
    %c4_386 = arith.constant 4 : index
    %c4_387 = arith.constant 4 : index
    %c0_388 = arith.constant 0 : index
    %c0_389 = arith.constant 0 : index
    %445 = vector.load %arg2[%c4_386, %c4_387, %c0_388, %c0_389] : memref<6x9x8x8xf32, #tpu.memory_space<vmem>>, vector<1x1x8x8xf32>
    %446 = vector.shape_cast %445 : vector<1x1x8x8xf32> to vector<8x8xf32>
    %cst_390 = arith.constant dense<0.000000e+00> : vector<8x256xf32>
    %447 = tpu.matmul %446, %444, %cst_390 {dimension_numbers = #tpu.dot_dimension_numbers<[1], [0], [0], [1], [0, 0, 1, 1], [], []>} : vector<8x8xf32>, vector<8x256xf32>, vector<8x256xf32> -> vector<8x256xf32>
    %448 = arith.addf %440, %447 : vector<8x256xf32>
    %449 = arith.select %8, %405, %404 : vector<8x256xi1>, vector<8x256xf32>
    %c5_391 = arith.constant 5 : index
    %c0_392 = arith.constant 0 : index
    %c0_393 = arith.constant 0 : index
    %450 = vector.load %arg4[%c5_391, %c0_392, %c0_393] : memref<9x1x256xf32, #tpu.memory_space<vmem>>, vector<1x1x256xf32>
    %451 = vector.shape_cast %450 : vector<1x1x256xf32> to vector<1x256xf32>
    %452 = vector.broadcast %451 : vector<1x256xf32> to vector<8x256xf32>
    %453 = arith.mulf %449, %452 : vector<8x256xf32>
    %c4_394 = arith.constant 4 : index
    %c5_395 = arith.constant 5 : index
    %c0_396 = arith.constant 0 : index
    %c0_397 = arith.constant 0 : index
    %454 = vector.load %arg2[%c4_394, %c5_395, %c0_396, %c0_397] : memref<6x9x8x8xf32, #tpu.memory_space<vmem>>, vector<1x1x8x8xf32>
    %455 = vector.shape_cast %454 : vector<1x1x8x8xf32> to vector<8x8xf32>
    %cst_398 = arith.constant dense<0.000000e+00> : vector<8x256xf32>
    %456 = tpu.matmul %455, %453, %cst_398 {dimension_numbers = #tpu.dot_dimension_numbers<[1], [0], [0], [1], [0, 0, 1, 1], [], []>} : vector<8x8xf32>, vector<8x256xf32>, vector<8x256xf32> -> vector<8x256xf32>
    %457 = arith.addf %448, %456 : vector<8x256xf32>
    %458 = arith.select %8, %402, %403 : vector<8x256xi1>, vector<8x256xf32>
    %c6_399 = arith.constant 6 : index
    %c0_400 = arith.constant 0 : index
    %c0_401 = arith.constant 0 : index
    %459 = vector.load %arg4[%c6_399, %c0_400, %c0_401] : memref<9x1x256xf32, #tpu.memory_space<vmem>>, vector<1x1x256xf32>
    %460 = vector.shape_cast %459 : vector<1x1x256xf32> to vector<1x256xf32>
    %461 = vector.broadcast %460 : vector<1x256xf32> to vector<8x256xf32>
    %462 = arith.mulf %458, %461 : vector<8x256xf32>
    %c4_402 = arith.constant 4 : index
    %c6_403 = arith.constant 6 : index
    %c0_404 = arith.constant 0 : index
    %c0_405 = arith.constant 0 : index
    %463 = vector.load %arg2[%c4_402, %c6_403, %c0_404, %c0_405] : memref<6x9x8x8xf32, #tpu.memory_space<vmem>>, vector<1x1x8x8xf32>
    %464 = vector.shape_cast %463 : vector<1x1x8x8xf32> to vector<8x8xf32>
    %cst_406 = arith.constant dense<0.000000e+00> : vector<8x256xf32>
    %465 = tpu.matmul %464, %462, %cst_406 {dimension_numbers = #tpu.dot_dimension_numbers<[1], [0], [0], [1], [0, 0, 1, 1], [], []>} : vector<8x8xf32>, vector<8x256xf32>, vector<8x256xf32> -> vector<8x256xf32>
    %466 = arith.addf %457, %465 : vector<8x256xf32>
    %467 = arith.select %8, %401, %400 : vector<8x256xi1>, vector<8x256xf32>
    %c7_407 = arith.constant 7 : index
    %c0_408 = arith.constant 0 : index
    %c0_409 = arith.constant 0 : index
    %468 = vector.load %arg4[%c7_407, %c0_408, %c0_409] : memref<9x1x256xf32, #tpu.memory_space<vmem>>, vector<1x1x256xf32>
    %469 = vector.shape_cast %468 : vector<1x1x256xf32> to vector<1x256xf32>
    %470 = vector.broadcast %469 : vector<1x256xf32> to vector<8x256xf32>
    %471 = arith.mulf %467, %470 : vector<8x256xf32>
    %c4_410 = arith.constant 4 : index
    %c7_411 = arith.constant 7 : index
    %c0_412 = arith.constant 0 : index
    %c0_413 = arith.constant 0 : index
    %472 = vector.load %arg2[%c4_410, %c7_411, %c0_412, %c0_413] : memref<6x9x8x8xf32, #tpu.memory_space<vmem>>, vector<1x1x8x8xf32>
    %473 = vector.shape_cast %472 : vector<1x1x8x8xf32> to vector<8x8xf32>
    %cst_414 = arith.constant dense<0.000000e+00> : vector<8x256xf32>
    %474 = tpu.matmul %473, %471, %cst_414 {dimension_numbers = #tpu.dot_dimension_numbers<[1], [0], [0], [1], [0, 0, 1, 1], [], []>} : vector<8x8xf32>, vector<8x256xf32>, vector<8x256xf32> -> vector<8x256xf32>
    %475 = arith.addf %466, %474 : vector<8x256xf32>
    %476 = arith.select %8, %399, %398 : vector<8x256xi1>, vector<8x256xf32>
    %c8_415 = arith.constant 8 : index
    %c0_416 = arith.constant 0 : index
    %c0_417 = arith.constant 0 : index
    %477 = vector.load %arg4[%c8_415, %c0_416, %c0_417] : memref<9x1x256xf32, #tpu.memory_space<vmem>>, vector<1x1x256xf32>
    %478 = vector.shape_cast %477 : vector<1x1x256xf32> to vector<1x256xf32>
    %479 = vector.broadcast %478 : vector<1x256xf32> to vector<8x256xf32>
    %480 = arith.mulf %476, %479 : vector<8x256xf32>
    %c4_418 = arith.constant 4 : index
    %c8_419 = arith.constant 8 : index
    %c0_420 = arith.constant 0 : index
    %c0_421 = arith.constant 0 : index
    %481 = vector.load %arg2[%c4_418, %c8_419, %c0_420, %c0_421] : memref<6x9x8x8xf32, #tpu.memory_space<vmem>>, vector<1x1x8x8xf32>
    %482 = vector.shape_cast %481 : vector<1x1x8x8xf32> to vector<8x8xf32>
    %cst_422 = arith.constant dense<0.000000e+00> : vector<8x256xf32>
    %483 = tpu.matmul %482, %480, %cst_422 {dimension_numbers = #tpu.dot_dimension_numbers<[1], [0], [0], [1], [0, 0, 1, 1], [], []>} : vector<8x8xf32>, vector<8x256xf32>, vector<8x256xf32> -> vector<8x256xf32>
    %484 = arith.addf %475, %483 : vector<8x256xf32>
    %c4_423 = arith.constant 4 : index
    %c0_424 = arith.constant 0 : index
    %c0_425 = arith.constant 0 : index
    %c0_426 = arith.constant 0 : index
    %485 = vector.load %arg3[%c4_423, %c0_424, %c0_425, %c0_426] : memref<6x2x8x1xf32, #tpu.memory_space<vmem>>, vector<1x1x8x1xf32>
    %486 = vector.shape_cast %485 : vector<1x1x8x1xf32> to vector<8x1xf32>
    %487 = vector.broadcast %486 : vector<8x1xf32> to vector<8x256xf32>
    %488 = arith.mulf %484, %487 : vector<8x256xf32>
    %c4_427 = arith.constant 4 : index
    %c1_428 = arith.constant 1 : index
    %c0_429 = arith.constant 0 : index
    %c0_430 = arith.constant 0 : index
    %489 = vector.load %arg3[%c4_427, %c1_428, %c0_429, %c0_430] : memref<6x2x8x1xf32, #tpu.memory_space<vmem>>, vector<1x1x8x1xf32>
    %490 = vector.shape_cast %489 : vector<1x1x8x1xf32> to vector<8x1xf32>
    %491 = vector.broadcast %490 : vector<8x1xf32> to vector<8x256xf32>
    %492 = arith.addf %488, %491 : vector<8x256xf32>
    %493 = arith.addf %492, %300 : vector<8x256xf32>
    %c17_i32_431 = arith.constant 17 : i32
    %494 = tpu.dynamic_rotate %493 by %c17_i32_431 dim 1 : vector<8x256xf32>, i32 -> vector<8x256xf32>
    %c239_i32_432 = arith.constant 239 : i32
    %495 = tpu.dynamic_rotate %493 by %c239_i32_432 dim 1 : vector<8x256xf32>, i32 -> vector<8x256xf32>
    %c16_i32_433 = arith.constant 16 : i32
    %496 = tpu.dynamic_rotate %493 by %c16_i32_433 dim 1 : vector<8x256xf32>, i32 -> vector<8x256xf32>
    %c240_i32_434 = arith.constant 240 : i32
    %497 = tpu.dynamic_rotate %493 by %c240_i32_434 dim 1 : vector<8x256xf32>, i32 -> vector<8x256xf32>
    %c241_i32_435 = arith.constant 241 : i32
    %498 = tpu.dynamic_rotate %493 by %c241_i32_435 dim 1 : vector<8x256xf32>, i32 -> vector<8x256xf32>
    %c15_i32_436 = arith.constant 15 : i32
    %499 = tpu.dynamic_rotate %493 by %c15_i32_436 dim 1 : vector<8x256xf32>, i32 -> vector<8x256xf32>
    %c1_i32_437 = arith.constant 1 : i32
    %500 = tpu.dynamic_rotate %493 by %c1_i32_437 dim 1 : vector<8x256xf32>, i32 -> vector<8x256xf32>
    %c255_i32_438 = arith.constant 255 : i32
    %501 = tpu.dynamic_rotate %493 by %c255_i32_438 dim 1 : vector<8x256xf32>, i32 -> vector<8x256xf32>
    %502 = arith.select %8, %494, %495 : vector<8x256xi1>, vector<8x256xf32>
    %c0_439 = arith.constant 0 : index
    %c0_440 = arith.constant 0 : index
    %c0_441 = arith.constant 0 : index
    %503 = vector.load %arg4[%c0_439, %c0_440, %c0_441] : memref<9x1x256xf32, #tpu.memory_space<vmem>>, vector<1x1x256xf32>
    %504 = vector.shape_cast %503 : vector<1x1x256xf32> to vector<1x256xf32>
    %505 = vector.broadcast %504 : vector<1x256xf32> to vector<8x256xf32>
    %506 = arith.mulf %502, %505 : vector<8x256xf32>
    %c5_442 = arith.constant 5 : index
    %c0_443 = arith.constant 0 : index
    %c0_444 = arith.constant 0 : index
    %c0_445 = arith.constant 0 : index
    %507 = vector.load %arg2[%c5_442, %c0_443, %c0_444, %c0_445] : memref<6x9x8x8xf32, #tpu.memory_space<vmem>>, vector<1x1x8x8xf32>
    %508 = vector.shape_cast %507 : vector<1x1x8x8xf32> to vector<8x8xf32>
    %cst_446 = arith.constant dense<0.000000e+00> : vector<8x256xf32>
    %509 = tpu.matmul %508, %506, %cst_446 {dimension_numbers = #tpu.dot_dimension_numbers<[1], [0], [0], [1], [0, 0, 1, 1], [], []>} : vector<8x8xf32>, vector<8x256xf32>, vector<8x256xf32> -> vector<8x256xf32>
    %510 = arith.select %8, %496, %497 : vector<8x256xi1>, vector<8x256xf32>
    %c1_447 = arith.constant 1 : index
    %c0_448 = arith.constant 0 : index
    %c0_449 = arith.constant 0 : index
    %511 = vector.load %arg4[%c1_447, %c0_448, %c0_449] : memref<9x1x256xf32, #tpu.memory_space<vmem>>, vector<1x1x256xf32>
    %512 = vector.shape_cast %511 : vector<1x1x256xf32> to vector<1x256xf32>
    %513 = vector.broadcast %512 : vector<1x256xf32> to vector<8x256xf32>
    %514 = arith.mulf %510, %513 : vector<8x256xf32>
    %c5_450 = arith.constant 5 : index
    %c1_451 = arith.constant 1 : index
    %c0_452 = arith.constant 0 : index
    %c0_453 = arith.constant 0 : index
    %515 = vector.load %arg2[%c5_450, %c1_451, %c0_452, %c0_453] : memref<6x9x8x8xf32, #tpu.memory_space<vmem>>, vector<1x1x8x8xf32>
    %516 = vector.shape_cast %515 : vector<1x1x8x8xf32> to vector<8x8xf32>
    %cst_454 = arith.constant dense<0.000000e+00> : vector<8x256xf32>
    %517 = tpu.matmul %516, %514, %cst_454 {dimension_numbers = #tpu.dot_dimension_numbers<[1], [0], [0], [1], [0, 0, 1, 1], [], []>} : vector<8x8xf32>, vector<8x256xf32>, vector<8x256xf32> -> vector<8x256xf32>
    %518 = arith.addf %509, %517 : vector<8x256xf32>
    %519 = arith.select %8, %499, %498 : vector<8x256xi1>, vector<8x256xf32>
    %c2_455 = arith.constant 2 : index
    %c0_456 = arith.constant 0 : index
    %c0_457 = arith.constant 0 : index
    %520 = vector.load %arg4[%c2_455, %c0_456, %c0_457] : memref<9x1x256xf32, #tpu.memory_space<vmem>>, vector<1x1x256xf32>
    %521 = vector.shape_cast %520 : vector<1x1x256xf32> to vector<1x256xf32>
    %522 = vector.broadcast %521 : vector<1x256xf32> to vector<8x256xf32>
    %523 = arith.mulf %519, %522 : vector<8x256xf32>
    %c5_458 = arith.constant 5 : index
    %c2_459 = arith.constant 2 : index
    %c0_460 = arith.constant 0 : index
    %c0_461 = arith.constant 0 : index
    %524 = vector.load %arg2[%c5_458, %c2_459, %c0_460, %c0_461] : memref<6x9x8x8xf32, #tpu.memory_space<vmem>>, vector<1x1x8x8xf32>
    %525 = vector.shape_cast %524 : vector<1x1x8x8xf32> to vector<8x8xf32>
    %cst_462 = arith.constant dense<0.000000e+00> : vector<8x256xf32>
    %526 = tpu.matmul %525, %523, %cst_462 {dimension_numbers = #tpu.dot_dimension_numbers<[1], [0], [0], [1], [0, 0, 1, 1], [], []>} : vector<8x8xf32>, vector<8x256xf32>, vector<8x256xf32> -> vector<8x256xf32>
    %527 = arith.addf %518, %526 : vector<8x256xf32>
    %528 = arith.select %8, %500, %501 : vector<8x256xi1>, vector<8x256xf32>
    %c3_463 = arith.constant 3 : index
    %c0_464 = arith.constant 0 : index
    %c0_465 = arith.constant 0 : index
    %529 = vector.load %arg4[%c3_463, %c0_464, %c0_465] : memref<9x1x256xf32, #tpu.memory_space<vmem>>, vector<1x1x256xf32>
    %530 = vector.shape_cast %529 : vector<1x1x256xf32> to vector<1x256xf32>
    %531 = vector.broadcast %530 : vector<1x256xf32> to vector<8x256xf32>
    %532 = arith.mulf %528, %531 : vector<8x256xf32>
    %c5_466 = arith.constant 5 : index
    %c3_467 = arith.constant 3 : index
    %c0_468 = arith.constant 0 : index
    %c0_469 = arith.constant 0 : index
    %533 = vector.load %arg2[%c5_466, %c3_467, %c0_468, %c0_469] : memref<6x9x8x8xf32, #tpu.memory_space<vmem>>, vector<1x1x8x8xf32>
    %534 = vector.shape_cast %533 : vector<1x1x8x8xf32> to vector<8x8xf32>
    %cst_470 = arith.constant dense<0.000000e+00> : vector<8x256xf32>
    %535 = tpu.matmul %534, %532, %cst_470 {dimension_numbers = #tpu.dot_dimension_numbers<[1], [0], [0], [1], [0, 0, 1, 1], [], []>} : vector<8x8xf32>, vector<8x256xf32>, vector<8x256xf32> -> vector<8x256xf32>
    %536 = arith.addf %527, %535 : vector<8x256xf32>
    %c4_471 = arith.constant 4 : index
    %c0_472 = arith.constant 0 : index
    %c0_473 = arith.constant 0 : index
    %537 = vector.load %arg4[%c4_471, %c0_472, %c0_473] : memref<9x1x256xf32, #tpu.memory_space<vmem>>, vector<1x1x256xf32>
    %538 = vector.shape_cast %537 : vector<1x1x256xf32> to vector<1x256xf32>
    %539 = vector.broadcast %538 : vector<1x256xf32> to vector<8x256xf32>
    %540 = arith.mulf %493, %539 : vector<8x256xf32>
    %c5_474 = arith.constant 5 : index
    %c4_475 = arith.constant 4 : index
    %c0_476 = arith.constant 0 : index
    %c0_477 = arith.constant 0 : index
    %541 = vector.load %arg2[%c5_474, %c4_475, %c0_476, %c0_477] : memref<6x9x8x8xf32, #tpu.memory_space<vmem>>, vector<1x1x8x8xf32>
    %542 = vector.shape_cast %541 : vector<1x1x8x8xf32> to vector<8x8xf32>
    %cst_478 = arith.constant dense<0.000000e+00> : vector<8x256xf32>
    %543 = tpu.matmul %542, %540, %cst_478 {dimension_numbers = #tpu.dot_dimension_numbers<[1], [0], [0], [1], [0, 0, 1, 1], [], []>} : vector<8x8xf32>, vector<8x256xf32>, vector<8x256xf32> -> vector<8x256xf32>
    %544 = arith.addf %536, %543 : vector<8x256xf32>
    %545 = arith.select %8, %501, %500 : vector<8x256xi1>, vector<8x256xf32>
    %c5_479 = arith.constant 5 : index
    %c0_480 = arith.constant 0 : index
    %c0_481 = arith.constant 0 : index
    %546 = vector.load %arg4[%c5_479, %c0_480, %c0_481] : memref<9x1x256xf32, #tpu.memory_space<vmem>>, vector<1x1x256xf32>
    %547 = vector.shape_cast %546 : vector<1x1x256xf32> to vector<1x256xf32>
    %548 = vector.broadcast %547 : vector<1x256xf32> to vector<8x256xf32>
    %549 = arith.mulf %545, %548 : vector<8x256xf32>
    %c5_482 = arith.constant 5 : index
    %c5_483 = arith.constant 5 : index
    %c0_484 = arith.constant 0 : index
    %c0_485 = arith.constant 0 : index
    %550 = vector.load %arg2[%c5_482, %c5_483, %c0_484, %c0_485] : memref<6x9x8x8xf32, #tpu.memory_space<vmem>>, vector<1x1x8x8xf32>
    %551 = vector.shape_cast %550 : vector<1x1x8x8xf32> to vector<8x8xf32>
    %cst_486 = arith.constant dense<0.000000e+00> : vector<8x256xf32>
    %552 = tpu.matmul %551, %549, %cst_486 {dimension_numbers = #tpu.dot_dimension_numbers<[1], [0], [0], [1], [0, 0, 1, 1], [], []>} : vector<8x8xf32>, vector<8x256xf32>, vector<8x256xf32> -> vector<8x256xf32>
    %553 = arith.addf %544, %552 : vector<8x256xf32>
    %554 = arith.select %8, %498, %499 : vector<8x256xi1>, vector<8x256xf32>
    %c6_487 = arith.constant 6 : index
    %c0_488 = arith.constant 0 : index
    %c0_489 = arith.constant 0 : index
    %555 = vector.load %arg4[%c6_487, %c0_488, %c0_489] : memref<9x1x256xf32, #tpu.memory_space<vmem>>, vector<1x1x256xf32>
    %556 = vector.shape_cast %555 : vector<1x1x256xf32> to vector<1x256xf32>
    %557 = vector.broadcast %556 : vector<1x256xf32> to vector<8x256xf32>
    %558 = arith.mulf %554, %557 : vector<8x256xf32>
    %c5_490 = arith.constant 5 : index
    %c6_491 = arith.constant 6 : index
    %c0_492 = arith.constant 0 : index
    %c0_493 = arith.constant 0 : index
    %559 = vector.load %arg2[%c5_490, %c6_491, %c0_492, %c0_493] : memref<6x9x8x8xf32, #tpu.memory_space<vmem>>, vector<1x1x8x8xf32>
    %560 = vector.shape_cast %559 : vector<1x1x8x8xf32> to vector<8x8xf32>
    %cst_494 = arith.constant dense<0.000000e+00> : vector<8x256xf32>
    %561 = tpu.matmul %560, %558, %cst_494 {dimension_numbers = #tpu.dot_dimension_numbers<[1], [0], [0], [1], [0, 0, 1, 1], [], []>} : vector<8x8xf32>, vector<8x256xf32>, vector<8x256xf32> -> vector<8x256xf32>
    %562 = arith.addf %553, %561 : vector<8x256xf32>
    %563 = arith.select %8, %497, %496 : vector<8x256xi1>, vector<8x256xf32>
    %c7_495 = arith.constant 7 : index
    %c0_496 = arith.constant 0 : index
    %c0_497 = arith.constant 0 : index
    %564 = vector.load %arg4[%c7_495, %c0_496, %c0_497] : memref<9x1x256xf32, #tpu.memory_space<vmem>>, vector<1x1x256xf32>
    %565 = vector.shape_cast %564 : vector<1x1x256xf32> to vector<1x256xf32>
    %566 = vector.broadcast %565 : vector<1x256xf32> to vector<8x256xf32>
    %567 = arith.mulf %563, %566 : vector<8x256xf32>
    %c5_498 = arith.constant 5 : index
    %c7_499 = arith.constant 7 : index
    %c0_500 = arith.constant 0 : index
    %c0_501 = arith.constant 0 : index
    %568 = vector.load %arg2[%c5_498, %c7_499, %c0_500, %c0_501] : memref<6x9x8x8xf32, #tpu.memory_space<vmem>>, vector<1x1x8x8xf32>
    %569 = vector.shape_cast %568 : vector<1x1x8x8xf32> to vector<8x8xf32>
    %cst_502 = arith.constant dense<0.000000e+00> : vector<8x256xf32>
    %570 = tpu.matmul %569, %567, %cst_502 {dimension_numbers = #tpu.dot_dimension_numbers<[1], [0], [0], [1], [0, 0, 1, 1], [], []>} : vector<8x8xf32>, vector<8x256xf32>, vector<8x256xf32> -> vector<8x256xf32>
    %571 = arith.addf %562, %570 : vector<8x256xf32>
    %572 = arith.select %8, %495, %494 : vector<8x256xi1>, vector<8x256xf32>
    %c8_503 = arith.constant 8 : index
    %c0_504 = arith.constant 0 : index
    %c0_505 = arith.constant 0 : index
    %573 = vector.load %arg4[%c8_503, %c0_504, %c0_505] : memref<9x1x256xf32, #tpu.memory_space<vmem>>, vector<1x1x256xf32>
    %574 = vector.shape_cast %573 : vector<1x1x256xf32> to vector<1x256xf32>
    %575 = vector.broadcast %574 : vector<1x256xf32> to vector<8x256xf32>
    %576 = arith.mulf %572, %575 : vector<8x256xf32>
    %c5_506 = arith.constant 5 : index
    %c8_507 = arith.constant 8 : index
    %c0_508 = arith.constant 0 : index
    %c0_509 = arith.constant 0 : index
    %577 = vector.load %arg2[%c5_506, %c8_507, %c0_508, %c0_509] : memref<6x9x8x8xf32, #tpu.memory_space<vmem>>, vector<1x1x8x8xf32>
    %578 = vector.shape_cast %577 : vector<1x1x8x8xf32> to vector<8x8xf32>
    %cst_510 = arith.constant dense<0.000000e+00> : vector<8x256xf32>
    %579 = tpu.matmul %578, %576, %cst_510 {dimension_numbers = #tpu.dot_dimension_numbers<[1], [0], [0], [1], [0, 0, 1, 1], [], []>} : vector<8x8xf32>, vector<8x256xf32>, vector<8x256xf32> -> vector<8x256xf32>
    %580 = arith.addf %571, %579 : vector<8x256xf32>
    %c5_511 = arith.constant 5 : index
    %c0_512 = arith.constant 0 : index
    %c0_513 = arith.constant 0 : index
    %c0_514 = arith.constant 0 : index
    %581 = vector.load %arg3[%c5_511, %c0_512, %c0_513, %c0_514] : memref<6x2x8x1xf32, #tpu.memory_space<vmem>>, vector<1x1x8x1xf32>
    %582 = vector.shape_cast %581 : vector<1x1x8x1xf32> to vector<8x1xf32>
    %583 = vector.broadcast %582 : vector<8x1xf32> to vector<8x256xf32>
    %584 = arith.mulf %580, %583 : vector<8x256xf32>
    %c5_515 = arith.constant 5 : index
    %c1_516 = arith.constant 1 : index
    %c0_517 = arith.constant 0 : index
    %c0_518 = arith.constant 0 : index
    %585 = vector.load %arg3[%c5_515, %c1_516, %c0_517, %c0_518] : memref<6x2x8x1xf32, #tpu.memory_space<vmem>>, vector<1x1x8x1xf32>
    %586 = vector.shape_cast %585 : vector<1x1x8x1xf32> to vector<8x1xf32>
    %587 = vector.broadcast %586 : vector<8x1xf32> to vector<8x256xf32>
    %588 = arith.addf %584, %587 : vector<8x256xf32>
    %589 = arith.addf %588, %107 : vector<8x256xf32>
    %c0_519 = arith.constant 0 : index
    %c0_520 = arith.constant 0 : index
    %c0_521 = arith.constant 0 : index
    %590 = vector.load %arg5[%c0_519, %c0_520, %c0_521] : memref<1x8x256xf32, #tpu.memory_space<vmem>>, vector<1x8x256xf32>
    %591 = vector.shape_cast %590 : vector<1x8x256xf32> to vector<8x256xf32>
    %592 = vector.shape_cast %589 : vector<8x256xf32> to vector<1x8x256xf32>
    tpu.vector_store %arg5[%c0_519, %c0_520, %c0_521], %592 {strides = array<i32>} : memref<1x8x256xf32, #tpu.memory_space<vmem>>, vector<1x8x256xf32>,
    return
  }
  func.func @transform_0(%arg0: i32) -> (i32, i32, i32) {
    %c0_i32 = arith.constant 0 : i32
    %c0_i32_0 = arith.constant 0 : i32
    %c0_i32_1 = arith.constant 0 : i32
    return %arg0, %c0_i32, %c0_i32_0 : i32, i32, i32
  }
  func.func @transform_1(%arg0: i32) -> (i32, i32, i32, i32) {
    %c0_i32 = arith.constant 0 : i32
    %c0_i32_0 = arith.constant 0 : i32
    %c0_i32_1 = arith.constant 0 : i32
    %c0_i32_2 = arith.constant 0 : i32
    %c0_i32_3 = arith.constant 0 : i32
    return %c0_i32, %c0_i32_0, %c0_i32_1, %c0_i32_2 : i32, i32, i32, i32
  }
  func.func @transform_2(%arg0: i32) -> (i32, i32, i32, i32) {
    %c0_i32 = arith.constant 0 : i32
    %c0_i32_0 = arith.constant 0 : i32
    %c0_i32_1 = arith.constant 0 : i32
    %c0_i32_2 = arith.constant 0 : i32
    %c0_i32_3 = arith.constant 0 : i32
    return %c0_i32, %c0_i32_0, %c0_i32_1, %c0_i32_2 : i32, i32, i32, i32
  }
  func.func @transform_3(%arg0: i32) -> (i32, i32, i32) {
    %c0_i32 = arith.constant 0 : i32
    %c0_i32_0 = arith.constant 0 : i32
    %c0_i32_1 = arith.constant 0 : i32
    %c0_i32_2 = arith.constant 0 : i32
    return %c0_i32, %c0_i32_0, %c0_i32_1 : i32, i32, i32
  }
  func.func @transform_4(%arg0: i32) -> (i32, i32, i32) {
    %c0_i32 = arith.constant 0 : i32
    %c0_i32_0 = arith.constant 0 : i32
    %c0_i32_1 = arith.constant 0 : i32
    return %arg0, %c0_i32, %c0_i32_0 : i32, i32, i32
  }
}

</mosaic_0001>

<bundles_post_ra>
// kernel: basic_block_forward.1
= control target key start
LH: loop header
LB: loop body
LE: loop exit
PB: predicated region body
PF: predicated region fallthrough
CT: control target
= control target key end

     0   :  { %s5497_s15 = smov 0   ;;  %s6862_s0 = inlined_call_operand.vmem [shape: f32[2,8,256], index: 0, kind: input, shape index: {}]   ;;  %s6863_s1 = inlined_call_operand.vmem [shape: f32[6,9,8,8], index: 1, kind: input, shape index: {}]   ;;  %s6864_s2 = inlined_call_operand.vmem [shape: f32[6,2,8,1], index: 2, kind: input, shape index: {}]   ;;  %s6865_s3 = inlined_call_operand.vmem [shape: f32[9,1,256], index: 3, kind: input, shape index: {}]   ;;  %s6866_s4 = inlined_call_operand.vmem [shape: f32[2,8,256], index: 4, kind: output, shape index: {}]  }
   0x1 LB: > { %s5197_s16 = sadd.s32 4294967295, %s5460_s15   ;;  %p5201_p0 = scmp.ge.s32.totalorder %s5460_s15, 1  ;;  %s5460_s15 = sphi %s5497_s15, %s14_s15  }
   0x2   : > { %p162_p1 = scmp.lt.s32.totalorder %s5460_s15, 3 }
   0x4   : > { %p163_p2 = pnand %p5201_p0, %p162_p1 }
   0x5   : > { %v198_v0 = vlaneseq (!%p163_p2)  ;;  %p188_p3 = scmp.lt.s32.totalorder (!%p163_p2), %s5197_s16, 1  ;;  %s5462_s17 = smov (!%p163_p2), 1   ;;  %v5464_v5 = vmov (!%p163_p2), 0.0   ;;  %v1121_v6 = vld [vmem:[%s6864_s2] sm:$0xff] (!%p163_p2)  ;;  %v5233_v7 = vld [vmem:[%s6864_s2 + $0x8] sm:$0xff] (!%p163_p2)  ;;  %v5471_v8 = vmov (!%p163_p2), 0  }
   0x6   : > { %166 = sbr.rel (%p163_p2) target bundleno = 2470 (0x9a6), region = 36  ;;  %s5463_s22 = smov (!%p163_p2), 16   ;;  %377 = vmatprep.mubr.f32.mxu0 (!%p163_p2), %v5464_v5  ;;  %1267 = vmatprep.mubr.f32.mxu1 (!%p163_p2), %v5464_v5  ;;  %v5208_v18 = vld [vmem:[%s6865_s3 + $0x2] sm:$0x3] (!%p163_p2)  ;;  %v5209_v38 = vld [vmem:[%s6863_s1 + $0x8] sm:$0xff] (!%p163_p2)  ;;  %vm309_vm6 = vcmask (!%p163_p2), 64512  }
   0x7   : > { %v5505_v1 = vand.u32 (!%p163_p2), 127, %v198_v0  ;;  %s5465_s23 = smov (!%p163_p2), 112   ;;  %s5466_s24 = smov (!%p163_p2), 17   ;;  %5452 = vset.pattern.permute.xlu0 (!%p163_p2), %v5471_v8  ;;  %5453 = vset.pattern.permute.xlu1 (!%p163_p2), %v5471_v8  ;;  %v278_v10 = vshrl.u32 (!%p163_p2), %v198_v0, 7  ;;  %v275_v39 = vld [vmem:[%s6865_s3] sm:$0x3] (!%p163_p2) }
   0x8   : > { %s5467_s25 = smov (!%p163_p2), 111   ;;  %s5468_s26 = smov (!%p163_p2), 113   ;;  %v289_v54 = vld [vmem:[%s6863_s1] sm:$0xff] (!%p163_p2) }
   0x9   : > { %201 = vrot.lane.b32.xlu0 (!%p163_p2), %v5505_v1, %s5462_s17  ;;  %v200_v2 = vadd.s32 (!%p163_p2), 128, %v5505_v1  ;;  %s5469_s27 = smov (!%p163_p2), 15   ;;  %s5470_s28 = smov (!%p163_p2), 127   ;;  %v5206_v12 = vadd.s32 (!%p163_p2), 4294967295, %v5505_v1  ;;  %vm208_vm0 = vcmp.eq.s32.totalorder (!%p163_p2), %v5505_v1, 0  ;;  %vm205_vm1 = vcmp.lt.s32.totalorder (!%p163_p2), %v5505_v1, 1 }
   0xa   : > { %v5566_v14 = vsub.s32 (!%p163_p2), 0, %v278_v10  ;;  %v5568_v15 = vsub.s32 (!%p163_p2), 1, %v278_v10  ;;  %vm236_vm2 = vcmp.lt.s32.totalorder (!%p163_p2), %v5505_v1, 16  ;;  %vm243_vm3 = vcmp.lt.s32.totalorder (!%p163_p2), %v5505_v1, 112  ;;  %v5212_v55 = vld [vmem:[%s6865_s3 + $0x4] sm:$0x3] (!%p163_p2) }
   0xb   : > { %v5207_v16 = vadd.s32 (!%p163_p2), 4294967295, %v200_v2  ;;  %v212_v19 = vsel (!%p163_p2), %vm208_vm0, 255, %v5206_v12  ;;  %vm222_vm7 = vcmp.lt.s32.totalorder (!%p163_p2), %v5505_v1, 17  ;;  %vm229_vm8 = vcmp.lt.s32.totalorder (!%p163_p2), %v5505_v1, 111  ;;  %v5213_v10 = vld [vmem:[%s6863_s1 + $0x10] sm:$0xff] (!%p163_p2) }
   0xc   : > { %v5580_v23 = vrot.slane (!%p163_p2), %v5208_v18, %v5568_v15  ;;  %v5583_v24 = vrot.slane (!%p163_p2), %v5208_v18, %v5566_v14  ;;  %v5629_v41 = vrot.slane (!%p163_p2), %v275_v39, %v5566_v14  ;;  %v5632_v42 = vrot.slane (!%p163_p2), %v275_v39, %v5568_v15  ;;  %v5218_v12 = vld [vmem:[%s6865_s3 + $0x8] sm:$0x3] (!%p163_p2) }
   0xd   : > { %s6872_s16 = smov (!%p188_p3, %s5197_s16), 1  ;;  %203 = vrot.lane.b32.xlu0 %v200_v2, %s5462_s17  ;;  %vm250_vm9 = vcmp.lt.s32.totalorder %v5505_v1, 113  ;;  %vm257_vm10 = vcmp.lt.s32.totalorder %v5505_v1, 15  ;;  %v5671_v57 = vrot.slane %v5212_v55, %v5566_v14  ;;  %v5674_v58 = vrot.slane %v5212_v55, %v5568_v15 }
   0xe   : > { %s5336_s18 = sshll.u32 %s6872_s16, 4  ;;  %vm270_vm11 = vcmp.lt.s32.totalorder %v5505_v1, 127  ;;  %v5712_v18 = vrot.slane %v5218_v12, %v5568_v15 }
   0xf   : > { %s192_s21 = scalar_lea.vmem %s6862_s0, %s5336_s18 }
  0x10   : > { %v5518_v3 = vld [vmem:[%s192_s21] sm:$0xff]  ;;  %v5523_v4 = vld [vmem:[%s192_s21 + $0x8] sm:$0xff] }
  0x11   : > { %232 = vrot.lane.b32.xlu1 %v5518_v3, %s5463_s22  ;;  %239 = vrot.lane.b32.xlu0 %v5518_v3, %s5465_s23 }
  0x15   : > { %234 = vrot.lane.b32.xlu1 %v5523_v4, %s5463_s22  ;;  %218 = vrot.lane.b32.xlu0 %v5518_v3, %s5466_s24 }
  0x19   : > { %241 = vrot.lane.b32.xlu1 %v5523_v4, %s5465_s23  ;;  %225 = vrot.lane.b32.xlu0 %v5518_v3, %s5467_s25 }
  0x1d   : > { %220 = vrot.lane.b32.xlu1 %v5523_v4, %s5466_s24  ;;  %246 = vrot.lane.b32.xlu0 %v5518_v3, %s5468_s26 }
  0x21   : > { %227 = vrot.lane.b32.xlu1 %v5523_v4, %s5467_s25  ;;  %253 = vrot.lane.b32.xlu0 %v5518_v3, %s5469_s27 }
  0x25   : > { %248 = vrot.lane.b32.xlu1 %v5523_v4, %s5468_s26  ;;  %260 = vrot.lane.b32.xlu0 %v5518_v3, %s5462_s17 }
  0x29   : > { %255 = vrot.lane.b32.xlu1 %v5523_v4, %s5469_s27  ;;  %266 = vrot.lane.b32.xlu0 %v5518_v3, %s5470_s28 }
  0x2d   : > { %262 = vrot.lane.b32.xlu1 %v5523_v4, %s5462_s17  ;;  %1124 = vperm.xlu0 %5452, %v1121_v6  }
  0x31   : > { %268 = vrot.lane.b32.xlu1 %v5523_v4, %s5470_s28 }
  0x35   : > { %1133 = vperm.xlu1 %5453, %v5233_v7  }
  0x7b   : > { %v202_v9 = vpop.permute.xlu0 %201 }
  0x7f   : > { %v204_v13 = vpop.permute.xlu0 %203 }
  0x80   : > { %v206_v20 = vsel %vm205_vm1, %v202_v9, %v204_v13  ;;  %v207_v21 = vsel %vm205_vm1, %v204_v13, %v202_v9 }
  0x81   : > { %vm5585_vm4 = vcmp.eq.s32.totalorder %v207_v21, %v212_v19  ;;  %vm5589_vm5 = vcmp.eq.s32.totalorder %v206_v20, %v5207_v16  ;;  %v5221_v19 = vld [vmem:[%s6865_s3 + $0xa] sm:$0x3]  ;;  %v5719_v21 = vrot.slane %v5218_v12, %v5566_v14 }
  0x82   : > { %v5738_v39 = vrot.slane %v5221_v19, %v5568_v15 }
  0x83   : > { %v233_v11 = vpop.permute.xlu1 %232  ;;  %v240_v22 = vpop.permute.xlu0 %239 }
  0x87   : > { %v235_v17 = vpop.permute.xlu1 %234  ;;  %v219_v30 = vpop.permute.xlu0 %218 }
  0x88   : > { %v5595_v28 = vsel %vm236_vm2, %v235_v17, %v233_v11  ;;  %v5603_v31 = vsel %vm236_vm2, %v233_v11, %v235_v17  ;;  %v5215_v11 = vld [vmem:[%s6865_s3 + $0x6] sm:$0x3] }
  0x89   : > { %v5706_v16 = vrot.slane %v5215_v11, %v5566_v14  ;;  %v5709_v17 = vrot.slane %v5215_v11, %v5568_v15 }
  0x8b   : > { %v242_v27 = vpop.permute.xlu1 %241  ;;  %v226_v40 = vpop.permute.xlu0 %225 }
  0x8c   : > { %v5599_v29 = vsel %vm243_vm3, %v240_v22, %v242_v27  ;;  %v5607_v32 = vsel %vm243_vm3, %v242_v27, %v240_v22 }
  0x8d   : > { %v291_v33 = vsel %vm5589_vm5, %v5603_v31, %v5607_v32  ;;  %v290_v34 = vsel %vm5585_vm4, %v5595_v28, %v5599_v29 }
  0x8e   : > { %v306_v35 = vmul.f32 %v5580_v23, %v291_v33  ;;  %v305_v36 = vmul.f32 %v5583_v24, %v290_v34 }
  0x8f   : > { %v221_v37 = vpop.permute.xlu1 %220  ;;  %v247_v48 = vpop.permute.xlu0 %246 }
  0x90   : > { %313 = vmatprep.subr.mxu0 %v306_v35  ;;  %v5637_v44 = vsel %vm222_vm7, %v219_v30, %v221_v37  ;;  %v5641_v45 = vsel %vm222_vm7, %v221_v37, %v219_v30 }
  0x91   : > { %314 = vmatpush1.msra.mxu0 %v305_v36 }
  0x92   : > { %5210 = vmatmul.mubr.msk.f32.vlgmr.msra.gmra.mrb[0].mxu0 %vm309_vm6, %v5209_v38  ;;  %v662_v38 = vmul.f32 %v5712_v18, %v5523_v4 }
  0x93   : > { %v228_v43 = vpop.permute.xlu1 %227  ;;  %451 = vmatprep.mubr.f32.mxu0 %v5464_v5  ;;  %v254_v56 = vpop.permute.xlu0 %253 }
  0x94   : > { %v5645_v46 = vsel %vm229_vm8, %v226_v40, %v228_v43  ;;  %v5649_v47 = vsel %vm229_vm8, %v228_v43, %v226_v40  ;;  %v5216_v43 = vld [vmem:[%s6863_s1 + $0x18] sm:$0xff] }
  0x95   : > { %v273_v49 = vsel %vm5585_vm4, %v5641_v45, %v5645_v46  ;;  %v274_v50 = vsel %vm5589_vm5, %v5637_v44, %v5649_v47 }
  0x96   : > { %v287_v51 = vmul.f32 %v5629_v41, %v273_v49  ;;  %v288_v52 = vmul.f32 %v5632_v42, %v274_v50  ;;  %v5224_v49 = vld [vmem:[%s6865_s3 + $0xc] sm:$0x3]  ;;  %v5754_v50 = vrot.slane %v5221_v19, %v5566_v14 }
  0x97   : > { %v249_v53 = vpop.permute.xlu1 %248  ;;  %v261_v0 = vpop.permute.xlu0 %260 }
  0x98   : > { %387 = vmatprep.subr.mxu0 %v288_v52  ;;  %v5679_v60 = vsel %vm250_vm9, %v247_v48, %v249_v53  ;;  %v252_v61 = vsel %vm250_vm9, %v249_v53, %v247_v48  ;;  %v661_v48 = vmul.f32 %v5719_v21, %v5518_v3  ;;  %v5219_v53 = vld [vmem:[%s6863_s1 + $0x20] sm:$0xff] }
  0x99   : > { %388 = vmatpush1.msra.mxu0 %v287_v51  ;;  %v5759_v51 = vrot.slane %v5224_v49, %v5568_v15 }
  0x9a   : > { %5211 = vmatmul.mubr.msk.f32.vlgmr.msra.gmra.mrb[0].mxu0 %vm309_vm6, %v289_v54 }
  0x9b   : > { %v256_v59 = vpop.permute.xlu1 %255  ;;  %544 = vmatprep.mubr.f32.mxu0 %v5464_v5  ;;  %v267_v13 = vpop.permute.xlu0 %266 }
  0x9c   : > { %v258_v62 = vsel %vm257_vm10, %v254_v56, %v256_v59  ;;  %v259_v63 = vsel %vm257_vm10, %v256_v59, %v254_v56  ;;  %v5227_v56 = vld [vmem:[%s6865_s3 + $0xe] sm:$0x3]  ;;  %v5774_v59 = vrot.slane %v5224_v49, %v5566_v14 }
  0x9d   : > { %v458_v2 = vsel %vm5585_vm4, %v259_v63, %v5679_v60  ;;  %v459_v6 = vsel %vm5589_vm5, %v258_v62, %v252_v61  ;;  %v837_v52 = vsel %vm5589_vm5, %v252_v61, %v258_v62  ;;  %v836_v61 = vsel %vm5585_vm4, %v5679_v60, %v259_v63  ;;  %v5230_v60 = vld [vmem:[%s6865_s3 + $0x10] sm:$0x3] }
  0x9e   : > { %v473_v7 = vmul.f32 %v5671_v57, %v458_v2  ;;  %v474_v8 = vmul.f32 %v5674_v58, %v459_v6  ;;  %v852_v55 = vmul.f32 %v5759_v51, %v837_v52  ;;  %v5780_v62 = vrot.slane %v5227_v56, %v5568_v15 }
  0x9f   : > { %v263_v9 = vpop.permute.xlu1 %262  ;;  %v932_v2 = vsel %vm5589_vm5, %v5607_v32, %v5603_v31  ;;  %v851_v6 = vmul.f32 %v5774_v59, %v836_v61  ;;  %v5797_v63 = vrot.slane %v5227_v56, %v5566_v14  ;;  %v931_v31 = vsel %vm5585_vm4, %v5599_v29, %v5595_v28  ;;  %v5228_v29 = vld [vmem:[%s6863_s1 + $0x38] sm:$0xff]  ;;  %v5235_v56 = vld [vmem:[%s6863_s1 + $0x50] sm:$0xff] }
  0xa0   : > { %480 = vmatprep.subr.mxu0 %v474_v8  ;;  %v264_v22 = vsel %vm205_vm1, %v261_v0, %v263_v9  ;;  %v265_v27 = vsel %vm205_vm1, %v263_v9, %v261_v0  ;;  %v5222_v0 = vld [vmem:[%s6863_s1 + $0x28] sm:$0xff]  ;;  %v5804_v32 = vrot.slane %v5230_v60, %v5568_v15  ;;  %v5225_v8 = vld [vmem:[%s6863_s1 + $0x30] sm:$0xff]  ;;  %v1027_v9 = vsel %vm5589_vm5, %v5649_v47, %v5637_v44 }
  0xa1   : > { %481 = vmatpush1.msra.mxu0 %v473_v7  ;;  %v947_v7 = vmul.f32 %v5780_v62, %v932_v2  ;;  %v5818_v15 = vrot.slane %v5230_v60, %v5566_v14  ;;  %v1026_v28 = vsel %vm5585_vm4, %v5645_v46, %v5641_v45  ;;  %v5231_v14 = vld [vmem:[%s6863_s1 + $0x40] sm:$0xff] }
  0xa2   : > { %5214 = vmatmul.mubr.msk.f32.vlgmr.msra.gmra.mrb[0].mxu0 %vm309_vm6, %v5213_v10  ;;  %v946_v10 = vmul.f32 %v5797_v63, %v931_v31  ;;  %v1042_v11 = vmul.f32 %v5804_v32, %v1027_v9 }
  0xa3   : > { %v269_v20 = vpop.permute.xlu1 %268  ;;  %639 = vmatprep.mubr.f32.mxu0 %v5464_v5  ;;  %v1041_v44 = vmul.f32 %v5818_v15, %v1026_v28 }
  0xa4   : > { %v271_v30 = vsel %vm270_vm11, %v267_v13, %v269_v20  ;;  %v272_v33 = vsel %vm270_vm11, %v269_v20, %v267_v13 }
  0xa5   : > { %v553_v34 = vsel %vm5585_vm4, %v265_v27, %v271_v30  ;;  %v554_v35 = vsel %vm5589_vm5, %v264_v22, %v272_v33  ;;  %v742_v40 = vsel %vm5589_vm5, %v272_v33, %v264_v22  ;;  %v741_v3 = vsel %vm5585_vm4, %v271_v30, %v265_v27  ;;  %v5252_v33 = vld [vmem:[%s6864_s2 + $0x10] sm:$0xff] }
  0xa6   : > { %v568_v36 = vmul.f32 %v5706_v16, %v553_v34  ;;  %v569_v37 = vmul.f32 %v5709_v17, %v554_v35  ;;  %v757_v4 = vmul.f32 %v5738_v39, %v742_v40  ;;  %v756_v54 = vmul.f32 %v5754_v50, %v741_v3  ;;  %v5253_v34 = vld [vmem:[%s6864_s2 + $0x18] sm:$0xff] }
  0xa8   : > { %575 = vmatprep.subr.mxu0 %v569_v37 }
  0xa9   : > { %576 = vmatpush1.msra.mxu0 %v568_v36 }
  0xaa   : > { %5217 = vmatmul.mubr.msk.f32.vlgmr.msra.gmra.mrb[0].mxu0 %vm309_vm6, %v5216_v43  ;;  %668 = vmatprep.subr.mxu0 %v662_v38 }
  0xab   : > { %669 = vmatpush1.msra.mxu0 %v661_v48  ;;  %732 = vmatprep.mubr.f32.mxu0 %v5464_v5 }
  0xac   : > { %763 = vmatprep.subr.mxu0 %v757_v4  ;;  %v1125_v45 = vpop.permute.xlu0 %1124 }
  0xb2   : > { %5220 = vmatmul.mubr.msk.f32.vlgmr.msra.gmra.mrb[0].mxu0 %vm309_vm6, %v5219_v53 }
  0xb3   : > { %764 = vmatpush1.msra.mxu0 %v756_v54  ;;  %827 = vmatprep.mubr.f32.mxu0 %v5464_v5 }
  0xb4   : > { %858 = vmatprep.subr.mxu0 %v852_v55  ;;  %v1134_v47 = vpop.permute.xlu1 %1133 }
  0xba   : > { %5223 = vmatmul.mubr.msk.f32.vlgmr.msra.gmra.mrb[0].mxu0 %vm309_vm6, %v5222_v0 }
  0xbb   : > { %859 = vmatpush1.msra.mxu0 %v851_v6  ;;  %922 = vmatprep.mubr.f32.mxu0 %v5464_v5 }
  0xbc   : > { %953 = vmatprep.subr.mxu0 %v947_v7 }
  0xc2   : > { %5226 = vmatmul.mubr.msk.f32.vlgmr.msra.gmra.mrb[0].mxu0 %vm309_vm6, %v5225_v8 }
  0xc3   : > { %954 = vmatpush1.msra.mxu0 %v946_v10  ;;  %1017 = vmatprep.mubr.f32.mxu0 %v5464_v5 }
  0xc4   : > { %1048 = vmatprep.subr.mxu0 %v1042_v11 }
  0xca   : > { %5229 = vmatmul.mubr.msk.f32.vlgmr.msra.gmra.mrb[0].mxu0 %vm309_vm6, %v5228_v29  ;;  %v5234_v29 = vld [vmem:[%s6863_s1 + $0x48] sm:$0xff] }
  0xcb   : > { %1049 = vmatpush1.msra.mxu0 %v1041_v44  ;;  %1112 = vmatprep.mubr.f32.mxu0 %v5464_v5 }
  0xd2   : > { %5232 = vmatmul.mubr.msk.f32.vlgmr.msra.gmra.mrb[0].mxu0 %vm309_vm6, %v5231_v14 }
  0xd3   : > { %2067 = vmatprep.mubr.f32.mxu0 %v5464_v5 }
 0x1a5   : > { %v1114_v46 = vpop.f32.mrb[0].mxu0 }
 0x1a6   : > { %v1127_v12 = vmul.f32 %v1125_v45, %v1114_v46  ;;  %v1116_v13 = vpop.f32.mrb[1].mxu0 }
 0x1a7   : > { %v1128_v19 = vmul.f32 %v1125_v45, %v1116_v13 }
 0x1a8   : > { %v1136_v20 = vadd.f32 %v1134_v47, %v1127_v12 }
 0x1a9   : > { %v1137_v22 = vadd.f32 %v1134_v47, %v1128_v19 }
 0x1aa   : > { %v5835_v27 = vmax.f32 %v1136_v20, 0.0 }
 0x1ab   : > { %v5837_v30 = vmax.f32 %v1137_v22, 0.0 }
 0x1ac   : > { %1152 = vrot.lane.b32.xlu1 %v5835_v27, %s5463_s22 }
 0x1ad   : > { %1154 = vrot.lane.b32.xlu0 %v5837_v30, %s5463_s22 }
 0x1b0   : > { %1158 = vrot.lane.b32.xlu1 %v5835_v27, %s5465_s23 }
 0x1b1   : > { %1160 = vrot.lane.b32.xlu0 %v5837_v30, %s5465_s23 }
 0x1b4   : > { %1140 = vrot.lane.b32.xlu1 %v5835_v27, %s5466_s24 }
 0x1b5   : > { %1142 = vrot.lane.b32.xlu0 %v5837_v30, %s5466_s24 }
 0x1b8   : > { %1146 = vrot.lane.b32.xlu1 %v5835_v27, %s5467_s25 }
 0x1b9   : > { %1148 = vrot.lane.b32.xlu0 %v5837_v30, %s5467_s25 }
 0x1bc   : > { %1164 = vrot.lane.b32.xlu1 %v5835_v27, %s5468_s26 }
 0x1bd   : > { %1166 = vrot.lane.b32.xlu0 %v5837_v30, %s5468_s26 }
 0x1c0   : > { %1170 = vrot.lane.b32.xlu1 %v5835_v27, %s5469_s27 }
 0x1c1   : > { %1172 = vrot.lane.b32.xlu0 %v5837_v30, %s5469_s27 }
 0x1c4   : > { %1176 = vrot.lane.b32.xlu1 %v5835_v27, %s5462_s17 }
 0x1c5   : > { %1178 = vrot.lane.b32.xlu0 %v5837_v30, %s5462_s17 }
 0x1c8   : > { %1182 = vrot.lane.b32.xlu1 %v5835_v27, %s5470_s28 }
 0x1c9   : > { %1184 = vrot.lane.b32.xlu0 %v5837_v30, %s5470_s28 }
 0x1cc   : > { %1924 = vperm.xlu1 %5453, %v5252_v33  }
 0x1cd   : > { %1933 = vperm.xlu0 %5452, %v5253_v34  }
 0x21e   : > { %v1153_v35 = vpop.permute.xlu1 %1152 }
 0x21f   : > { %v1155_v36 = vpop.permute.xlu0 %1154 }
 0x220   : > { %v5879_v40 = vsel %vm236_vm2, %v1153_v35, %v1155_v36  ;;  %v5883_v43 = vsel %vm236_vm2, %v1155_v36, %v1153_v35  ;;  %v5238_v35 = vld [vmem:[%s6863_s1 + $0x58] sm:$0xff] }
 0x222   : > { %v1159_v37 = vpop.permute.xlu1 %1158 }
 0x223   : > { %v1161_v38 = vpop.permute.xlu0 %1160 }
 0x224   : > { %v5887_v48 = vsel %vm243_vm3, %v1159_v37, %v1161_v38  ;;  %v5891_v4 = vsel %vm243_vm3, %v1161_v38, %v1159_v37 }
 0x225   : > { %v1195_v49 = vsel %vm5589_vm5, %v5879_v40, %v5891_v4  ;;  %v1194_v3 = vsel %vm5585_vm4, %v5883_v43, %v5887_v48 }
 0x226   : > { %v1141_v52 = vpop.permute.xlu1 %1140  ;;  %v1197_v53 = vmul.f32 %v1195_v49, %v5580_v23  ;;  %v1196_v54 = vmul.f32 %v1194_v3, %v5583_v24 }
 0x227   : > { %v1143_v55 = vpop.permute.xlu0 %1142 }
 0x228   : > { %1203 = vmatprep.subr.mxu1 %v1197_v53  ;;  %v5910_v2 = vsel %vm222_vm7, %v1141_v52, %v1143_v55  ;;  %v5914_v6 = vsel %vm222_vm7, %v1143_v55, %v1141_v52 }
 0x229   : > { %1204 = vmatpush1.msra.mxu1 %v1196_v54 }
 0x22a   : > { %v1147_v61 = vpop.permute.xlu1 %1146  ;;  %5236 = vmatmul.mubr.msk.f32.vlgmr.msra.gmra.mrb[0].mxu1 %vm309_vm6, %v5235_v56 }
 0x22b   : > { %v1149_v0 = vpop.permute.xlu0 %1148  ;;  %1341 = vmatprep.mubr.f32.mxu1 %v5464_v5 }
 0x22c   : > { %v5918_v7 = vsel %vm229_vm8, %v1147_v61, %v1149_v0  ;;  %v5922_v60 = vsel %vm229_vm8, %v1149_v0, %v1147_v61  ;;  %v5240_v0 = vld [vmem:[%s6863_s1 + $0x60] sm:$0xff] }
 0x22d   : > { %v1188_v31 = vsel %vm5585_vm4, %v5914_v6, %v5918_v7  ;;  %v1189_v8 = vsel %vm5589_vm5, %v5910_v2, %v5922_v60 }
 0x22e   : > { %v1190_v9 = vmul.f32 %v1188_v31, %v5629_v41  ;;  %v1165_v10 = vpop.permute.xlu1 %1164  ;;  %v1191_v11 = vmul.f32 %v1189_v8, %v5632_v42  ;;  %v1513_v31 = vmul.f32 %v5837_v30, %v5712_v18  ;;  %v1512_v8 = vmul.f32 %v5835_v27, %v5719_v21 }
 0x22f   : > { %v1167_v28 = vpop.permute.xlu0 %1166 }
 0x230   : > { %1277 = vmatprep.subr.mxu1 %v1191_v11  ;;  %v1168_v45 = vsel %vm250_vm9, %v1165_v10, %v1167_v28  ;;  %v1169_v46 = vsel %vm250_vm9, %v1167_v28, %v1165_v10  ;;  %v5242_v28 = vld [vmem:[%s6863_s1 + $0x68] sm:$0xff] }
 0x231   : > { %1278 = vmatpush1.msra.mxu1 %v1190_v9 }
 0x232   : > { %v1171_v44 = vpop.permute.xlu1 %1170  ;;  %5237 = vmatmul.mubr.msk.f32.vlgmr.msra.gmra.mrb[0].mxu1 %vm309_vm6, %v5234_v29 }
 0x233   : > { %v1173_v14 = vpop.permute.xlu0 %1172  ;;  %1421 = vmatprep.mubr.f32.mxu1 %v5464_v5 }
 0x234   : > { %v1174_v47 = vsel %vm257_vm10, %v1171_v44, %v1173_v14  ;;  %v1175_v12 = vsel %vm257_vm10, %v1173_v14, %v1171_v44 }
 0x235   : > { %v1348_v13 = vsel %vm5585_vm4, %v1175_v12, %v1168_v45  ;;  %v1349_v19 = vsel %vm5589_vm5, %v1174_v47, %v1169_v46  ;;  %v1675_v11 = vsel %vm5589_vm5, %v1169_v46, %v1174_v47  ;;  %v1674_v14 = vsel %vm5585_vm4, %v1168_v45, %v1175_v12  ;;  %v5244_v47 = vld [vmem:[%s6863_s1 + $0x70] sm:$0xff] }
 0x236   : > { %v1350_v20 = vmul.f32 %v1348_v13, %v5671_v57  ;;  %v1177_v22 = vpop.permute.xlu1 %1176  ;;  %v1351_v33 = vmul.f32 %v1349_v19, %v5674_v58  ;;  %v1677_v44 = vmul.f32 %v1675_v11, %v5759_v51  ;;  %v1757_v46 = vsel %vm5589_vm5, %v5891_v4, %v5879_v40  ;;  %v5246_v4 = vld [vmem:[%s6863_s1 + $0x78] sm:$0xff] }
 0x237   : > { %v1179_v34 = vpop.permute.xlu0 %1178  ;;  %v1676_v13 = vmul.f32 %v1674_v14, %v5774_v59  ;;  %v1759_v19 = vmul.f32 %v1757_v46, %v5780_v62  ;;  %v1756_v45 = vsel %vm5585_vm4, %v5887_v48, %v5883_v43  ;;  %v1839_v40 = vsel %vm5589_vm5, %v5922_v60, %v5910_v2  ;;  %v5248_v48 = vld [vmem:[%s6863_s1 + $0x80] sm:$0xff]  ;;  %v5250_v60 = vld [vmem:[%s6863_s1 + $0x88] sm:$0xff]  ;;  %v5255_v14 = vld [vmem:[%s6863_s1 + $0x98] sm:$0xff] }
 0x238   : > { %1357 = vmatprep.subr.mxu1 %v1351_v33  ;;  %v1180_v38 = vsel %vm205_vm1, %v1177_v22, %v1179_v34  ;;  %v1181_v49 = vsel %vm205_vm1, %v1179_v34, %v1177_v22  ;;  %v1758_v12 = vmul.f32 %v1756_v45, %v5797_v63  ;;  %v1838_v43 = vsel %vm5585_vm4, %v5918_v7, %v5914_v6 }
 0x239   : > { %1358 = vmatpush1.msra.mxu1 %v1350_v20  ;;  %v1841_v20 = vmul.f32 %v1839_v40, %v5804_v32  ;;  %v1840_v2 = vmul.f32 %v1838_v43, %v5818_v15 }
 0x23a   : > { %v1183_v36 = vpop.permute.xlu1 %1182  ;;  %5239 = vmatmul.mubr.msk.f32.vlgmr.msra.gmra.mrb[0].mxu1 %vm309_vm6, %v5238_v35 }
 0x23b   : > { %v1185_v37 = vpop.permute.xlu0 %1184  ;;  %1503 = vmatprep.mubr.f32.mxu1 %v5464_v5 }
 0x23c   : > { %v1186_v3 = vsel %vm270_vm11, %v1183_v36, %v1185_v37  ;;  %v1187_v52 = vsel %vm270_vm11, %v1185_v37, %v1183_v36 }
 0x23d   : > { %v1430_v53 = vsel %vm5585_vm4, %v1181_v49, %v1186_v3  ;;  %v1431_v54 = vsel %vm5589_vm5, %v1180_v38, %v1187_v52  ;;  %v1593_v61 = vsel %vm5589_vm5, %v1187_v52, %v1180_v38  ;;  %v1592_v10 = vsel %vm5585_vm4, %v1186_v3, %v1181_v49  ;;  %v5272_v3 = vld [vmem:[%s6864_s2 + $0x20] sm:$0xff]  ;;  %v5273_v52 = vld [vmem:[%s6864_s2 + $0x28] sm:$0xff] }
 0x23e   : > { %v1432_v55 = vmul.f32 %v1430_v53, %v5706_v16  ;;  %v1433_v56 = vmul.f32 %v1431_v54, %v5709_v17  ;;  %v1595_v9 = vmul.f32 %v1593_v61, %v5738_v39  ;;  %v1594_v29 = vmul.f32 %v1592_v10, %v5754_v50 }
 0x240   : > { %1439 = vmatprep.subr.mxu1 %v1433_v56 }
 0x241   : > { %1440 = vmatpush1.msra.mxu1 %v1432_v55 }
 0x242   : > { %5241 = vmatmul.mubr.msk.f32.vlgmr.msra.gmra.mrb[0].mxu1 %vm309_vm6, %v5240_v0  ;;  %1519 = vmatprep.subr.mxu1 %v1513_v31 }
 0x243   : > { %1520 = vmatpush1.msra.mxu1 %v1512_v8  ;;  %1583 = vmatprep.mubr.f32.mxu1 %v5464_v5 }
 0x244   : > { %1601 = vmatprep.subr.mxu1 %v1595_v9 }
 0x24a   : > { %5243 = vmatmul.mubr.msk.f32.vlgmr.msra.gmra.mrb[0].mxu1 %vm309_vm6, %v5242_v28 }
 0x24b   : > { %1602 = vmatpush1.msra.mxu1 %v1594_v29  ;;  %1665 = vmatprep.mubr.f32.mxu1 %v5464_v5  ;;  %v1925_v6 = vpop.permute.xlu1 %1924 }
 0x24c   : > { %1683 = vmatprep.subr.mxu1 %v1677_v44  ;;  %v1934_v34 = vpop.permute.xlu0 %1933 }
 0x252   : > { %5245 = vmatmul.mubr.msk.f32.vlgmr.msra.gmra.mrb[0].mxu1 %vm309_vm6, %v5244_v47 }
 0x253   : > { %1684 = vmatpush1.msra.mxu1 %v1676_v13  ;;  %1747 = vmatprep.mubr.f32.mxu1 %v5464_v5 }
 0x254   : > { %1765 = vmatprep.subr.mxu1 %v1759_v19 }
 0x25a   : > { %5247 = vmatmul.mubr.msk.f32.vlgmr.msra.gmra.mrb[0].mxu1 %vm309_vm6, %v5246_v4 }
 0x25b   : > { %1766 = vmatpush1.msra.mxu1 %v1758_v12  ;;  %1829 = vmatprep.mubr.f32.mxu1 %v5464_v5 }
 0x25c   : > { %1847 = vmatprep.subr.mxu1 %v1841_v20 }
 0x262   : > { %5249 = vmatmul.mubr.msk.f32.vlgmr.msra.gmra.mrb[0].mxu1 %vm309_vm6, %v5248_v48 }
 0x263   : > { %1848 = vmatpush1.msra.mxu1 %v1840_v2  ;;  %1911 = vmatprep.mubr.f32.mxu1 %v5464_v5 }
 0x26a   : > { %5251 = vmatmul.mubr.msk.f32.vlgmr.msra.gmra.mrb[0].mxu1 %vm309_vm6, %v5250_v60  ;;  %v5254_v60 = vld [vmem:[%s6863_s1 + $0x90] sm:$0xff] }
 0x26b   : > { %2867 = vmatprep.mubr.f32.mxu1 %v5464_v5 }
 0x33d   : > { %v1913_v7 = vpop.f32.mrb[0].mxu1 }
 0x33e   : > { %v1927_v22 = vmul.f32 %v1925_v6, %v1913_v7  ;;  %v1915_v33 = vpop.f32.mrb[1].mxu1 }
 0x33f   : > { %v1928_v35 = vmul.f32 %v1925_v6, %v1915_v33 }
 0x340   : > { %v1936_v36 = vadd.f32 %v1934_v34, %v1927_v22 }
 0x341   : > { %v1937_v37 = vadd.f32 %v1934_v34, %v1928_v35 }
 0x342   : > { %v6038_v38 = vmax.f32 %v1936_v36, 0.0 }
 0x343   : > { %v6040_v49 = vmax.f32 %v1937_v37, 0.0 }
 0x344   : > { %1952 = vrot.lane.b32.xlu1 %v6038_v38, %s5463_s22 }
 0x345   : > { %1954 = vrot.lane.b32.xlu0 %v6040_v49, %s5463_s22 }
 0x348   : > { %1958 = vrot.lane.b32.xlu1 %v6038_v38, %s5465_s23 }
 0x349   : > { %1960 = vrot.lane.b32.xlu0 %v6040_v49, %s5465_s23 }
 0x34c   : > { %1940 = vrot.lane.b32.xlu1 %v6038_v38, %s5466_s24 }
 0x34d   : > { %1942 = vrot.lane.b32.xlu0 %v6040_v49, %s5466_s24 }
 0x350   : > { %1946 = vrot.lane.b32.xlu1 %v6038_v38, %s5467_s25 }
 0x351   : > { %1948 = vrot.lane.b32.xlu0 %v6040_v49, %s5467_s25 }
 0x354   : > { %1964 = vrot.lane.b32.xlu1 %v6038_v38, %s5468_s26 }
 0x355   : > { %1966 = vrot.lane.b32.xlu0 %v6040_v49, %s5468_s26 }
 0x358   : > { %1970 = vrot.lane.b32.xlu1 %v6038_v38, %s5469_s27 }
 0x359   : > { %1972 = vrot.lane.b32.xlu0 %v6040_v49, %s5469_s27 }
 0x35c   : > { %1976 = vrot.lane.b32.xlu1 %v6038_v38, %s5462_s17 }
 0x35d   : > { %1978 = vrot.lane.b32.xlu0 %v6040_v49, %s5462_s17 }
 0x360   : > { %1982 = vrot.lane.b32.xlu1 %v6038_v38, %s5470_s28 }
 0x361   : > { %1984 = vrot.lane.b32.xlu0 %v6040_v49, %s5470_s28 }
 0x364   : > { %2724 = vperm.xlu1 %5453, %v5272_v3  }
 0x365   : > { %2733 = vperm.xlu0 %5452, %v5273_v52  }
 0x3b6   : > { %v1953_v53 = vpop.permute.xlu1 %1952 }
 0x3b7   : > { %v1955_v54 = vpop.permute.xlu0 %1954 }
 0x3b8   : > { %v6082_v61 = vsel %vm236_vm2, %v1953_v53, %v1955_v54  ;;  %v6086_v0 = vsel %vm236_vm2, %v1955_v54, %v1953_v53 }
 0x3ba   : > { %v1959_v55 = vpop.permute.xlu1 %1958 }
 0x3bb   : > { %v1961_v56 = vpop.permute.xlu0 %1960 }
 0x3bc   : > { %v6090_v31 = vsel %vm243_vm3, %v1959_v55, %v1961_v56  ;;  %v6094_v8 = vsel %vm243_vm3, %v1961_v56, %v1959_v55  ;;  %v5258_v55 = vld [vmem:[%s6863_s1 + $0xa0] sm:$0xff] }
 0x3bd   : > { %v1994_v9 = vsel %vm5585_vm4, %v6086_v0, %v6090_v31  ;;  %v1995_v10 = vsel %vm5589_vm5, %v6082_v61, %v6094_v8 }
 0x3be   : > { %v1996_v11 = vmul.f32 %v1994_v9, %v5583_v24  ;;  %v1941_v28 = vpop.permute.xlu1 %1940  ;;  %v1997_v29 = vmul.f32 %v1995_v10, %v5580_v23 }
 0x3bf   : > { %v1943_v44 = vpop.permute.xlu0 %1942 }
 0x3c0   : > { %2003 = vmatprep.subr.mxu0 %v1997_v29  ;;  %v6113_v13 = vsel %vm222_vm7, %v1941_v28, %v1943_v44  ;;  %v6117_v19 = vsel %vm222_vm7, %v1943_v44, %v1941_v28 }
 0x3c1   : > { %2004 = vmatpush1.msra.mxu0 %v1996_v11 }
 0x3c2   : > { %v1947_v46 = vpop.permute.xlu1 %1946  ;;  %5256 = vmatmul.mubr.msk.f32.vlgmr.msra.gmra.mrb[2].mxu0 %vm309_vm6, %v5255_v14 }
 0x3c3   : > { %v1949_v47 = vpop.permute.xlu0 %1948  ;;  %2141 = vmatprep.mubr.f32.mxu0 %v5464_v5 }
 0x3c4   : > { %v6121_v45 = vsel %vm229_vm8, %v1947_v46, %v1949_v47  ;;  %v6125_v40 = vsel %vm229_vm8, %v1949_v47, %v1947_v46 }
 0x3c5   : > { %v1988_v4 = vsel %vm5585_vm4, %v6117_v19, %v6121_v45  ;;  %v1989_v12 = vsel %vm5589_vm5, %v6113_v13, %v6125_v40 }
 0x3c6   : > { %v1990_v20 = vmul.f32 %v1988_v4, %v5629_v41  ;;  %v1965_v43 = vpop.permute.xlu1 %1964  ;;  %v1991_v48 = vmul.f32 %v1989_v12, %v5632_v42  ;;  %v5260_v12 = vld [vmem:[%s6863_s1 + $0xa8] sm:$0xff] }
 0x3c7   : > { %v1967_v2 = vpop.permute.xlu0 %1966 }
 0x3c8   : > { %2077 = vmatprep.subr.mxu0 %v1991_v48  ;;  %v1968_v22 = vsel %vm250_vm9, %v1965_v43, %v1967_v2  ;;  %v1969_v33 = vsel %vm250_vm9, %v1967_v2, %v1965_v43  ;;  %v2312_v43 = vmul.f32 %v6038_v38, %v5719_v21 }
 0x3c9   : > { %2078 = vmatpush1.msra.mxu0 %v1990_v20  ;;  %v2313_v20 = vmul.f32 %v6040_v49, %v5712_v18  ;;  %v5262_v49 = vld [vmem:[%s6863_s1 + $0xb0] sm:$0xff] }
 0x3ca   : > { %v1971_v6 = vpop.permute.xlu1 %1970  ;;  %5257 = vmatmul.mubr.msk.f32.vlgmr.msra.gmra.mrb[2].mxu0 %vm309_vm6, %v5254_v60 }
 0x3cb   : > { %v1973_v7 = vpop.permute.xlu0 %1972  ;;  %2221 = vmatprep.mubr.f32.mxu0 %v5464_v5 }
 0x3cc   : > { %v1974_v34 = vsel %vm257_vm10, %v1971_v6, %v1973_v7  ;;  %v1975_v35 = vsel %vm257_vm10, %v1973_v7, %v1971_v6 }
 0x3cd   : > { %v2148_v36 = vsel %vm5585_vm4, %v1975_v35, %v1968_v22  ;;  %v2149_v37 = vsel %vm5589_vm5, %v1974_v34, %v1969_v33  ;;  %v2475_v60 = vsel %vm5589_vm5, %v1969_v33, %v1974_v34  ;;  %v2474_v7 = vsel %vm5585_vm4, %v1968_v22, %v1975_v35  ;;  %v5264_v34 = vld [vmem:[%s6863_s1 + $0xb8] sm:$0xff] }
 0x3ce   : > { %v2150_v3 = vmul.f32 %v2148_v36, %v5671_v57  ;;  %v1977_v52 = vpop.permute.xlu1 %1976  ;;  %v2151_v53 = vmul.f32 %v2149_v37, %v5674_v58  ;;  %v2477_v6 = vmul.f32 %v2475_v60, %v5759_v51  ;;  %v2557_v33 = vsel %vm5589_vm5, %v6094_v8, %v6082_v61  ;;  %v5266_v8 = vld [vmem:[%s6863_s1 + $0xc0] sm:$0xff] }
 0x3cf   : > { %v1979_v54 = vpop.permute.xlu0 %1978  ;;  %v2476_v36 = vmul.f32 %v2474_v7, %v5774_v59  ;;  %v2559_v37 = vmul.f32 %v2557_v33, %v5780_v62  ;;  %v2556_v22 = vsel %vm5585_vm4, %v6090_v31, %v6086_v0  ;;  %v2639_v61 = vsel %vm5589_vm5, %v6125_v40, %v6113_v13  ;;  %v5268_v31 = vld [vmem:[%s6863_s1 + $0xc8] sm:$0xff]  ;;  %v5270_v40 = vld [vmem:[%s6863_s1 + $0xd0] sm:$0xff]  ;;  %v5275_v7 = vld [vmem:[%s6863_s1 + $0xe0] sm:$0xff] }
 0x3d0   : > { %2157 = vmatprep.subr.mxu0 %v2151_v53  ;;  %v1980_v10 = vsel %vm205_vm1, %v1977_v52, %v1979_v54  ;;  %v1981_v11 = vsel %vm205_vm1, %v1979_v54, %v1977_v52  ;;  %v2558_v35 = vmul.f32 %v2556_v22, %v5797_v63  ;;  %v2638_v0 = vsel %vm5585_vm4, %v6121_v45, %v6117_v19 }
 0x3d1   : > { %2158 = vmatpush1.msra.mxu0 %v2150_v3  ;;  %v2641_v3 = vmul.f32 %v2639_v61, %v5804_v32  ;;  %v2640_v13 = vmul.f32 %v2638_v0, %v5818_v15 }
 0x3d2   : > { %v1983_v56 = vpop.permute.xlu1 %1982  ;;  %5259 = vmatmul.mubr.msk.f32.vlgmr.msra.gmra.mrb[2].mxu0 %vm309_vm6, %v5258_v55 }
 0x3d3   : > { %v1985_v9 = vpop.permute.xlu0 %1984  ;;  %2303 = vmatprep.mubr.f32.mxu0 %v5464_v5 }
 0x3d4   : > { %v1986_v28 = vsel %vm270_vm11, %v1983_v56, %v1985_v9  ;;  %v1987_v29 = vsel %vm270_vm11, %v1985_v9, %v1983_v56 }
 0x3d5   : > { %v2230_v44 = vsel %vm5585_vm4, %v1981_v11, %v1986_v28  ;;  %v2231_v14 = vsel %vm5589_vm5, %v1980_v10, %v1987_v29  ;;  %v2393_v4 = vsel %vm5589_vm5, %v1987_v29, %v1980_v10  ;;  %v2392_v2 = vsel %vm5585_vm4, %v1986_v28, %v1981_v11  ;;  %v5292_v28 = vld [vmem:[%s6864_s2 + $0x30] sm:$0xff]  ;;  %v5293_v29 = vld [vmem:[%s6864_s2 + $0x38] sm:$0xff] }
 0x3d6   : > { %v2232_v46 = vmul.f32 %v2230_v44, %v5706_v16  ;;  %v2233_v47 = vmul.f32 %v2231_v14, %v5709_v17  ;;  %v2395_v48 = vmul.f32 %v2393_v4, %v5738_v39  ;;  %v2394_v38 = vmul.f32 %v2392_v2, %v5754_v50 }
 0x3d8   : > { %2239 = vmatprep.subr.mxu0 %v2233_v47 }
 0x3d9   : > { %2240 = vmatpush1.msra.mxu0 %v2232_v46 }
 0x3da   : > { %5261 = vmatmul.mubr.msk.f32.vlgmr.msra.gmra.mrb[2].mxu0 %vm309_vm6, %v5260_v12  ;;  %2319 = vmatprep.subr.mxu0 %v2313_v20 }
 0x3db   : > { %2320 = vmatpush1.msra.mxu0 %v2312_v43  ;;  %2383 = vmatprep.mubr.f32.mxu0 %v5464_v5 }
 0x3dc   : > { %2401 = vmatprep.subr.mxu0 %v2395_v48 }
 0x3e2   : > { %5263 = vmatmul.mubr.msk.f32.vlgmr.msra.gmra.mrb[2].mxu0 %vm309_vm6, %v5262_v49 }
 0x3e3   : > { %2402 = vmatpush1.msra.mxu0 %v2394_v38  ;;  %2465 = vmatprep.mubr.f32.mxu0 %v5464_v5  ;;  %v2725_v19 = vpop.permute.xlu1 %2724 }
 0x3e4   : > { %2483 = vmatprep.subr.mxu0 %v2477_v6  ;;  %v2734_v54 = vpop.permute.xlu0 %2733 }
 0x3ea   : > { %5265 = vmatmul.mubr.msk.f32.vlgmr.msra.gmra.mrb[2].mxu0 %vm309_vm6, %v5264_v34 }
 0x3eb   : > { %2484 = vmatpush1.msra.mxu0 %v2476_v36  ;;  %2547 = vmatprep.mubr.f32.mxu0 %v5464_v5 }
 0x3ec   : > { %2565 = vmatprep.subr.mxu0 %v2559_v37 }
 0x3f2   : > { %5267 = vmatmul.mubr.msk.f32.vlgmr.msra.gmra.mrb[2].mxu0 %vm309_vm6, %v5266_v8 }
 0x3f3   : > { %2566 = vmatpush1.msra.mxu0 %v2558_v35  ;;  %2629 = vmatprep.mubr.f32.mxu0 %v5464_v5 }
 0x3f4   : > { %2647 = vmatprep.subr.mxu0 %v2641_v3 }
 0x3fa   : > { %5269 = vmatmul.mubr.msk.f32.vlgmr.msra.gmra.mrb[2].mxu0 %vm309_vm6, %v5268_v31 }
 0x3fb   : > { %2648 = vmatpush1.msra.mxu0 %v2640_v13  ;;  %2711 = vmatprep.mubr.f32.mxu0 %v5464_v5 }
 0x402   : > { %5271 = vmatmul.mubr.msk.f32.vlgmr.msra.gmra.mrb[2].mxu0 %vm309_vm6, %v5270_v40  ;;  %v5274_v40 = vld [vmem:[%s6863_s1 + $0xd8] sm:$0xff] }
 0x403   : > { %3667 = vmatprep.mubr.f32.mxu0 %v5464_v5 }
 0x4d5   : > { %v2713_v45 = vpop.f32.mrb[2].mxu0 }
 0x4d6   : > { %v2727_v52 = vmul.f32 %v2725_v19, %v2713_v45  ;;  %v2715_v53 = vpop.f32.mrb[3].mxu0 }
 0x4d7   : > { %v2728_v55 = vmul.f32 %v2725_v19, %v2715_v53 }
 0x4d8   : > { %v2736_v56 = vadd.f32 %v2734_v54, %v2727_v52 }
 0x4d9   : > { %v2737_v9 = vadd.f32 %v2734_v54, %v2728_v55 }
 0x4da   : > { %v6242_v10 = vadd.f32 %v2736_v56, %v5835_v27 }
 0x4db   : > { %v6245_v11 = vadd.f32 %v2737_v9, %v5837_v30 }
 0x4dc   : > { %2752 = vrot.lane.b32.xlu1 %v6242_v10, %s5463_s22 }
 0x4dd   : > { %2754 = vrot.lane.b32.xlu0 %v6245_v11, %s5463_s22 }
 0x4e0   : > { %2758 = vrot.lane.b32.xlu1 %v6242_v10, %s5465_s23 }
 0x4e1   : > { %2760 = vrot.lane.b32.xlu0 %v6245_v11, %s5465_s23 }
 0x4e4   : > { %2740 = vrot.lane.b32.xlu1 %v6242_v10, %s5466_s24 }
 0x4e5   : > { %2742 = vrot.lane.b32.xlu0 %v6245_v11, %s5466_s24 }
 0x4e8   : > { %2746 = vrot.lane.b32.xlu1 %v6242_v10, %s5467_s25 }
 0x4e9   : > { %2748 = vrot.lane.b32.xlu0 %v6245_v11, %s5467_s25 }
 0x4ec   : > { %2764 = vrot.lane.b32.xlu1 %v6242_v10, %s5468_s26 }
 0x4ed   : > { %2766 = vrot.lane.b32.xlu0 %v6245_v11, %s5468_s26 }
 0x4f0   : > { %2770 = vrot.lane.b32.xlu1 %v6242_v10, %s5469_s27 }
 0x4f1   : > { %2772 = vrot.lane.b32.xlu0 %v6245_v11, %s5469_s27 }
 0x4f4   : > { %2776 = vrot.lane.b32.xlu1 %v6242_v10, %s5462_s17 }
 0x4f5   : > { %2778 = vrot.lane.b32.xlu0 %v6245_v11, %s5462_s17 }
 0x4f8   : > { %2782 = vrot.lane.b32.xlu1 %v6242_v10, %s5470_s28 }
 0x4f9   : > { %2784 = vrot.lane.b32.xlu0 %v6245_v11, %s5470_s28 }
 0x4fc   : > { %3524 = vperm.xlu1 %5453, %v5292_v28  }
 0x4fd   : > { %3533 = vperm.xlu0 %5452, %v5293_v29  }
 0x54e   : > { %v2753_v44 = vpop.permute.xlu1 %2752 }
 0x54f   : > { %v2755_v14 = vpop.permute.xlu0 %2754 }
 0x550   : > { %v6287_v4 = vsel %vm236_vm2, %v2753_v44, %v2755_v14  ;;  %v6291_v12 = vsel %vm236_vm2, %v2755_v14, %v2753_v44 }
 0x552   : > { %v2759_v46 = vpop.permute.xlu1 %2758 }
 0x553   : > { %v2761_v47 = vpop.permute.xlu0 %2760 }
 0x554   : > { %v6295_v20 = vsel %vm243_vm3, %v2759_v46, %v2761_v47  ;;  %v6299_v43 = vsel %vm243_vm3, %v2761_v47, %v2759_v46  ;;  %v5278_v46 = vld [vmem:[%s6863_s1 + $0xe8] sm:$0xff] }
 0x555   : > { %v2794_v48 = vsel %vm5585_vm4, %v6291_v12, %v6295_v20  ;;  %v2795_v2 = vsel %vm5589_vm5, %v6287_v4, %v6299_v43 }
 0x556   : > { %v2796_v60 = vmul.f32 %v2794_v48, %v5583_v24  ;;  %v2741_v49 = vpop.permute.xlu1 %2740  ;;  %v2797_v38 = vmul.f32 %v2795_v2, %v5580_v23 }
 0x557   : > { %v2743_v6 = vpop.permute.xlu0 %2742 }
 0x558   : > { %2803 = vmatprep.subr.mxu1 %v2797_v38  ;;  %v6318_v36 = vsel %vm222_vm7, %v2741_v49, %v2743_v6  ;;  %v6322_v37 = vsel %vm222_vm7, %v2743_v6, %v2741_v49 }
 0x559   : > { %2804 = vmatpush1.msra.mxu1 %v2796_v60 }
 0x55a   : > { %v2747_v33 = vpop.permute.xlu1 %2746  ;;  %5276 = vmatmul.mubr.msk.f32.vlgmr.msra.gmra.mrb[2].mxu1 %vm309_vm6, %v5275_v7 }
 0x55b   : > { %v2749_v34 = vpop.permute.xlu0 %2748  ;;  %2941 = vmatprep.mubr.f32.mxu1 %v5464_v5 }
 0x55c   : > { %v6326_v22 = vsel %vm229_vm8, %v2747_v33, %v2749_v34  ;;  %v6330_v61 = vsel %vm229_vm8, %v2749_v34, %v2747_v33 }
 0x55d   : > { %v2788_v8 = vsel %vm5585_vm4, %v6322_v37, %v6326_v22  ;;  %v2789_v35 = vsel %vm5589_vm5, %v6318_v36, %v6330_v61 }
 0x55e   : > { %v2790_v3 = vmul.f32 %v2788_v8, %v5629_v41  ;;  %v2765_v0 = vpop.permute.xlu1 %2764  ;;  %v2791_v31 = vmul.f32 %v2789_v35, %v5632_v42  ;;  %v5280_v35 = vld [vmem:[%s6863_s1 + $0xf0] sm:$0xff] }
 0x55f   : > { %v2767_v13 = vpop.permute.xlu0 %2766 }
 0x560   : > { %2877 = vmatprep.subr.mxu1 %v2791_v31  ;;  %v2768_v52 = vsel %vm250_vm9, %v2765_v0, %v2767_v13  ;;  %v2769_v53 = vsel %vm250_vm9, %v2767_v13, %v2765_v0  ;;  %v3112_v0 = vmul.f32 %v6242_v10, %v5719_v21 }
 0x561   : > { %2878 = vmatpush1.msra.mxu1 %v2790_v3  ;;  %v3113_v3 = vmul.f32 %v6245_v11, %v5712_v18 }
 0x562   : > { %v2771_v19 = vpop.permute.xlu1 %2770  ;;  %5277 = vmatmul.mubr.msk.f32.vlgmr.msra.gmra.mrb[2].mxu1 %vm309_vm6, %v5274_v40 }
 0x563   : > { %v2773_v45 = vpop.permute.xlu0 %2772  ;;  %3021 = vmatprep.mubr.f32.mxu1 %v5464_v5 }
 0x564   : > { %v2774_v54 = vsel %vm257_vm10, %v2771_v19, %v2773_v45  ;;  %v2775_v55 = vsel %vm257_vm10, %v2773_v45, %v2771_v19  ;;  %v5282_v19 = vld [vmem:[%s6863_s1 + $0xf8] sm:$0xff] }
 0x565   : > { %v2948_v56 = vsel %vm5585_vm4, %v2775_v55, %v2768_v52  ;;  %v2949_v9 = vsel %vm5589_vm5, %v2774_v54, %v2769_v53  ;;  %v3275_v40 = vsel %vm5589_vm5, %v2769_v53, %v2774_v54  ;;  %v3357_v53 = vsel %vm5589_vm5, %v6299_v43, %v6287_v4  ;;  %v5284_v54 = vld [vmem:[%s6863_s1 + $0x100] sm:$0xff]  ;;  %v5286_v43 = vld [vmem:[%s6863_s1 + $0x108] sm:$0xff] }
 0x566   : > { %v2950_v28 = vmul.f32 %v2948_v56, %v5671_v57  ;;  %v2777_v29 = vpop.permute.xlu1 %2776  ;;  %v2951_v44 = vmul.f32 %v2949_v9, %v5674_v58  ;;  %v3277_v56 = vmul.f32 %v3275_v40, %v5759_v51  ;;  %v3274_v9 = vsel %vm5585_vm4, %v2768_v52, %v2775_v55 }
 0x567   : > { %v2779_v14 = vpop.permute.xlu0 %2778  ;;  %v3356_v52 = vsel %vm5585_vm4, %v6295_v20, %v6291_v12  ;;  %v3439_v4 = vsel %vm5589_vm5, %v6330_v61, %v6318_v36  ;;  %v3438_v12 = vsel %vm5585_vm4, %v6326_v22, %v6322_v37  ;;  %v5288_v20 = vld [vmem:[%s6863_s1 + $0x110] sm:$0xff]  ;;  %v5290_v61 = vld [vmem:[%s6863_s1 + $0x118] sm:$0xff] }
 0x568   : > { %2957 = vmatprep.subr.mxu1 %v2951_v44  ;;  %v2780_v2 = vsel %vm205_vm1, %v2777_v29, %v2779_v14  ;;  %v2781_v60 = vsel %vm205_vm1, %v2779_v14, %v2777_v29  ;;  %v3359_v29 = vmul.f32 %v3357_v53, %v5780_v62  ;;  %v3358_v55 = vmul.f32 %v3356_v52, %v5797_v63 }
 0x569   : > { %2958 = vmatpush1.msra.mxu1 %v2950_v28  ;;  %v3276_v28 = vmul.f32 %v3274_v9, %v5774_v59  ;;  %v3441_v44 = vmul.f32 %v3439_v4, %v5804_v32  ;;  %v3440_v36 = vmul.f32 %v3438_v12, %v5818_v15 }
 0x56a   : > { %v2783_v47 = vpop.permute.xlu1 %2782  ;;  %5279 = vmatmul.mubr.msk.f32.vlgmr.msra.gmra.mrb[2].mxu1 %vm309_vm6, %v5278_v46 }
 0x56b   : > { %v2785_v48 = vpop.permute.xlu0 %2784  ;;  %3103 = vmatprep.mubr.f32.mxu1 %v5464_v5 }
 0x56c   : > { %v2786_v49 = vsel %vm270_vm11, %v2783_v47, %v2785_v48  ;;  %v2787_v38 = vsel %vm270_vm11, %v2785_v48, %v2783_v47 }
 0x56d   : > { %v3030_v6 = vsel %vm5585_vm4, %v2781_v60, %v2786_v49  ;;  %v3031_v7 = vsel %vm5589_vm5, %v2780_v2, %v2787_v38  ;;  %v3193_v8 = vsel %vm5589_vm5, %v2787_v38, %v2780_v2  ;;  %v3192_v13 = vsel %vm5585_vm4, %v2786_v49, %v2781_v60 }
 0x56e   : > { %v3032_v33 = vmul.f32 %v3030_v6, %v5706_v16  ;;  %v3033_v34 = vmul.f32 %v3031_v7, %v5709_v17  ;;  %v3195_v31 = vmul.f32 %v3193_v8, %v5738_v39  ;;  %v3194_v45 = vmul.f32 %v3192_v13, %v5754_v50  ;;  %v5312_v6 = vld [vmem:[%s6864_s2 + $0x40] sm:$0xff]  ;;  %v5313_v7 = vld [vmem:[%s6864_s2 + $0x48] sm:$0xff] }
 0x570   : > { %3039 = vmatprep.subr.mxu1 %v3033_v34 }
 0x571   : > { %3040 = vmatpush1.msra.mxu1 %v3032_v33 }
 0x572   : > { %5281 = vmatmul.mubr.msk.f32.vlgmr.msra.gmra.mrb[2].mxu1 %vm309_vm6, %v5280_v35  ;;  %3119 = vmatprep.subr.mxu1 %v3113_v3 }
 0x573   : > { %3120 = vmatpush1.msra.mxu1 %v3112_v0  ;;  %3183 = vmatprep.mubr.f32.mxu1 %v5464_v5 }
 0x574   : > { %3201 = vmatprep.subr.mxu1 %v3195_v31 }
 0x57a   : > { %5283 = vmatmul.mubr.msk.f32.vlgmr.msra.gmra.mrb[2].mxu1 %vm309_vm6, %v5282_v19 }
 0x57b   : > { %3202 = vmatpush1.msra.mxu1 %v3194_v45  ;;  %3265 = vmatprep.mubr.f32.mxu1 %v5464_v5  ;;  %v3525_v37 = vpop.permute.xlu1 %3524 }
 0x57c   : > { %3283 = vmatprep.subr.mxu1 %v3277_v56  ;;  %v3534_v47 = vpop.permute.xlu0 %3533 }
 0x582   : > { %5285 = vmatmul.mubr.msk.f32.vlgmr.msra.gmra.mrb[2].mxu1 %vm309_vm6, %v5284_v54  ;;  %v5295_v54 = vld [vmem:[%s6863_s1 + $0x128] sm:$0xff] }
 0x583   : > { %3284 = vmatpush1.msra.mxu1 %v3276_v28  ;;  %3347 = vmatprep.mubr.f32.mxu1 %v5464_v5 }
 0x584   : > { %3365 = vmatprep.subr.mxu1 %v3359_v29 }
 0x58a   : > { %5287 = vmatmul.mubr.msk.f32.vlgmr.msra.gmra.mrb[2].mxu1 %vm309_vm6, %v5286_v43 }
 0x58b   : > { %3366 = vmatpush1.msra.mxu1 %v3358_v55  ;;  %3429 = vmatprep.mubr.f32.mxu1 %v5464_v5 }
 0x58c   : > { %3447 = vmatprep.subr.mxu1 %v3441_v44 }
 0x592   : > { %5289 = vmatmul.mubr.msk.f32.vlgmr.msra.gmra.mrb[2].mxu1 %vm309_vm6, %v5288_v20 }
 0x593   : > { %3448 = vmatpush1.msra.mxu1 %v3440_v36  ;;  %3511 = vmatprep.mubr.f32.mxu1 %v5464_v5 }
 0x59a   : > { %5291 = vmatmul.mubr.msk.f32.vlgmr.msra.gmra.mrb[2].mxu1 %vm309_vm6, %v5290_v61 }
 0x59b   : > { %4467 = vmatprep.mubr.f32.mxu1 %v5464_v5 }
 0x66d   : > { %v3513_v22 = vpop.f32.mrb[2].mxu1 }
 0x66e   : > { %v3527_v14 = vmul.f32 %v3525_v37, %v3513_v22  ;;  %v3515_v46 = vpop.f32.mrb[3].mxu1  ;;  %v5294_v22 = vld [vmem:[%s6863_s1 + $0x120] sm:$0xff] }
 0x66f   : > { %v3528_v48 = vmul.f32 %v3525_v37, %v3515_v46 }
 0x670   : > { %v3536_v2 = vadd.f32 %v3534_v47, %v3527_v14 }
 0x671   : > { %v3537_v60 = vadd.f32 %v3534_v47, %v3528_v48 }
 0x672   : > { %v6446_v49 = vmax.f32 %v3536_v2, 0.0 }
 0x673   : > { %v6448_v38 = vmax.f32 %v3537_v60, 0.0 }
 0x674   : > { %3552 = vrot.lane.b32.xlu1 %v6446_v49, %s5463_s22 }
 0x675   : > { %3554 = vrot.lane.b32.xlu0 %v6448_v38, %s5463_s22 }
 0x678   : > { %3558 = vrot.lane.b32.xlu1 %v6446_v49, %s5465_s23 }
 0x679   : > { %3560 = vrot.lane.b32.xlu0 %v6448_v38, %s5465_s23 }
 0x67c   : > { %3540 = vrot.lane.b32.xlu1 %v6446_v49, %s5466_s24 }
 0x67d   : > { %3542 = vrot.lane.b32.xlu0 %v6448_v38, %s5466_s24 }
 0x680   : > { %3546 = vrot.lane.b32.xlu1 %v6446_v49, %s5467_s25 }
 0x681   : > { %3548 = vrot.lane.b32.xlu0 %v6448_v38, %s5467_s25 }
 0x684   : > { %3564 = vrot.lane.b32.xlu1 %v6446_v49, %s5468_s26 }
 0x685   : > { %3566 = vrot.lane.b32.xlu0 %v6448_v38, %s5468_s26 }
 0x688   : > { %3570 = vrot.lane.b32.xlu1 %v6446_v49, %s5469_s27 }
 0x689   : > { %3572 = vrot.lane.b32.xlu0 %v6448_v38, %s5469_s27 }
 0x68c   : > { %3576 = vrot.lane.b32.xlu1 %v6446_v49, %s5462_s17 }
 0x68d   : > { %3578 = vrot.lane.b32.xlu0 %v6448_v38, %s5462_s17 }
 0x690   : > { %3582 = vrot.lane.b32.xlu1 %v6446_v49, %s5470_s28 }
 0x691   : > { %3584 = vrot.lane.b32.xlu0 %v6448_v38, %s5470_s28 }
 0x694   : > { %4324 = vperm.xlu1 %5453, %v5312_v6  }
 0x695   : > { %4333 = vperm.xlu0 %5452, %v5313_v7  }
 0x6e6   : > { %v3553_v33 = vpop.permute.xlu1 %3552 }
 0x6e7   : > { %v3555_v34 = vpop.permute.xlu0 %3554 }
 0x6e8   : > { %v6490_v3 = vsel %vm236_vm2, %v3553_v33, %v3555_v34  ;;  %v6494_v0 = vsel %vm236_vm2, %v3555_v34, %v3553_v33 }
 0x6ea   : > { %v3559_v8 = vpop.permute.xlu1 %3558 }
 0x6eb   : > { %v3561_v35 = vpop.permute.xlu0 %3560 }
 0x6ec   : > { %v6498_v31 = vsel %vm243_vm3, %v3559_v8, %v3561_v35  ;;  %v6502_v13 = vsel %vm243_vm3, %v3561_v35, %v3559_v8 }
 0x6ed   : > { %v3594_v40 = vsel %vm5585_vm4, %v6494_v0, %v6498_v31  ;;  %v3595_v19 = vsel %vm5589_vm5, %v6490_v3, %v6502_v13 }
 0x6ee   : > { %v3596_v45 = vmul.f32 %v3594_v40, %v5583_v24  ;;  %v3541_v56 = vpop.permute.xlu1 %3540  ;;  %v3597_v9 = vmul.f32 %v3595_v19, %v5580_v23  ;;  %v5298_v40 = vld [vmem:[%s6863_s1 + $0x130] sm:$0xff] }
 0x6ef   : > { %v3543_v53 = vpop.permute.xlu0 %3542 }
 0x6f0   : > { %3603 = vmatprep.subr.mxu0 %v3597_v9  ;;  %v6521_v52 = vsel %vm222_vm7, %v3541_v56, %v3543_v53  ;;  %v6525_v4 = vsel %vm222_vm7, %v3543_v53, %v3541_v56 }
 0x6f1   : > { %3604 = vmatpush1.msra.mxu0 %v3596_v45 }
 0x6f2   : > { %v3547_v28 = vpop.permute.xlu1 %3546  ;;  %5296 = vmatmul.mubr.msk.f32.vlgmr.msra.gmra.mrb[4].mxu0 %vm309_vm6, %v5295_v54 }
 0x6f3   : > { %v3549_v29 = vpop.permute.xlu0 %3548  ;;  %3741 = vmatprep.mubr.f32.mxu0 %v5464_v5 }
 0x6f4   : > { %v6529_v43 = vsel %vm229_vm8, %v3547_v28, %v3549_v29  ;;  %v6533_v55 = vsel %vm229_vm8, %v3549_v29, %v3547_v28 }
 0x6f5   : > { %v3588_v44 = vsel %vm5585_vm4, %v6525_v4, %v6529_v43  ;;  %v3589_v12 = vsel %vm5589_vm5, %v6521_v52, %v6533_v55 }
 0x6f6   : > { %v3590_v20 = vmul.f32 %v3588_v44, %v5629_v41  ;;  %v3565_v36 = vpop.permute.xlu1 %3564  ;;  %v3591_v61 = vmul.f32 %v3589_v12, %v5632_v42 }
 0x6f7   : > { %v3567_v37 = vpop.permute.xlu0 %3566 }
 0x6f8   : > { %3677 = vmatprep.subr.mxu0 %v3591_v61  ;;  %v3568_v47 = vsel %vm250_vm9, %v3565_v36, %v3567_v37  ;;  %v3569_v48 = vsel %vm250_vm9, %v3567_v37, %v3565_v36  ;;  %v5300_v36 = vld [vmem:[%s6863_s1 + $0x138] sm:$0xff]  ;;  %v3913_v61 = vmul.f32 %v6448_v38, %v5712_v18  ;;  %v3912_v37 = vmul.f32 %v6446_v49, %v5719_v21  ;;  %v5302_v38 = vld [vmem:[%s6863_s1 + $0x140] sm:$0xff] }
 0x6f9   : > { %3678 = vmatpush1.msra.mxu0 %v3590_v20 }
 0x6fa   : > { %v3571_v14 = vpop.permute.xlu1 %3570  ;;  %5297 = vmatmul.mubr.msk.f32.vlgmr.msra.gmra.mrb[4].mxu0 %vm309_vm6, %v5294_v22 }
 0x6fb   : > { %v3573_v46 = vpop.permute.xlu0 %3572  ;;  %3821 = vmatprep.mubr.f32.mxu0 %v5464_v5 }
 0x6fc   : > { %v3574_v2 = vsel %vm257_vm10, %v3571_v14, %v3573_v46  ;;  %v3575_v60 = vsel %vm257_vm10, %v3573_v46, %v3571_v14 }
 0x6fd   : > { %v3748_v6 = vsel %vm5585_vm4, %v3575_v60, %v3568_v47  ;;  %v3749_v7 = vsel %vm5589_vm5, %v3574_v2, %v3569_v48  ;;  %v4075_v46 = vsel %vm5589_vm5, %v3569_v48, %v3574_v2  ;;  %v4157_v48 = vsel %vm5589_vm5, %v6502_v13, %v6490_v3  ;;  %v5304_v2 = vld [vmem:[%s6863_s1 + $0x148] sm:$0xff]  ;;  %v5306_v13 = vld [vmem:[%s6863_s1 + $0x150] sm:$0xff] }
 0x6fe   : > { %v3750_v33 = vmul.f32 %v3748_v6, %v5671_v57  ;;  %v3577_v34 = vpop.permute.xlu1 %3576  ;;  %v3751_v8 = vmul.f32 %v3749_v7, %v5674_v58  ;;  %v4077_v6 = vmul.f32 %v4075_v46, %v5759_v51  ;;  %v4074_v7 = vsel %vm5585_vm4, %v3568_v47, %v3575_v60 }
 0x6ff   : > { %v3579_v35 = vpop.permute.xlu0 %3578  ;;  %v4156_v47 = vsel %vm5585_vm4, %v6498_v31, %v6494_v0  ;;  %v4239_v3 = vsel %vm5589_vm5, %v6533_v55, %v6521_v52  ;;  %v4238_v0 = vsel %vm5585_vm4, %v6529_v43, %v6525_v4  ;;  %v5308_v31 = vld [vmem:[%s6863_s1 + $0x158] sm:$0xff]  ;;  %v5310_v55 = vld [vmem:[%s6863_s1 + $0x160] sm:$0xff] }
 0x700   : > { %3757 = vmatprep.subr.mxu0 %v3751_v8  ;;  %v3580_v56 = vsel %vm205_vm1, %v3577_v34, %v3579_v35  ;;  %v3581_v9 = vsel %vm205_vm1, %v3579_v35, %v3577_v34  ;;  %v4159_v34 = vmul.f32 %v4157_v48, %v5780_v62  ;;  %v4158_v60 = vmul.f32 %v4156_v47, %v5797_v63 }
 0x701   : > { %3758 = vmatpush1.msra.mxu0 %v3750_v33  ;;  %v4076_v33 = vmul.f32 %v4074_v7, %v5774_v59  ;;  %v4241_v8 = vmul.f32 %v4239_v3, %v5804_v32  ;;  %v4240_v52 = vmul.f32 %v4238_v0, %v5818_v15  ;;  %v5315_v7 = vld [vmem:[%s6863_s1 + $0x170] sm:$0xff] }
 0x702   : > { %v3583_v19 = vpop.permute.xlu1 %3582  ;;  %5299 = vmatmul.mubr.msk.f32.vlgmr.msra.gmra.mrb[4].mxu0 %vm309_vm6, %v5298_v40 }
 0x703   : > { %v3585_v45 = vpop.permute.xlu0 %3584  ;;  %3903 = vmatprep.mubr.f32.mxu0 %v5464_v5 }
 0x704   : > { %v3586_v53 = vsel %vm270_vm11, %v3583_v19, %v3585_v45  ;;  %v3587_v54 = vsel %vm270_vm11, %v3585_v45, %v3583_v19 }
 0x705   : > { %v3830_v28 = vsel %vm5585_vm4, %v3581_v9, %v3586_v53  ;;  %v3831_v29 = vsel %vm5589_vm5, %v3580_v56, %v3587_v54  ;;  %v3993_v20 = vsel %vm5589_vm5, %v3587_v54, %v3580_v56  ;;  %v3992_v14 = vsel %vm5585_vm4, %v3586_v53, %v3581_v9 }
 0x706   : > { %v3832_v44 = vmul.f32 %v3830_v28, %v5706_v16  ;;  %v3833_v12 = vmul.f32 %v3831_v29, %v5709_v17  ;;  %v3995_v22 = vmul.f32 %v3993_v20, %v5738_v39  ;;  %v3994_v49 = vmul.f32 %v3992_v14, %v5754_v50 }
 0x708   : > { %3839 = vmatprep.subr.mxu0 %v3833_v12 }
 0x709   : > { %3840 = vmatpush1.msra.mxu0 %v3832_v44 }
 0x70a   : > { %5301 = vmatmul.mubr.msk.f32.vlgmr.msra.gmra.mrb[4].mxu0 %vm309_vm6, %v5300_v36  ;;  %3919 = vmatprep.subr.mxu0 %v3913_v61 }
 0x70b   : > { %3920 = vmatpush1.msra.mxu0 %v3912_v37  ;;  %3983 = vmatprep.mubr.f32.mxu0 %v5464_v5 }
 0x70c   : > { %4001 = vmatprep.subr.mxu0 %v3995_v22 }
 0x712   : > { %5303 = vmatmul.mubr.msk.f32.vlgmr.msra.gmra.mrb[4].mxu0 %vm309_vm6, %v5302_v38 }
 0x713   : > { %4002 = vmatpush1.msra.mxu0 %v3994_v49  ;;  %4065 = vmatprep.mubr.f32.mxu0 %v5464_v5  ;;  %v4325_v35 = vpop.permute.xlu1 %4324 }
 0x714   : > { %4083 = vmatprep.subr.mxu0 %v4077_v6  ;;  %v4334_v19 = vpop.permute.xlu0 %4333 }
 0x71a   : > { %5305 = vmatmul.mubr.msk.f32.vlgmr.msra.gmra.mrb[4].mxu0 %vm309_vm6, %v5304_v2 }
 0x71b   : > { %4084 = vmatpush1.msra.mxu0 %v4076_v33  ;;  %4147 = vmatprep.mubr.f32.mxu0 %v5464_v5 }
 0x71c   : > { %4165 = vmatprep.subr.mxu0 %v4159_v34 }
 0x722   : > { %5307 = vmatmul.mubr.msk.f32.vlgmr.msra.gmra.mrb[4].mxu0 %vm309_vm6, %v5306_v13 }
 0x723   : > { %4166 = vmatpush1.msra.mxu0 %v4158_v60  ;;  %4229 = vmatprep.mubr.f32.mxu0 %v5464_v5 }
 0x724   : > { %4247 = vmatprep.subr.mxu0 %v4241_v8 }
 0x72a   : > { %5309 = vmatmul.mubr.msk.f32.vlgmr.msra.gmra.mrb[4].mxu0 %vm309_vm6, %v5308_v31  ;;  %v5314_v31 = vld [vmem:[%s6863_s1 + $0x168] sm:$0xff] }
 0x72b   : > { %4248 = vmatpush1.msra.mxu0 %v4240_v52  ;;  %4311 = vmatprep.mubr.f32.mxu0 %v5464_v5 }
 0x732   : > { %5311 = vmatmul.mubr.msk.f32.vlgmr.msra.gmra.mrb[4].mxu0 %vm309_vm6, %v5310_v55 }
 0x805   : > { %v4313_v40 = vpop.f32.mrb[4].mxu0 }
 0x806   : > { %v4327_v4 = vmul.f32 %v4325_v35, %v4313_v40  ;;  %v4315_v43 = vpop.f32.mrb[5].mxu0 }
 0x807   : > { %v4328_v45 = vmul.f32 %v4325_v35, %v4315_v43 }
 0x808   : > { %v4336_v56 = vadd.f32 %v4334_v19, %v4327_v4 }
 0x809   : > { %v4337_v9 = vadd.f32 %v4334_v19, %v4328_v45 }
 0x80a   : > { %v6649_v53 = vadd.f32 %v4336_v56, %v6242_v10  ;;  %v5332_v10 = vld [vmem:[%s6864_s2 + $0x50] sm:$0xff] }
 0x80b   : > { %v6652_v54 = vadd.f32 %v4337_v9, %v6245_v11  ;;  %v5333_v11 = vld [vmem:[%s6864_s2 + $0x58] sm:$0xff] }
 0x80c   : > { %4352 = vrot.lane.b32.xlu1 %v6649_v53, %s5463_s22 }
 0x80d   : > { %4354 = vrot.lane.b32.xlu0 %v6652_v54, %s5463_s22  ;;  %v4713_v1 = vmul.f32 %v6652_v54, %v5712_v18  ;;  %v5322_v18 = vld [vmem:[%s6863_s1 + $0x188] sm:$0xff] }
 0x810   : > { %4358 = vrot.lane.b32.xlu1 %v6649_v53, %s5465_s23 }
 0x811   : > { %4360 = vrot.lane.b32.xlu0 %v6652_v54, %s5465_s23  ;;  %s197_s23 = scalar_lea.vmem %s6866_s4, %s5336_s18 }
 0x814   : > { %4340 = vrot.lane.b32.xlu1 %v6649_v53, %s5466_s24 }
 0x815   : > { %4342 = vrot.lane.b32.xlu0 %v6652_v54, %s5466_s24 }
 0x818   : > { %4346 = vrot.lane.b32.xlu1 %v6649_v53, %s5467_s25 }
 0x819   : > { %4348 = vrot.lane.b32.xlu0 %v6652_v54, %s5467_s25 }
 0x81c   : > { %4364 = vrot.lane.b32.xlu1 %v6649_v53, %s5468_s26 }
 0x81d   : > { %4366 = vrot.lane.b32.xlu0 %v6652_v54, %s5468_s26 }
 0x820   : > { %4370 = vrot.lane.b32.xlu1 %v6649_v53, %s5469_s27 }
 0x821   : > { %4372 = vrot.lane.b32.xlu0 %v6652_v54, %s5469_s27 }
 0x824   : > { %4376 = vrot.lane.b32.xlu1 %v6649_v53, %s5462_s17 }
 0x825   : > { %4378 = vrot.lane.b32.xlu0 %v6652_v54, %s5462_s17 }
 0x828   : > { %4382 = vrot.lane.b32.xlu1 %v6649_v53, %s5470_s28 }
 0x829   : > { %4384 = vrot.lane.b32.xlu0 %v6652_v54, %s5470_s28 }
 0x82c   : > { %5124 = vperm.xlu1 %5453, %v5332_v10   ;;  %v5318_v10 = vld [vmem:[%s6863_s1 + $0x178] sm:$0xff] }
 0x82d   : > { %5133 = vperm.xlu0 %5452, %v5333_v11  }
 0x87e   : > { %v4353_v28 = vpop.permute.xlu1 %4352 }
 0x87f   : > { %v4355_v29 = vpop.permute.xlu0 %4354 }
 0x880   : > { %v6694_v20 = vsel %vm236_vm2, %v4353_v28, %v4355_v29  ;;  %v6698_v36 = vsel %vm236_vm2, %v4355_v29, %v4353_v28 }
 0x882   : > { %v4359_v44 = vpop.permute.xlu1 %4358 }
 0x883   : > { %v4361_v12 = vpop.permute.xlu0 %4360 }
 0x884   : > { %v6702_v61 = vsel %vm243_vm3, %v4359_v44, %v4361_v12  ;;  %v6706_v37 = vsel %vm243_vm3, %v4361_v12, %v4359_v44 }
 0x885   : > { %v4394_v22 = vsel %vm5585_vm4, %v6698_v36, %v6702_v61  ;;  %v4395_v14 = vsel %vm5589_vm5, %v6694_v20, %v6706_v37  ;;  %v4957_v54 = vsel %vm5589_vm5, %v6706_v37, %v6694_v20 }
 0x886   : > { %v4396_v46 = vmul.f32 %v4394_v22, %v5583_v24  ;;  %v4341_v38 = vpop.permute.xlu1 %4340  ;;  %v4397_v49 = vmul.f32 %v4395_v14, %v5580_v23 }
 0x887   : > { %v4343_v6 = vpop.permute.xlu0 %4342 }
 0x888   : > { %4403 = vmatprep.subr.mxu1 %v4397_v49  ;;  %v6725_v33 = vsel %vm222_vm7, %v4341_v38, %v4343_v6  ;;  %v6729_v23 = vsel %vm222_vm7, %v4343_v6, %v4341_v38  ;;  %v5320_v49 = vld [vmem:[%s6863_s1 + $0x180] sm:$0xff]  ;;  %v4712_v6 = vmul.f32 %v6649_v53, %v5719_v21 }
 0x889   : > { %4404 = vmatpush1.msra.mxu1 %v4396_v46 }
 0x88a   : > { %v4347_v48 = vpop.permute.xlu1 %4346  ;;  %5316 = vmatmul.mubr.msk.f32.vlgmr.msra.gmra.mrb[4].mxu1 %vm309_vm6, %v5315_v7 }
 0x88b   : > { %v4349_v2 = vpop.permute.xlu0 %4348  ;;  %4541 = vmatprep.mubr.f32.mxu1 %v5464_v5 }
 0x88c   : > { %v6733_v24 = vsel %vm229_vm8, %v4347_v48, %v4349_v2  ;;  %v6737_v34 = vsel %vm229_vm8, %v4349_v2, %v4347_v48  ;;  %v4956_v2 = vsel %vm5585_vm4, %v6702_v61, %v6698_v36  ;;  %v5328_v36 = vld [vmem:[%s6863_s1 + $0x1a0] sm:$0xff] }
 0x88d   : > { %v4388_v47 = vsel %vm5585_vm4, %v6729_v23, %v6733_v24  ;;  %v4389_v3 = vsel %vm5589_vm5, %v6725_v33, %v6737_v34  ;;  %v5039_v20 = vsel %vm5589_vm5, %v6737_v34, %v6725_v33  ;;  %v5038_v26 = vsel %vm5585_vm4, %v6733_v24, %v6729_v23 }
 0x88e   : > { %v4390_v13 = vmul.f32 %v4388_v47, %v5629_v41  ;;  %v4365_v60 = vpop.permute.xlu1 %4364  ;;  %v4391_v8 = vmul.f32 %v4389_v3, %v5632_v42  ;;  %v5041_v37 = vmul.f32 %v5039_v20, %v5804_v32  ;;  %v5330_v32 = vld [vmem:[%s6863_s1 + $0x1a8] sm:$0xff] }
 0x88f   : > { %v4367_v0 = vpop.permute.xlu0 %4366 }
 0x890   : > { %4477 = vmatprep.subr.mxu1 %v4391_v8  ;;  %v4368_v35 = vsel %vm250_vm9, %v4365_v60, %v4367_v0  ;;  %v4369_v41 = vsel %vm250_vm9, %v4367_v0, %v4365_v60 }
 0x891   : > { %4478 = vmatpush1.msra.mxu1 %v4390_v13 }
 0x892   : > { %v4371_v52 = vpop.permute.xlu1 %4370  ;;  %5317 = vmatmul.mubr.msk.f32.vlgmr.msra.gmra.mrb[4].mxu1 %vm309_vm6, %v5314_v31 }
 0x893   : > { %v4373_v55 = vpop.permute.xlu0 %4372  ;;  %4621 = vmatprep.mubr.f32.mxu1 %v5464_v5 }
 0x894   : > { %v4374_v42 = vsel %vm257_vm10, %v4371_v52, %v4373_v55  ;;  %v4375_v40 = vsel %vm257_vm10, %v4373_v55, %v4371_v52 }
 0x895   : > { %v4548_v4 = vsel %vm5585_vm4, %v4375_v40, %v4368_v35  ;;  %v4549_v43 = vsel %vm5589_vm5, %v4374_v42, %v4369_v41  ;;  %v4875_v7 = vsel %vm5589_vm5, %v4369_v41, %v4374_v42  ;;  %v4874_v53 = vsel %vm5585_vm4, %v4368_v35, %v4375_v40 }
 0x896   : > { %v4550_v19 = vmul.f32 %v4548_v4, %v5671_v57  ;;  %v4377_v45 = vpop.permute.xlu1 %4376  ;;  %v4551_v56 = vmul.f32 %v4549_v43, %v5674_v58  ;;  %v4876_v48 = vmul.f32 %v4874_v53, %v5774_v59  ;;  %v5326_v59 = vld [vmem:[%s6863_s1 + $0x198] sm:$0xff] }
 0x897   : > { %v4379_v9 = vpop.permute.xlu0 %4378 }
 0x898   : > { %4557 = vmatprep.subr.mxu1 %v4551_v56  ;;  %v4380_v29 = vsel %vm205_vm1, %v4377_v45, %v4379_v9  ;;  %v4381_v57 = vsel %vm205_vm1, %v4379_v9, %v4377_v45 }
 0x899   : > { %4558 = vmatpush1.msra.mxu1 %v4550_v19 }
 0x89a   : > { %v4383_v11 = vpop.permute.xlu1 %4382  ;;  %5319 = vmatmul.mubr.msk.f32.vlgmr.msra.gmra.mrb[4].mxu1 %vm309_vm6, %v5318_v10 }
 0x89b   : > { %v4385_v28 = vpop.permute.xlu0 %4384  ;;  %4703 = vmatprep.mubr.f32.mxu1 %v5464_v5 }
 0x89c   : > { %v4386_v58 = vsel %vm270_vm11, %v4383_v11, %v4385_v28  ;;  %v4387_v44 = vsel %vm270_vm11, %v4385_v28, %v4383_v11 }
 0x89d   : > { %v4630_v12 = vsel %vm5585_vm4, %v4381_v57, %v4386_v58  ;;  %v4631_v22 = vsel %vm5589_vm5, %v4380_v29, %v4387_v44  ;;  %v4793_v38 = vsel %vm5589_vm5, %v4387_v44, %v4380_v29 }
 0x89e   : > { %v4632_v14 = vmul.f32 %v4630_v12, %v5706_v16  ;;  %v4633_v46 = vmul.f32 %v4631_v22, %v5709_v17  ;;  %v4795_v16 = vmul.f32 %v4793_v38, %v5738_v39  ;;  %v4792_v17 = vsel %vm5585_vm4, %v4386_v58, %v4381_v57 }
 0x89f   : > { %v4794_v21 = vmul.f32 %v4792_v17, %v5754_v50  ;;  %v4877_v39 = vmul.f32 %v4875_v7, %v5759_v51  ;;  %v5324_v50 = vld [vmem:[%s6863_s1 + $0x190] sm:$0xff]  ;;  %v4959_v51 = vmul.f32 %v4957_v54, %v5780_v62  ;;  %v4958_v62 = vmul.f32 %v4956_v2, %v5797_v63 }
 0x8a0   : > { %4639 = vmatprep.subr.mxu1 %v4633_v46  ;;  %v5040_v63 = vmul.f32 %v5038_v26, %v5818_v15 }
 0x8a1   : > { %4640 = vmatpush1.msra.mxu1 %v4632_v14 }
 0x8a2   : > { %5321 = vmatmul.mubr.msk.f32.vlgmr.msra.gmra.mrb[4].mxu1 %vm309_vm6, %v5320_v49  ;;  %4719 = vmatprep.subr.mxu1 %v4713_v1 }
 0x8a3   : > { %4720 = vmatpush1.msra.mxu1 %v4712_v6  ;;  %4783 = vmatprep.mubr.f32.mxu1 %v5464_v5 }
 0x8a4   : > { %4801 = vmatprep.subr.mxu1 %v4795_v16 }
 0x8aa   : > { %5323 = vmatmul.mubr.msk.f32.vlgmr.msra.gmra.mrb[4].mxu1 %vm309_vm6, %v5322_v18 }
 0x8ab   : > { %4802 = vmatpush1.msra.mxu1 %v4794_v21  ;;  %4865 = vmatprep.mubr.f32.mxu1 %v5464_v5  ;;  %v5125_v25 = vpop.permute.xlu1 %5124 }
 0x8ac   : > { %4883 = vmatprep.subr.mxu1 %v4877_v39  ;;  %v5134_v24 = vpop.permute.xlu0 %5133 }
 0x8b2   : > { %5325 = vmatmul.mubr.msk.f32.vlgmr.msra.gmra.mrb[4].mxu1 %vm309_vm6, %v5324_v50 }
 0x8b3   : > { %4884 = vmatpush1.msra.mxu1 %v4876_v48  ;;  %4947 = vmatprep.mubr.f32.mxu1 %v5464_v5 }
 0x8b4   : > { %4965 = vmatprep.subr.mxu1 %v4959_v51 }
 0x8ba   : > { %5327 = vmatmul.mubr.msk.f32.vlgmr.msra.gmra.mrb[4].mxu1 %vm309_vm6, %v5326_v59 }
 0x8bb   : > { %4966 = vmatpush1.msra.mxu1 %v4958_v62  ;;  %5029 = vmatprep.mubr.f32.mxu1 %v5464_v5 }
 0x8bc   : > { %5047 = vmatprep.subr.mxu1 %v5041_v37 }
 0x8c2   : > { %5329 = vmatmul.mubr.msk.f32.vlgmr.msra.gmra.mrb[4].mxu1 %vm309_vm6, %v5328_v36 }
 0x8c3   : > { %5048 = vmatpush1.msra.mxu1 %v5040_v63  ;;  %5111 = vmatprep.mubr.f32.mxu1 %v5464_v5 }
 0x8ca   : > { %5331 = vmatmul.mubr.msk.f32.vlgmr.msra.gmra.mrb[4].mxu1 %vm309_vm6, %v5330_v32 }
 0x99d   : > { %v5113_v61 = vpop.f32.mrb[4].mxu1 }
 0x99e   : > { %v5127_v33 = vmul.f32 %v5125_v25, %v5113_v61  ;;  %v5115_v23 = vpop.f32.mrb[5].mxu1 }
 0x99f   : > { %v5128_v34 = vmul.f32 %v5125_v25, %v5115_v23 }
 0x9a0   : > { %v5136_v47 = vadd.f32 %v5134_v24, %v5127_v33 }
 0x9a1   : > { %v5137_v15 = vadd.f32 %v5134_v24, %v5128_v34 }
 0x9a2   : > { %v5138_v5 = vadd.f32 %v5136_v47, %v5835_v27 }
 0x9a3   : > { %v5139_v3 = vadd.f32 %v5137_v15, %v5837_v30 }
 0x9a4   : > { %5140 = vst [vmem:[%s197_s23] sm:$0xff] %v5138_v5 }
 0x9a5   : > { %5141 = vst [vmem:[%s197_s23 + $0x8] sm:$0xff] %v5139_v3 }
 0x9a6 PF: > { %s14_s15 = sadd.s32 1, %s5460_s15  }
 0x9a7   : > { %p11_p4 = scmp.ge.s32.totalorder %s14_s15, 4  }
 0x9a9   :  { %13 = sbr.rel (!%p11_p4) target bundleno = 1 (0x1), region = 138 }

</bundles_post_ra>
